<compile_context>
chip_gen: v7x
topology: tpu7x:2x2x1
jax: 0.10.0
libtpu: 0.0.40
codegen_flags: <defaults>
</compile_context>

<pallas_src>
import functools

import jax
import jax.numpy as jnp
from jax.experimental import pallas as pl
from jax.experimental.pallas import tpu as pltpu

HID = 64     # hidden size of both RNNs
SEQ1 = 20    # inner sequence length fed to rnn1 (input_size = 1)
SEQ2 = 10    # outer loop count == rnn2 sequence length
FEAT2 = 20   # rnn2 input size
OUT = 5      # linear3 output size


def _rrnn_kernel(x_ref, hp1_ref, hp2_ref,
                 w1i0_ref, b1l0_ref, w1h0_ref, w1i1_ref, w1h1_ref, b1l1_ref,
                 wl1_ref, bl1_ref,
                 w2i0_ref, b2l0_ref, w2h0_ref, w2i1_ref, w2h1_ref, b2l1_ref,
                 wl3_ref, bl3_ref,
                 h3_ref, hp1o_ref, hp2o_ref,
                 xw_ref, h1rows_ref, h1buf_ref, xw2_ref, g1buf_ref):
    f32 = jnp.float32
    dot = functools.partial(jnp.dot, preferred_element_type=f32)

    # ---- phase 0: loop-invariant weight loads + hoisted input term ---------
    w1h0 = w1h0_ref[...]                       # (64, 64)  W_hh0^T
    w1i1 = w1i1_ref[...]                       # (64, 64)  W_ih1^T
    w1h1 = w1h1_ref[...]                       # (64, 64)  W_hh1^T
    b1l1 = b1l1_ref[...]                       # (1, 64)
    wl1 = wl1_ref[...]                         # (1, 64)   linear1 weight
    bl1 = bl1_ref[...]                         # (1, 1)

    # Input-dependent term of rnn1 layer-0 for all 200 steps in one shot
    # (VPU outer product), removing it from the 200-step dependent chain.
    xw_ref[...] = x_ref[...] * w1i0_ref[...] + b1l0_ref[...]       # (200, 64)

    # Per-row h1 stash: rows 20..63 stay zero so the batched linear1 below
    # produces exactly zero (+bl1, annihilated later) on the padding lanes.
    h1rows_ref[...] = jnp.zeros_like(h1rows_ref)

    # ---- phase 1: rnn1, 10 rows x 20 steps; linear1 batched per row --------
    def outer(i, carry):
        h0, h1 = carry                         # (1,64) each
        base = i * SEQ1
        for t in range(SEQ1):                  # fully unrolled
            xw_t = xw_ref[pl.ds(base + t, 1), :]
            # layer 0: only the K=64 hidden matmul is on the serial chain.
            h0 = jnp.tanh(xw_t + dot(h0, w1h0))
            # layer 1: split K=64 matmuls; the h1-half is independent of h0_t.
            h1 = jnp.tanh(dot(h0, w1i1) + dot(h1, w1h1) + b1l1)
            h1rows_ref[pl.ds(t, 1), :] = h1    # off the critical path
        # linear1 over the whole row in one transposed matmul:
        # (1,64) x (64,64 contracted on lanes) -> (1,64); lanes 20..63 = bl1
        # (later multiplied by zero rows of w2i0, so harmless).
        y_row = jax.lax.dot_general(
            wl1, h1rows_ref[...], (((1,), (1,)), ((), ())),
            preferred_element_type=f32) + bl1
        h1buf_ref[pl.ds(i, 1), :] = y_row
        return (h0, h1)

    h0, h1 = jax.lax.fori_loop(0, SEQ2, outer,
                               (hp1_ref[0:1, :], hp1_ref[1:2, :]))
    hp1o_ref[0:1, :] = h0
    hp1o_ref[1:2, :] = h1

    # ---- phase 2: rnn2 + linear3 --------------------------------------------
    w2h0 = w2h0_ref[...]                       # (64, 64)  W_hh0^T
    w2i1 = w2i1_ref[...]                       # (64, 64)  W_ih1^T
    w2h1 = w2h1_ref[...]                       # (64, 64)  W_hh1^T
    b2l1 = b2l1_ref[...]                       # (1, 64)

    # Hoisted layer-0 input term for all 10 steps: one (10,64)@(64,64) matmul
    # (rows 20..63 of w2i0 are zero -> padding lanes of h1buf are annihilated).
    xw2_ref[...] = dot(h1buf_ref[...], w2i0_ref[...]) + b2l0_ref[...]

    g0 = hp2_ref[0:1, :]
    g1 = hp2_ref[1:2, :]
    for t in range(SEQ2):                      # fully unrolled
        g0 = jnp.tanh(xw2_ref[pl.ds(t, 1), :] + dot(g0, w2h0))
        g1 = jnp.tanh(dot(g0, w2i1) + dot(g1, w2h1) + b2l1)
        g1buf_ref[pl.ds(t, 1), :] = g1
    hp2o_ref[0:1, :] = g0
    hp2o_ref[1:2, :] = g1

    # linear3 batched: one (10,64)@(64,5) matmul and a single store.
    h3_ref[...] = dot(g1buf_ref[...], wl3_ref[...]) + bl3_ref[...]


def rrnn_forward(kp, x, hp1, hp2):
    """x: (1,10,20), hp1/hp2: (2,1,64)  ->  h3 (10,1,5), hp1 (2,1,64), hp2 (2,1,64)."""
    x_col = x.reshape(SEQ2 * SEQ1, 1).astype(jnp.float32)
    hp1_2 = hp1.reshape(2, HID).astype(jnp.float32)
    hp2_2 = hp2.reshape(2, HID).astype(jnp.float32)

    vmem = pl.BlockSpec(memory_space=pltpu.MemorySpace.VMEM)

    args = (x_col, hp1_2, hp2_2,
            kp['w1i0'], kp['b1l0'], kp['w1h0'], kp['w1i1'], kp['w1h1'], kp['b1l1'],
            kp['wl1'], kp['bl1'],
            kp['w2i0'], kp['b2l0'], kp['w2h0'], kp['w2i1'], kp['w2h1'], kp['b2l1'],
            kp['wl3'], kp['bl3'])

    h3, hp1o, hp2o = pl.pallas_call(
        _rrnn_kernel,
        out_shape=(jax.ShapeDtypeStruct((SEQ2, OUT), jnp.float32),
                   jax.ShapeDtypeStruct((2, HID), jnp.float32),
                   jax.ShapeDtypeStruct((2, HID), jnp.float32)),
        in_specs=[vmem] * len(args),
        out_specs=(vmem, vmem, vmem),
        scratch_shapes=[pltpu.VMEM((SEQ2 * SEQ1, HID), jnp.float32),   # xw
                        pltpu.VMEM((HID, HID), jnp.float32),           # h1rows
                        pltpu.VMEM((SEQ2, HID), jnp.float32),          # h1buf
                        pltpu.VMEM((SEQ2, HID), jnp.float32),          # xw2
                        pltpu.VMEM((SEQ2, HID), jnp.float32)],         # g1buf
    )(*args)

    return (h3.reshape(SEQ2, 1, OUT),
            hp1o.reshape(2, 1, HID),
            hp2o.reshape(2, 1, HID))


# ----------------------------------------------------------------------------
# Parameters (PyTorch layout) and the kernel layout derived from them.
# ----------------------------------------------------------------------------
def init_raw_params(key):
    """PyTorch-style uniform(-1/sqrt(64), 1/sqrt(64)) init, PyTorch layouts."""
    ks = jax.random.split(key, 20)
    bound = HID ** -0.5

    def u(k, shape):
        return jax.random.uniform(k, shape, jnp.float32, -bound, bound)

    p = {}
    # rnn1 (input_size=1, hidden=64, 2 layers)
    p['r1_wi0'] = u(ks[0], (HID, 1));     p['r1_wh0'] = u(ks[1], (HID, HID))
    p['r1_bi0'] = u(ks[2], (HID,));       p['r1_bh0'] = u(ks[3], (HID,))
    p['r1_wi1'] = u(ks[4], (HID, HID));   p['r1_wh1'] = u(ks[5], (HID, HID))
    p['r1_bi1'] = u(ks[6], (HID,));       p['r1_bh1'] = u(ks[7], (HID,))
    # rnn2 (input_size=20, hidden=64, 2 layers)
    p['r2_wi0'] = u(ks[8], (HID, FEAT2)); p['r2_wh0'] = u(ks[9], (HID, HID))
    p['r2_bi0'] = u(ks[10], (HID,));      p['r2_bh0'] = u(ks[11], (HID,))
    p['r2_wi1'] = u(ks[12], (HID, HID));  p['r2_wh1'] = u(ks[13], (HID, HID))
    p['r2_bi1'] = u(ks[14], (HID,));      p['r2_bh1'] = u(ks[15], (HID,))
    # linear1 (64 -> 1), linear3 (64 -> 5)
    p['l1_w'] = u(ks[16], (1, HID));      p['l1_b'] = u(ks[17], (1,))
    p['l3_w'] = u(ks[18], (OUT, HID));    p['l3_b'] = u(ks[19], (OUT,))
    # TODO(synk): linear2 (nn.Linear(20,5)) exists in __init__ but is never used
    # in forward, so it is omitted.
    return p


def fuse_params(raw):
    """Build the transposed / padded weights the kernel consumes."""
    f32 = jnp.float32
    p = {}
    # rnn1 layer 0
    p['w1i0'] = raw['r1_wi0'].T.astype(f32)                              # (1, 64)
    p['b1l0'] = (raw['r1_bi0'] + raw['r1_bh0']).reshape(1, HID).astype(f32)
    p['w1h0'] = raw['r1_wh0'].T.astype(f32)                              # (64, 64)
    # rnn1 layer 1 (split)
    p['w1i1'] = raw['r1_wi1'].T.astype(f32)                              # (64, 64)
    p['w1h1'] = raw['r1_wh1'].T.astype(f32)                              # (64, 64)
    p['b1l1'] = (raw['r1_bi1'] + raw['r1_bh1']).reshape(1, HID).astype(f32)
    # linear1
    p['wl1'] = raw['l1_w'].astype(f32)                                   # (1, 64)
    p['bl1'] = raw['l1_b'].reshape(1, 1).astype(f32)
    # rnn2 layer 0: input weight padded to 64 input lanes (rows 20..63 zero)
    p['w2i0'] = jnp.concatenate(
        [raw['r2_wi0'].T, jnp.zeros((HID - FEAT2, HID), f32)], axis=0).astype(f32)
    p['b2l0'] = (raw['r2_bi0'] + raw['r2_bh0']).reshape(1, HID).astype(f32)
    p['w2h0'] = raw['r2_wh0'].T.astype(f32)                              # (64, 64)
    # rnn2 layer 1 (split)
    p['w2i1'] = raw['r2_wi1'].T.astype(f32)                              # (64, 64)
    p['w2h1'] = raw['r2_wh1'].T.astype(f32)                              # (64, 64)
    p['b2l1'] = (raw['r2_bi1'] + raw['r2_bh1']).reshape(1, HID).astype(f32)
    # linear3
    p['wl3'] = raw['l3_w'].T.astype(f32)                                 # (64, 5)
    p['bl3'] = raw['l3_b'].reshape(1, OUT).astype(f32)
    return p


def rrnn_reference(raw, x, hp1, hp2):
    """Pure-JAX transcription of the PyTorch forward (correctness check)."""
    f32 = jnp.float32
    hi = jax.lax.Precision.HIGHEST
    x = x.reshape(SEQ2, SEQ1).astype(f32)

    def cell(wi, wh, bi, bh, xt, h):
        return jnp.tanh(jnp.dot(xt, wi.T, precision=hi)
                        + jnp.dot(h, wh.T, precision=hi) + bi + bh)

    h0, h1 = hp1[0].astype(f32), hp1[1].astype(f32)
    rows = []
    for i in range(SEQ2):
        row = []
        for t in range(SEQ1):
            xt = x[i, t].reshape(1, 1)
            h0 = cell(raw['r1_wi0'], raw['r1_wh0'], raw['r1_bi0'], raw['r1_bh0'], xt, h0)
            h1 = cell(raw['r1_wi1'], raw['r1_wh1'], raw['r1_bi1'], raw['r1_bh1'], h0, h1)
            row.append((jnp.dot(h1, raw['l1_w'].T, precision=hi) + raw['l1_b'])[0, 0])
        rows.append(jnp.stack(row))
    h1buf = jnp.stack(rows)                                   # (10, 20)

    g0, g1 = hp2[0].astype(f32), hp2[1].astype(f32)
    outs = []
    for t in range(SEQ2):
        xt = h1buf[t].reshape(1, FEAT2)
        g0 = cell(raw['r2_wi0'], raw['r2_wh0'], raw['r2_bi0'], raw['r2_bh0'], xt, g0)
        g1 = cell(raw['r2_wi1'], raw['r2_wh1'], raw['r2_bi1'], raw['r2_bh1'], g0, g1)
        outs.append(jnp.dot(g1, raw['l3_w'].T, precision=hi) + raw['l3_b'])
    h3 = jnp.stack(outs)                                      # (10, 1, 5)
    return h3, jnp.stack([h0, h1]), jnp.stack([g0, g1])


if __name__ == "__main__":
    key = jax.random.PRNGKey(0)
    kpar, kx, k1, k2 = jax.random.split(key, 4)
    raw = init_raw_params(kpar)
    kparams = fuse_params(raw)

    x = jax.random.normal(kx, (1, SEQ2, FEAT2), jnp.float32)     # (1, 10, 20)
    hp1 = jax.random.normal(k1, (2, 1, HID), jnp.float32)        # (2, 1, 64)
    hp2 = jax.random.normal(k2, (2, 1, HID), jnp.float32)        # (2, 1, 64)

    h3, hp1o, hp2o = jax.jit(rrnn_forward)(kparams, x, hp1, hp2)
    jax.block_until_ready((h3, hp1o, hp2o))

    assert h3.shape == (SEQ2, 1, OUT)
    assert hp1o.shape == (2, 1, HID)
    assert hp2o.shape == (2, 1, HID)
    assert bool(jnp.all(jnp.isfinite(h3)))

    # Compare against a pure-JAX (HIGHEST-precision) reference of the forward.
    r_h3, r_hp1, r_hp2 = jax.jit(rrnn_reference)(raw, x, hp1, hp2)
    err = max(float(jnp.max(jnp.abs(h3 - r_h3))),
              float(jnp.max(jnp.abs(hp1o - r_hp1))),
              float(jnp.max(jnp.abs(hp2o - r_hp2))))
    assert err < 1e-4, f"max abs error vs reference: {err}"

    print("KERNEL_OK")
</pallas_src>

<mosaic_0001>
module attributes {stable_mosaic.version = 11 : i64} {
  func.func @_rrnn_kernel(%arg0: memref<200x1xf32, #tpu.memory_space<vmem>>, %arg1: memref<2x64xf32, #tpu.memory_space<vmem>>, %arg2: memref<2x64xf32, #tpu.memory_space<vmem>>, %arg3: memref<1x64xf32, #tpu.memory_space<vmem>>, %arg4: memref<1x64xf32, #tpu.memory_space<vmem>>, %arg5: memref<64x64xf32, #tpu.memory_space<vmem>>, %arg6: memref<64x64xf32, #tpu.memory_space<vmem>>, %arg7: memref<64x64xf32, #tpu.memory_space<vmem>>, %arg8: memref<1x64xf32, #tpu.memory_space<vmem>>, %arg9: memref<1x64xf32, #tpu.memory_space<vmem>>, %arg10: memref<1x1xf32, #tpu.memory_space<vmem>>, %arg11: memref<64x64xf32, #tpu.memory_space<vmem>>, %arg12: memref<1x64xf32, #tpu.memory_space<vmem>>, %arg13: memref<64x64xf32, #tpu.memory_space<vmem>>, %arg14: memref<64x64xf32, #tpu.memory_space<vmem>>, %arg15: memref<64x64xf32, #tpu.memory_space<vmem>>, %arg16: memref<1x64xf32, #tpu.memory_space<vmem>>, %arg17: memref<64x5xf32, #tpu.memory_space<vmem>>, %arg18: memref<1x5xf32, #tpu.memory_space<vmem>>, %arg19: memref<10x5xf32, #tpu.memory_space<vmem>>, %arg20: memref<2x64xf32, #tpu.memory_space<vmem>>, %arg21: memref<2x64xf32, #tpu.memory_space<vmem>>, %arg22: memref<200x64xf32, #tpu.memory_space<vmem>>, %arg23: memref<64x64xf32, #tpu.memory_space<vmem>>, %arg24: memref<10x64xf32, #tpu.memory_space<vmem>>, %arg25: memref<10x64xf32, #tpu.memory_space<vmem>>, %arg26: memref<10x64xf32, #tpu.memory_space<vmem>>) attributes {dimension_semantics = [], scalar_prefetch = 0 : i64, scratch_operands = 5 : i64, tpu.core_type = #tpu.core_type<tc>} {
    %c0 = arith.constant 0 : index
    %c0_0 = arith.constant 0 : index
    %0 = vector.load %arg5[%c0, %c0_0] : memref<64x64xf32, #tpu.memory_space<vmem>>, vector<64x64xf32>
    %c0_1 = arith.constant 0 : index
    %c0_2 = arith.constant 0 : index
    %1 = vector.load %arg6[%c0_1, %c0_2] : memref<64x64xf32, #tpu.memory_space<vmem>>, vector<64x64xf32>
    %c0_3 = arith.constant 0 : index
    %c0_4 = arith.constant 0 : index
    %2 = vector.load %arg7[%c0_3, %c0_4] : memref<64x64xf32, #tpu.memory_space<vmem>>, vector<64x64xf32>
    %c0_5 = arith.constant 0 : index
    %c0_6 = arith.constant 0 : index
    %3 = vector.load %arg8[%c0_5, %c0_6] : memref<1x64xf32, #tpu.memory_space<vmem>>, vector<1x64xf32>
    %c0_7 = arith.constant 0 : index
    %c0_8 = arith.constant 0 : index
    %4 = vector.load %arg9[%c0_7, %c0_8] : memref<1x64xf32, #tpu.memory_space<vmem>>, vector<1x64xf32>
    %c0_9 = arith.constant 0 : index
    %c0_10 = arith.constant 0 : index
    %5 = vector.load %arg10[%c0_9, %c0_10] : memref<1x1xf32, #tpu.memory_space<vmem>>, vector<1x1xf32>
    %c0_11 = arith.constant 0 : index
    %c0_12 = arith.constant 0 : index
    %6 = vector.load %arg0[%c0_11, %c0_12] : memref<200x1xf32, #tpu.memory_space<vmem>>, vector<200x1xf32>
    %c0_13 = arith.constant 0 : index
    %c0_14 = arith.constant 0 : index
    %7 = vector.load %arg3[%c0_13, %c0_14] : memref<1x64xf32, #tpu.memory_space<vmem>>, vector<1x64xf32>
    %8 = vector.broadcast %6 : vector<200x1xf32> to vector<200x64xf32>
    %9 = vector.broadcast %7 : vector<1x64xf32> to vector<200x64xf32>
    %10 = arith.mulf %8, %9 : vector<200x64xf32>
    %c0_15 = arith.constant 0 : index
    %c0_16 = arith.constant 0 : index
    %11 = vector.load %arg4[%c0_15, %c0_16] : memref<1x64xf32, #tpu.memory_space<vmem>>, vector<1x64xf32>
    %12 = vector.broadcast %11 : vector<1x64xf32> to vector<200x64xf32>
    %13 = arith.addf %10, %12 : vector<200x64xf32>
    %c0_17 = arith.constant 0 : index
    %c0_18 = arith.constant 0 : index
    %14 = vector.load %arg22[%c0_17, %c0_18] : memref<200x64xf32, #tpu.memory_space<vmem>>, vector<200x64xf32>
    tpu.vector_store %arg22[%c0_17, %c0_18], %13 {strides = array<i32>} : memref<200x64xf32, #tpu.memory_space<vmem>>, vector<200x64xf32>,
    %cst = arith.constant 0.000000e+00 : f32
    %15 = vector.broadcast %cst : f32 to vector<64x64xf32>
    %c0_19 = arith.constant 0 : index
    %c0_20 = arith.constant 0 : index
    %16 = vector.load %arg23[%c0_19, %c0_20] : memref<64x64xf32, #tpu.memory_space<vmem>>, vector<64x64xf32>
    tpu.vector_store %arg23[%c0_19, %c0_20], %15 {strides = array<i32>} : memref<64x64xf32, #tpu.memory_space<vmem>>, vector<64x64xf32>,
    %c0_21 = arith.constant 0 : index
    %c0_22 = arith.constant 0 : index
    %17 = vector.load %arg1[%c0_21, %c0_22] : memref<2x64xf32, #tpu.memory_space<vmem>>, vector<1x64xf32>
    %c1 = arith.constant 1 : index
    %c0_23 = arith.constant 0 : index
    %18 = vector.load %arg1[%c1, %c0_23] : memref<2x64xf32, #tpu.memory_space<vmem>>, vector<1x64xf32>
    %c0_i32 = arith.constant 0 : i32
    %c10_i32 = arith.constant 10 : i32
    %19 = arith.addi %c0_i32, %c10_i32 : i32
    %c1_i32 = arith.constant 1 : i32
    %20:2 = scf.for %arg27 = %c0_i32 to %19 step %c1_i32 iter_args(%arg28 = %17, %arg29 = %18) -> (vector<1x64xf32>, vector<1x64xf32>)  : i32 {
      %c20_i32 = arith.constant 20 : i32
      %145 = arith.muli %arg27, %c20_i32 : i32
      %c0_i32_125 = arith.constant 0 : i32
      %146 = arith.addi %145, %c0_i32_125 : i32
      %147 = arith.index_cast %146 : i32 to index
      %c0_126 = arith.constant 0 : index
      %148 = vector.load %arg22[%147, %c0_126] : memref<200x64xf32, #tpu.memory_space<vmem>>, vector<1x64xf32>
      %cst_127 = arith.constant dense<0.000000e+00> : vector<1x64xf32>
      %149 = tpu.matmul %arg28, %0, %cst_127 {dimension_numbers = #tpu.dot_dimension_numbers<[1], [0], [0], [1], [0, 0, 1, 1], [], []>} : vector<1x64xf32>, vector<64x64xf32>, vector<1x64xf32> -> vector<1x64xf32>
      %150 = arith.addf %148, %149 : vector<1x64xf32>
      %151 = math.tanh %150 : vector<1x64xf32>
      %cst_128 = arith.constant dense<0.000000e+00> : vector<1x64xf32>
      %152 = tpu.matmul %151, %1, %cst_128 {dimension_numbers = #tpu.dot_dimension_numbers<[1], [0], [0], [1], [0, 0, 1, 1], [], []>} : vector<1x64xf32>, vector<64x64xf32>, vector<1x64xf32> -> vector<1x64xf32>
      %cst_129 = arith.constant dense<0.000000e+00> : vector<1x64xf32>
      %153 = tpu.matmul %arg29, %2, %cst_129 {dimension_numbers = #tpu.dot_dimension_numbers<[1], [0], [0], [1], [0, 0, 1, 1], [], []>} : vector<1x64xf32>, vector<64x64xf32>, vector<1x64xf32> -> vector<1x64xf32>
      %154 = arith.addf %152, %153 : vector<1x64xf32>
      %155 = arith.addf %154, %3 : vector<1x64xf32>
      %156 = math.tanh %155 : vector<1x64xf32>
      %c0_130 = arith.constant 0 : index
      %c0_131 = arith.constant 0 : index
      %157 = vector.load %arg23[%c0_130, %c0_131] : memref<64x64xf32, #tpu.memory_space<vmem>>, vector<1x64xf32>
      tpu.vector_store %arg23[%c0_130, %c0_131], %156 {strides = array<i32>} : memref<64x64xf32, #tpu.memory_space<vmem>>, vector<1x64xf32>,
      %c1_i32_132 = arith.constant 1 : i32
      %158 = arith.addi %145, %c1_i32_132 : i32
      %159 = arith.index_cast %158 : i32 to index
      %c0_133 = arith.constant 0 : index
      %160 = vector.load %arg22[%159, %c0_133] : memref<200x64xf32, #tpu.memory_space<vmem>>, vector<1x64xf32>
      %cst_134 = arith.constant dense<0.000000e+00> : vector<1x64xf32>
      %161 = tpu.matmul %151, %0, %cst_134 {dimension_numbers = #tpu.dot_dimension_numbers<[1], [0], [0], [1], [0, 0, 1, 1], [], []>} : vector<1x64xf32>, vector<64x64xf32>, vector<1x64xf32> -> vector<1x64xf32>
      %162 = arith.addf %160, %161 : vector<1x64xf32>
      %163 = math.tanh %162 : vector<1x64xf32>
      %cst_135 = arith.constant dense<0.000000e+00> : vector<1x64xf32>
      %164 = tpu.matmul %163, %1, %cst_135 {dimension_numbers = #tpu.dot_dimension_numbers<[1], [0], [0], [1], [0, 0, 1, 1], [], []>} : vector<1x64xf32>, vector<64x64xf32>, vector<1x64xf32> -> vector<1x64xf32>
      %cst_136 = arith.constant dense<0.000000e+00> : vector<1x64xf32>
      %165 = tpu.matmul %156, %2, %cst_136 {dimension_numbers = #tpu.dot_dimension_numbers<[1], [0], [0], [1], [0, 0, 1, 1], [], []>} : vector<1x64xf32>, vector<64x64xf32>, vector<1x64xf32> -> vector<1x64xf32>
      %166 = arith.addf %164, %165 : vector<1x64xf32>
      %167 = arith.addf %166, %3 : vector<1x64xf32>
      %168 = math.tanh %167 : vector<1x64xf32>
      %c1_137 = arith.constant 1 : index
      %c0_138 = arith.constant 0 : index
      %169 = vector.load %arg23[%c1_137, %c0_138] : memref<64x64xf32, #tpu.memory_space<vmem>>, vector<1x64xf32>
      tpu.vector_store %arg23[%c1_137, %c0_138], %168 {strides = array<i32>} : memref<64x64xf32, #tpu.memory_space<vmem>>, vector<1x64xf32>,
      %c2_i32 = arith.constant 2 : i32
      %170 = arith.addi %145, %c2_i32 : i32
      %171 = arith.index_cast %170 : i32 to index
      %c0_139 = arith.constant 0 : index
      %172 = vector.load %arg22[%171, %c0_139] : memref<200x64xf32, #tpu.memory_space<vmem>>, vector<1x64xf32>
      %cst_140 = arith.constant dense<0.000000e+00> : vector<1x64xf32>
      %173 = tpu.matmul %163, %0, %cst_140 {dimension_numbers = #tpu.dot_dimension_numbers<[1], [0], [0], [1], [0, 0, 1, 1], [], []>} : vector<1x64xf32>, vector<64x64xf32>, vector<1x64xf32> -> vector<1x64xf32>
      %174 = arith.addf %172, %173 : vector<1x64xf32>
      %175 = math.tanh %174 : vector<1x64xf32>
      %cst_141 = arith.constant dense<0.000000e+00> : vector<1x64xf32>
      %176 = tpu.matmul %175, %1, %cst_141 {dimension_numbers = #tpu.dot_dimension_numbers<[1], [0], [0], [1], [0, 0, 1, 1], [], []>} : vector<1x64xf32>, vector<64x64xf32>, vector<1x64xf32> -> vector<1x64xf32>
      %cst_142 = arith.constant dense<0.000000e+00> : vector<1x64xf32>
      %177 = tpu.matmul %168, %2, %cst_142 {dimension_numbers = #tpu.dot_dimension_numbers<[1], [0], [0], [1], [0, 0, 1, 1], [], []>} : vector<1x64xf32>, vector<64x64xf32>, vector<1x64xf32> -> vector<1x64xf32>
      %178 = arith.addf %176, %177 : vector<1x64xf32>
      %179 = arith.addf %178, %3 : vector<1x64xf32>
      %180 = math.tanh %179 : vector<1x64xf32>
      %c2_143 = arith.constant 2 : index
      %c0_144 = arith.constant 0 : index
      %181 = vector.load %arg23[%c2_143, %c0_144] : memref<64x64xf32, #tpu.memory_space<vmem>>, vector<1x64xf32>
      tpu.vector_store %arg23[%c2_143, %c0_144], %180 {strides = array<i32>} : memref<64x64xf32, #tpu.memory_space<vmem>>, vector<1x64xf32>,
      %c3_i32 = arith.constant 3 : i32
      %182 = arith.addi %145, %c3_i32 : i32
      %183 = arith.index_cast %182 : i32 to index
      %c0_145 = arith.constant 0 : index
      %184 = vector.load %arg22[%183, %c0_145] : memref<200x64xf32, #tpu.memory_space<vmem>>, vector<1x64xf32>
      %cst_146 = arith.constant dense<0.000000e+00> : vector<1x64xf32>
      %185 = tpu.matmul %175, %0, %cst_146 {dimension_numbers = #tpu.dot_dimension_numbers<[1], [0], [0], [1], [0, 0, 1, 1], [], []>} : vector<1x64xf32>, vector<64x64xf32>, vector<1x64xf32> -> vector<1x64xf32>
      %186 = arith.addf %184, %185 : vector<1x64xf32>
      %187 = math.tanh %186 : vector<1x64xf32>
      %cst_147 = arith.constant dense<0.000000e+00> : vector<1x64xf32>
      %188 = tpu.matmul %187, %1, %cst_147 {dimension_numbers = #tpu.dot_dimension_numbers<[1], [0], [0], [1], [0, 0, 1, 1], [], []>} : vector<1x64xf32>, vector<64x64xf32>, vector<1x64xf32> -> vector<1x64xf32>
      %cst_148 = arith.constant dense<0.000000e+00> : vector<1x64xf32>
      %189 = tpu.matmul %180, %2, %cst_148 {dimension_numbers = #tpu.dot_dimension_numbers<[1], [0], [0], [1], [0, 0, 1, 1], [], []>} : vector<1x64xf32>, vector<64x64xf32>, vector<1x64xf32> -> vector<1x64xf32>
      %190 = arith.addf %188, %189 : vector<1x64xf32>
      %191 = arith.addf %190, %3 : vector<1x64xf32>
      %192 = math.tanh %191 : vector<1x64xf32>
      %c3_149 = arith.constant 3 : index
      %c0_150 = arith.constant 0 : index
      %193 = vector.load %arg23[%c3_149, %c0_150] : memref<64x64xf32, #tpu.memory_space<vmem>>, vector<1x64xf32>
      tpu.vector_store %arg23[%c3_149, %c0_150], %192 {strides = array<i32>} : memref<64x64xf32, #tpu.memory_space<vmem>>, vector<1x64xf32>,
      %c4_i32 = arith.constant 4 : i32
      %194 = arith.addi %145, %c4_i32 : i32
      %195 = arith.index_cast %194 : i32 to index
      %c0_151 = arith.constant 0 : index
      %196 = vector.load %arg22[%195, %c0_151] : memref<200x64xf32, #tpu.memory_space<vmem>>, vector<1x64xf32>
      %cst_152 = arith.constant dense<0.000000e+00> : vector<1x64xf32>
      %197 = tpu.matmul %187, %0, %cst_152 {dimension_numbers = #tpu.dot_dimension_numbers<[1], [0], [0], [1], [0, 0, 1, 1], [], []>} : vector<1x64xf32>, vector<64x64xf32>, vector<1x64xf32> -> vector<1x64xf32>
      %198 = arith.addf %196, %197 : vector<1x64xf32>
      %199 = math.tanh %198 : vector<1x64xf32>
      %cst_153 = arith.constant dense<0.000000e+00> : vector<1x64xf32>
      %200 = tpu.matmul %199, %1, %cst_153 {dimension_numbers = #tpu.dot_dimension_numbers<[1], [0], [0], [1], [0, 0, 1, 1], [], []>} : vector<1x64xf32>, vector<64x64xf32>, vector<1x64xf32> -> vector<1x64xf32>
      %cst_154 = arith.constant dense<0.000000e+00> : vector<1x64xf32>
      %201 = tpu.matmul %192, %2, %cst_154 {dimension_numbers = #tpu.dot_dimension_numbers<[1], [0], [0], [1], [0, 0, 1, 1], [], []>} : vector<1x64xf32>, vector<64x64xf32>, vector<1x64xf32> -> vector<1x64xf32>
      %202 = arith.addf %200, %201 : vector<1x64xf32>
      %203 = arith.addf %202, %3 : vector<1x64xf32>
      %204 = math.tanh %203 : vector<1x64xf32>
      %c4_155 = arith.constant 4 : index
      %c0_156 = arith.constant 0 : index
      %205 = vector.load %arg23[%c4_155, %c0_156] : memref<64x64xf32, #tpu.memory_space<vmem>>, vector<1x64xf32>
      tpu.vector_store %arg23[%c4_155, %c0_156], %204 {strides = array<i32>} : memref<64x64xf32, #tpu.memory_space<vmem>>, vector<1x64xf32>,
      %c5_i32 = arith.constant 5 : i32
      %206 = arith.addi %145, %c5_i32 : i32
      %207 = arith.index_cast %206 : i32 to index
      %c0_157 = arith.constant 0 : index
      %208 = vector.load %arg22[%207, %c0_157] : memref<200x64xf32, #tpu.memory_space<vmem>>, vector<1x64xf32>
      %cst_158 = arith.constant dense<0.000000e+00> : vector<1x64xf32>
      %209 = tpu.matmul %199, %0, %cst_158 {dimension_numbers = #tpu.dot_dimension_numbers<[1], [0], [0], [1], [0, 0, 1, 1], [], []>} : vector<1x64xf32>, vector<64x64xf32>, vector<1x64xf32> -> vector<1x64xf32>
      %210 = arith.addf %208, %209 : vector<1x64xf32>
      %211 = math.tanh %210 : vector<1x64xf32>
      %cst_159 = arith.constant dense<0.000000e+00> : vector<1x64xf32>
      %212 = tpu.matmul %211, %1, %cst_159 {dimension_numbers = #tpu.dot_dimension_numbers<[1], [0], [0], [1], [0, 0, 1, 1], [], []>} : vector<1x64xf32>, vector<64x64xf32>, vector<1x64xf32> -> vector<1x64xf32>
      %cst_160 = arith.constant dense<0.000000e+00> : vector<1x64xf32>
      %213 = tpu.matmul %204, %2, %cst_160 {dimension_numbers = #tpu.dot_dimension_numbers<[1], [0], [0], [1], [0, 0, 1, 1], [], []>} : vector<1x64xf32>, vector<64x64xf32>, vector<1x64xf32> -> vector<1x64xf32>
      %214 = arith.addf %212, %213 : vector<1x64xf32>
      %215 = arith.addf %214, %3 : vector<1x64xf32>
      %216 = math.tanh %215 : vector<1x64xf32>
      %c5_161 = arith.constant 5 : index
      %c0_162 = arith.constant 0 : index
      %217 = vector.load %arg23[%c5_161, %c0_162] : memref<64x64xf32, #tpu.memory_space<vmem>>, vector<1x64xf32>
      tpu.vector_store %arg23[%c5_161, %c0_162], %216 {strides = array<i32>} : memref<64x64xf32, #tpu.memory_space<vmem>>, vector<1x64xf32>,
      %c6_i32 = arith.constant 6 : i32
      %218 = arith.addi %145, %c6_i32 : i32
      %219 = arith.index_cast %218 : i32 to index
      %c0_163 = arith.constant 0 : index
      %220 = vector.load %arg22[%219, %c0_163] : memref<200x64xf32, #tpu.memory_space<vmem>>, vector<1x64xf32>
      %cst_164 = arith.constant dense<0.000000e+00> : vector<1x64xf32>
      %221 = tpu.matmul %211, %0, %cst_164 {dimension_numbers = #tpu.dot_dimension_numbers<[1], [0], [0], [1], [0, 0, 1, 1], [], []>} : vector<1x64xf32>, vector<64x64xf32>, vector<1x64xf32> -> vector<1x64xf32>
      %222 = arith.addf %220, %221 : vector<1x64xf32>
      %223 = math.tanh %222 : vector<1x64xf32>
      %cst_165 = arith.constant dense<0.000000e+00> : vector<1x64xf32>
      %224 = tpu.matmul %223, %1, %cst_165 {dimension_numbers = #tpu.dot_dimension_numbers<[1], [0], [0], [1], [0, 0, 1, 1], [], []>} : vector<1x64xf32>, vector<64x64xf32>, vector<1x64xf32> -> vector<1x64xf32>
      %cst_166 = arith.constant dense<0.000000e+00> : vector<1x64xf32>
      %225 = tpu.matmul %216, %2, %cst_166 {dimension_numbers = #tpu.dot_dimension_numbers<[1], [0], [0], [1], [0, 0, 1, 1], [], []>} : vector<1x64xf32>, vector<64x64xf32>, vector<1x64xf32> -> vector<1x64xf32>
      %226 = arith.addf %224, %225 : vector<1x64xf32>
      %227 = arith.addf %226, %3 : vector<1x64xf32>
      %228 = math.tanh %227 : vector<1x64xf32>
      %c6_167 = arith.constant 6 : index
      %c0_168 = arith.constant 0 : index
      %229 = vector.load %arg23[%c6_167, %c0_168] : memref<64x64xf32, #tpu.memory_space<vmem>>, vector<1x64xf32>
      tpu.vector_store %arg23[%c6_167, %c0_168], %228 {strides = array<i32>} : memref<64x64xf32, #tpu.memory_space<vmem>>, vector<1x64xf32>,
      %c7_i32 = arith.constant 7 : i32
      %230 = arith.addi %145, %c7_i32 : i32
      %231 = arith.index_cast %230 : i32 to index
      %c0_169 = arith.constant 0 : index
      %232 = vector.load %arg22[%231, %c0_169] : memref<200x64xf32, #tpu.memory_space<vmem>>, vector<1x64xf32>
      %cst_170 = arith.constant dense<0.000000e+00> : vector<1x64xf32>
      %233 = tpu.matmul %223, %0, %cst_170 {dimension_numbers = #tpu.dot_dimension_numbers<[1], [0], [0], [1], [0, 0, 1, 1], [], []>} : vector<1x64xf32>, vector<64x64xf32>, vector<1x64xf32> -> vector<1x64xf32>
      %234 = arith.addf %232, %233 : vector<1x64xf32>
      %235 = math.tanh %234 : vector<1x64xf32>
      %cst_171 = arith.constant dense<0.000000e+00> : vector<1x64xf32>
      %236 = tpu.matmul %235, %1, %cst_171 {dimension_numbers = #tpu.dot_dimension_numbers<[1], [0], [0], [1], [0, 0, 1, 1], [], []>} : vector<1x64xf32>, vector<64x64xf32>, vector<1x64xf32> -> vector<1x64xf32>
      %cst_172 = arith.constant dense<0.000000e+00> : vector<1x64xf32>
      %237 = tpu.matmul %228, %2, %cst_172 {dimension_numbers = #tpu.dot_dimension_numbers<[1], [0], [0], [1], [0, 0, 1, 1], [], []>} : vector<1x64xf32>, vector<64x64xf32>, vector<1x64xf32> -> vector<1x64xf32>
      %238 = arith.addf %236, %237 : vector<1x64xf32>
      %239 = arith.addf %238, %3 : vector<1x64xf32>
      %240 = math.tanh %239 : vector<1x64xf32>
      %c7_173 = arith.constant 7 : index
      %c0_174 = arith.constant 0 : index
      %241 = vector.load %arg23[%c7_173, %c0_174] : memref<64x64xf32, #tpu.memory_space<vmem>>, vector<1x64xf32>
      tpu.vector_store %arg23[%c7_173, %c0_174], %240 {strides = array<i32>} : memref<64x64xf32, #tpu.memory_space<vmem>>, vector<1x64xf32>,
      %c8_i32 = arith.constant 8 : i32
      %242 = arith.addi %145, %c8_i32 : i32
      %243 = arith.index_cast %242 : i32 to index
      %c0_175 = arith.constant 0 : index
      %244 = vector.load %arg22[%243, %c0_175] : memref<200x64xf32, #tpu.memory_space<vmem>>, vector<1x64xf32>
      %cst_176 = arith.constant dense<0.000000e+00> : vector<1x64xf32>
      %245 = tpu.matmul %235, %0, %cst_176 {dimension_numbers = #tpu.dot_dimension_numbers<[1], [0], [0], [1], [0, 0, 1, 1], [], []>} : vector<1x64xf32>, vector<64x64xf32>, vector<1x64xf32> -> vector<1x64xf32>
      %246 = arith.addf %244, %245 : vector<1x64xf32>
      %247 = math.tanh %246 : vector<1x64xf32>
      %cst_177 = arith.constant dense<0.000000e+00> : vector<1x64xf32>
      %248 = tpu.matmul %247, %1, %cst_177 {dimension_numbers = #tpu.dot_dimension_numbers<[1], [0], [0], [1], [0, 0, 1, 1], [], []>} : vector<1x64xf32>, vector<64x64xf32>, vector<1x64xf32> -> vector<1x64xf32>
      %cst_178 = arith.constant dense<0.000000e+00> : vector<1x64xf32>
      %249 = tpu.matmul %240, %2, %cst_178 {dimension_numbers = #tpu.dot_dimension_numbers<[1], [0], [0], [1], [0, 0, 1, 1], [], []>} : vector<1x64xf32>, vector<64x64xf32>, vector<1x64xf32> -> vector<1x64xf32>
      %250 = arith.addf %248, %249 : vector<1x64xf32>
      %251 = arith.addf %250, %3 : vector<1x64xf32>
      %252 = math.tanh %251 : vector<1x64xf32>
      %c8_179 = arith.constant 8 : index
      %c0_180 = arith.constant 0 : index
      %253 = vector.load %arg23[%c8_179, %c0_180] : memref<64x64xf32, #tpu.memory_space<vmem>>, vector<1x64xf32>
      tpu.vector_store %arg23[%c8_179, %c0_180], %252 {strides = array<i32>} : memref<64x64xf32, #tpu.memory_space<vmem>>, vector<1x64xf32>,
      %c9_i32 = arith.constant 9 : i32
      %254 = arith.addi %145, %c9_i32 : i32
      %255 = arith.index_cast %254 : i32 to index
      %c0_181 = arith.constant 0 : index
      %256 = vector.load %arg22[%255, %c0_181] : memref<200x64xf32, #tpu.memory_space<vmem>>, vector<1x64xf32>
      %cst_182 = arith.constant dense<0.000000e+00> : vector<1x64xf32>
      %257 = tpu.matmul %247, %0, %cst_182 {dimension_numbers = #tpu.dot_dimension_numbers<[1], [0], [0], [1], [0, 0, 1, 1], [], []>} : vector<1x64xf32>, vector<64x64xf32>, vector<1x64xf32> -> vector<1x64xf32>
      %258 = arith.addf %256, %257 : vector<1x64xf32>
      %259 = math.tanh %258 : vector<1x64xf32>
      %cst_183 = arith.constant dense<0.000000e+00> : vector<1x64xf32>
      %260 = tpu.matmul %259, %1, %cst_183 {dimension_numbers = #tpu.dot_dimension_numbers<[1], [0], [0], [1], [0, 0, 1, 1], [], []>} : vector<1x64xf32>, vector<64x64xf32>, vector<1x64xf32> -> vector<1x64xf32>
      %cst_184 = arith.constant dense<0.000000e+00> : vector<1x64xf32>
      %261 = tpu.matmul %252, %2, %cst_184 {dimension_numbers = #tpu.dot_dimension_numbers<[1], [0], [0], [1], [0, 0, 1, 1], [], []>} : vector<1x64xf32>, vector<64x64xf32>, vector<1x64xf32> -> vector<1x64xf32>
      %262 = arith.addf %260, %261 : vector<1x64xf32>
      %263 = arith.addf %262, %3 : vector<1x64xf32>
      %264 = math.tanh %263 : vector<1x64xf32>
      %c9_185 = arith.constant 9 : index
      %c0_186 = arith.constant 0 : index
      %265 = vector.load %arg23[%c9_185, %c0_186] : memref<64x64xf32, #tpu.memory_space<vmem>>, vector<1x64xf32>
      tpu.vector_store %arg23[%c9_185, %c0_186], %264 {strides = array<i32>} : memref<64x64xf32, #tpu.memory_space<vmem>>, vector<1x64xf32>,
      %c10_i32_187 = arith.constant 10 : i32
      %266 = arith.addi %145, %c10_i32_187 : i32
      %267 = arith.index_cast %266 : i32 to index
      %c0_188 = arith.constant 0 : index
      %268 = vector.load %arg22[%267, %c0_188] : memref<200x64xf32, #tpu.memory_space<vmem>>, vector<1x64xf32>
      %cst_189 = arith.constant dense<0.000000e+00> : vector<1x64xf32>
      %269 = tpu.matmul %259, %0, %cst_189 {dimension_numbers = #tpu.dot_dimension_numbers<[1], [0], [0], [1], [0, 0, 1, 1], [], []>} : vector<1x64xf32>, vector<64x64xf32>, vector<1x64xf32> -> vector<1x64xf32>
      %270 = arith.addf %268, %269 : vector<1x64xf32>
      %271 = math.tanh %270 : vector<1x64xf32>
      %cst_190 = arith.constant dense<0.000000e+00> : vector<1x64xf32>
      %272 = tpu.matmul %271, %1, %cst_190 {dimension_numbers = #tpu.dot_dimension_numbers<[1], [0], [0], [1], [0, 0, 1, 1], [], []>} : vector<1x64xf32>, vector<64x64xf32>, vector<1x64xf32> -> vector<1x64xf32>
      %cst_191 = arith.constant dense<0.000000e+00> : vector<1x64xf32>
      %273 = tpu.matmul %264, %2, %cst_191 {dimension_numbers = #tpu.dot_dimension_numbers<[1], [0], [0], [1], [0, 0, 1, 1], [], []>} : vector<1x64xf32>, vector<64x64xf32>, vector<1x64xf32> -> vector<1x64xf32>
      %274 = arith.addf %272, %273 : vector<1x64xf32>
      %275 = arith.addf %274, %3 : vector<1x64xf32>
      %276 = math.tanh %275 : vector<1x64xf32>
      %c10 = arith.constant 10 : index
      %c0_192 = arith.constant 0 : index
      %277 = vector.load %arg23[%c10, %c0_192] : memref<64x64xf32, #tpu.memory_space<vmem>>, vector<1x64xf32>
      tpu.vector_store %arg23[%c10, %c0_192], %276 {strides = array<i32>} : memref<64x64xf32, #tpu.memory_space<vmem>>, vector<1x64xf32>,
      %c11_i32 = arith.constant 11 : i32
      %278 = arith.addi %145, %c11_i32 : i32
      %279 = arith.index_cast %278 : i32 to index
      %c0_193 = arith.constant 0 : index
      %280 = vector.load %arg22[%279, %c0_193] : memref<200x64xf32, #tpu.memory_space<vmem>>, vector<1x64xf32>
      %cst_194 = arith.constant dense<0.000000e+00> : vector<1x64xf32>
      %281 = tpu.matmul %271, %0, %cst_194 {dimension_numbers = #tpu.dot_dimension_numbers<[1], [0], [0], [1], [0, 0, 1, 1], [], []>} : vector<1x64xf32>, vector<64x64xf32>, vector<1x64xf32> -> vector<1x64xf32>
      %282 = arith.addf %280, %281 : vector<1x64xf32>
      %283 = math.tanh %282 : vector<1x64xf32>
      %cst_195 = arith.constant dense<0.000000e+00> : vector<1x64xf32>
      %284 = tpu.matmul %283, %1, %cst_195 {dimension_numbers = #tpu.dot_dimension_numbers<[1], [0], [0], [1], [0, 0, 1, 1], [], []>} : vector<1x64xf32>, vector<64x64xf32>, vector<1x64xf32> -> vector<1x64xf32>
      %cst_196 = arith.constant dense<0.000000e+00> : vector<1x64xf32>
      %285 = tpu.matmul %276, %2, %cst_196 {dimension_numbers = #tpu.dot_dimension_numbers<[1], [0], [0], [1], [0, 0, 1, 1], [], []>} : vector<1x64xf32>, vector<64x64xf32>, vector<1x64xf32> -> vector<1x64xf32>
      %286 = arith.addf %284, %285 : vector<1x64xf32>
      %287 = arith.addf %286, %3 : vector<1x64xf32>
      %288 = math.tanh %287 : vector<1x64xf32>
      %c11 = arith.constant 11 : index
      %c0_197 = arith.constant 0 : index
      %289 = vector.load %arg23[%c11, %c0_197] : memref<64x64xf32, #tpu.memory_space<vmem>>, vector<1x64xf32>
      tpu.vector_store %arg23[%c11, %c0_197], %288 {strides = array<i32>} : memref<64x64xf32, #tpu.memory_space<vmem>>, vector<1x64xf32>,
      %c12_i32 = arith.constant 12 : i32
      %290 = arith.addi %145, %c12_i32 : i32
      %291 = arith.index_cast %290 : i32 to index
      %c0_198 = arith.constant 0 : index
      %292 = vector.load %arg22[%291, %c0_198] : memref<200x64xf32, #tpu.memory_space<vmem>>, vector<1x64xf32>
      %cst_199 = arith.constant dense<0.000000e+00> : vector<1x64xf32>
      %293 = tpu.matmul %283, %0, %cst_199 {dimension_numbers = #tpu.dot_dimension_numbers<[1], [0], [0], [1], [0, 0, 1, 1], [], []>} : vector<1x64xf32>, vector<64x64xf32>, vector<1x64xf32> -> vector<1x64xf32>
      %294 = arith.addf %292, %293 : vector<1x64xf32>
      %295 = math.tanh %294 : vector<1x64xf32>
      %cst_200 = arith.constant dense<0.000000e+00> : vector<1x64xf32>
      %296 = tpu.matmul %295, %1, %cst_200 {dimension_numbers = #tpu.dot_dimension_numbers<[1], [0], [0], [1], [0, 0, 1, 1], [], []>} : vector<1x64xf32>, vector<64x64xf32>, vector<1x64xf32> -> vector<1x64xf32>
      %cst_201 = arith.constant dense<0.000000e+00> : vector<1x64xf32>
      %297 = tpu.matmul %288, %2, %cst_201 {dimension_numbers = #tpu.dot_dimension_numbers<[1], [0], [0], [1], [0, 0, 1, 1], [], []>} : vector<1x64xf32>, vector<64x64xf32>, vector<1x64xf32> -> vector<1x64xf32>
      %298 = arith.addf %296, %297 : vector<1x64xf32>
      %299 = arith.addf %298, %3 : vector<1x64xf32>
      %300 = math.tanh %299 : vector<1x64xf32>
      %c12 = arith.constant 12 : index
      %c0_202 = arith.constant 0 : index
      %301 = vector.load %arg23[%c12, %c0_202] : memref<64x64xf32, #tpu.memory_space<vmem>>, vector<1x64xf32>
      tpu.vector_store %arg23[%c12, %c0_202], %300 {strides = array<i32>} : memref<64x64xf32, #tpu.memory_space<vmem>>, vector<1x64xf32>,
      %c13_i32 = arith.constant 13 : i32
      %302 = arith.addi %145, %c13_i32 : i32
      %303 = arith.index_cast %302 : i32 to index
      %c0_203 = arith.constant 0 : index
      %304 = vector.load %arg22[%303, %c0_203] : memref<200x64xf32, #tpu.memory_space<vmem>>, vector<1x64xf32>
      %cst_204 = arith.constant dense<0.000000e+00> : vector<1x64xf32>
      %305 = tpu.matmul %295, %0, %cst_204 {dimension_numbers = #tpu.dot_dimension_numbers<[1], [0], [0], [1], [0, 0, 1, 1], [], []>} : vector<1x64xf32>, vector<64x64xf32>, vector<1x64xf32> -> vector<1x64xf32>
      %306 = arith.addf %304, %305 : vector<1x64xf32>
      %307 = math.tanh %306 : vector<1x64xf32>
      %cst_205 = arith.constant dense<0.000000e+00> : vector<1x64xf32>
      %308 = tpu.matmul %307, %1, %cst_205 {dimension_numbers = #tpu.dot_dimension_numbers<[1], [0], [0], [1], [0, 0, 1, 1], [], []>} : vector<1x64xf32>, vector<64x64xf32>, vector<1x64xf32> -> vector<1x64xf32>
      %cst_206 = arith.constant dense<0.000000e+00> : vector<1x64xf32>
      %309 = tpu.matmul %300, %2, %cst_206 {dimension_numbers = #tpu.dot_dimension_numbers<[1], [0], [0], [1], [0, 0, 1, 1], [], []>} : vector<1x64xf32>, vector<64x64xf32>, vector<1x64xf32> -> vector<1x64xf32>
      %310 = arith.addf %308, %309 : vector<1x64xf32>
      %311 = arith.addf %310, %3 : vector<1x64xf32>
      %312 = math.tanh %311 : vector<1x64xf32>
      %c13 = arith.constant 13 : index
      %c0_207 = arith.constant 0 : index
      %313 = vector.load %arg23[%c13, %c0_207] : memref<64x64xf32, #tpu.memory_space<vmem>>, vector<1x64xf32>
      tpu.vector_store %arg23[%c13, %c0_207], %312 {strides = array<i32>} : memref<64x64xf32, #tpu.memory_space<vmem>>, vector<1x64xf32>,
      %c14_i32 = arith.constant 14 : i32
      %314 = arith.addi %145, %c14_i32 : i32
      %315 = arith.index_cast %314 : i32 to index
      %c0_208 = arith.constant 0 : index
      %316 = vector.load %arg22[%315, %c0_208] : memref<200x64xf32, #tpu.memory_space<vmem>>, vector<1x64xf32>
      %cst_209 = arith.constant dense<0.000000e+00> : vector<1x64xf32>
      %317 = tpu.matmul %307, %0, %cst_209 {dimension_numbers = #tpu.dot_dimension_numbers<[1], [0], [0], [1], [0, 0, 1, 1], [], []>} : vector<1x64xf32>, vector<64x64xf32>, vector<1x64xf32> -> vector<1x64xf32>
      %318 = arith.addf %316, %317 : vector<1x64xf32>
      %319 = math.tanh %318 : vector<1x64xf32>
      %cst_210 = arith.constant dense<0.000000e+00> : vector<1x64xf32>
      %320 = tpu.matmul %319, %1, %cst_210 {dimension_numbers = #tpu.dot_dimension_numbers<[1], [0], [0], [1], [0, 0, 1, 1], [], []>} : vector<1x64xf32>, vector<64x64xf32>, vector<1x64xf32> -> vector<1x64xf32>
      %cst_211 = arith.constant dense<0.000000e+00> : vector<1x64xf32>
      %321 = tpu.matmul %312, %2, %cst_211 {dimension_numbers = #tpu.dot_dimension_numbers<[1], [0], [0], [1], [0, 0, 1, 1], [], []>} : vector<1x64xf32>, vector<64x64xf32>, vector<1x64xf32> -> vector<1x64xf32>
      %322 = arith.addf %320, %321 : vector<1x64xf32>
      %323 = arith.addf %322, %3 : vector<1x64xf32>
      %324 = math.tanh %323 : vector<1x64xf32>
      %c14 = arith.constant 14 : index
      %c0_212 = arith.constant 0 : index
      %325 = vector.load %arg23[%c14, %c0_212] : memref<64x64xf32, #tpu.memory_space<vmem>>, vector<1x64xf32>
      tpu.vector_store %arg23[%c14, %c0_212], %324 {strides = array<i32>} : memref<64x64xf32, #tpu.memory_space<vmem>>, vector<1x64xf32>,
      %c15_i32 = arith.constant 15 : i32
      %326 = arith.addi %145, %c15_i32 : i32
      %327 = arith.index_cast %326 : i32 to index
      %c0_213 = arith.constant 0 : index
      %328 = vector.load %arg22[%327, %c0_213] : memref<200x64xf32, #tpu.memory_space<vmem>>, vector<1x64xf32>
      %cst_214 = arith.constant dense<0.000000e+00> : vector<1x64xf32>
      %329 = tpu.matmul %319, %0, %cst_214 {dimension_numbers = #tpu.dot_dimension_numbers<[1], [0], [0], [1], [0, 0, 1, 1], [], []>} : vector<1x64xf32>, vector<64x64xf32>, vector<1x64xf32> -> vector<1x64xf32>
      %330 = arith.addf %328, %329 : vector<1x64xf32>
      %331 = math.tanh %330 : vector<1x64xf32>
      %cst_215 = arith.constant dense<0.000000e+00> : vector<1x64xf32>
      %332 = tpu.matmul %331, %1, %cst_215 {dimension_numbers = #tpu.dot_dimension_numbers<[1], [0], [0], [1], [0, 0, 1, 1], [], []>} : vector<1x64xf32>, vector<64x64xf32>, vector<1x64xf32> -> vector<1x64xf32>
      %cst_216 = arith.constant dense<0.000000e+00> : vector<1x64xf32>
      %333 = tpu.matmul %324, %2, %cst_216 {dimension_numbers = #tpu.dot_dimension_numbers<[1], [0], [0], [1], [0, 0, 1, 1], [], []>} : vector<1x64xf32>, vector<64x64xf32>, vector<1x64xf32> -> vector<1x64xf32>
      %334 = arith.addf %332, %333 : vector<1x64xf32>
      %335 = arith.addf %334, %3 : vector<1x64xf32>
      %336 = math.tanh %335 : vector<1x64xf32>
      %c15 = arith.constant 15 : index
      %c0_217 = arith.constant 0 : index
      %337 = vector.load %arg23[%c15, %c0_217] : memref<64x64xf32, #tpu.memory_space<vmem>>, vector<1x64xf32>
      tpu.vector_store %arg23[%c15, %c0_217], %336 {strides = array<i32>} : memref<64x64xf32, #tpu.memory_space<vmem>>, vector<1x64xf32>,
      %c16_i32 = arith.constant 16 : i32
      %338 = arith.addi %145, %c16_i32 : i32
      %339 = arith.index_cast %338 : i32 to index
      %c0_218 = arith.constant 0 : index
      %340 = vector.load %arg22[%339, %c0_218] : memref<200x64xf32, #tpu.memory_space<vmem>>, vector<1x64xf32>
      %cst_219 = arith.constant dense<0.000000e+00> : vector<1x64xf32>
      %341 = tpu.matmul %331, %0, %cst_219 {dimension_numbers = #tpu.dot_dimension_numbers<[1], [0], [0], [1], [0, 0, 1, 1], [], []>} : vector<1x64xf32>, vector<64x64xf32>, vector<1x64xf32> -> vector<1x64xf32>
      %342 = arith.addf %340, %341 : vector<1x64xf32>
      %343 = math.tanh %342 : vector<1x64xf32>
      %cst_220 = arith.constant dense<0.000000e+00> : vector<1x64xf32>
      %344 = tpu.matmul %343, %1, %cst_220 {dimension_numbers = #tpu.dot_dimension_numbers<[1], [0], [0], [1], [0, 0, 1, 1], [], []>} : vector<1x64xf32>, vector<64x64xf32>, vector<1x64xf32> -> vector<1x64xf32>
      %cst_221 = arith.constant dense<0.000000e+00> : vector<1x64xf32>
      %345 = tpu.matmul %336, %2, %cst_221 {dimension_numbers = #tpu.dot_dimension_numbers<[1], [0], [0], [1], [0, 0, 1, 1], [], []>} : vector<1x64xf32>, vector<64x64xf32>, vector<1x64xf32> -> vector<1x64xf32>
      %346 = arith.addf %344, %345 : vector<1x64xf32>
      %347 = arith.addf %346, %3 : vector<1x64xf32>
      %348 = math.tanh %347 : vector<1x64xf32>
      %c16 = arith.constant 16 : index
      %c0_222 = arith.constant 0 : index
      %349 = vector.load %arg23[%c16, %c0_222] : memref<64x64xf32, #tpu.memory_space<vmem>>, vector<1x64xf32>
      tpu.vector_store %arg23[%c16, %c0_222], %348 {strides = array<i32>} : memref<64x64xf32, #tpu.memory_space<vmem>>, vector<1x64xf32>,
      %c17_i32 = arith.constant 17 : i32
      %350 = arith.addi %145, %c17_i32 : i32
      %351 = arith.index_cast %350 : i32 to index
      %c0_223 = arith.constant 0 : index
      %352 = vector.load %arg22[%351, %c0_223] : memref<200x64xf32, #tpu.memory_space<vmem>>, vector<1x64xf32>
      %cst_224 = arith.constant dense<0.000000e+00> : vector<1x64xf32>
      %353 = tpu.matmul %343, %0, %cst_224 {dimension_numbers = #tpu.dot_dimension_numbers<[1], [0], [0], [1], [0, 0, 1, 1], [], []>} : vector<1x64xf32>, vector<64x64xf32>, vector<1x64xf32> -> vector<1x64xf32>
      %354 = arith.addf %352, %353 : vector<1x64xf32>
      %355 = math.tanh %354 : vector<1x64xf32>
      %cst_225 = arith.constant dense<0.000000e+00> : vector<1x64xf32>
      %356 = tpu.matmul %355, %1, %cst_225 {dimension_numbers = #tpu.dot_dimension_numbers<[1], [0], [0], [1], [0, 0, 1, 1], [], []>} : vector<1x64xf32>, vector<64x64xf32>, vector<1x64xf32> -> vector<1x64xf32>
      %cst_226 = arith.constant dense<0.000000e+00> : vector<1x64xf32>
      %357 = tpu.matmul %348, %2, %cst_226 {dimension_numbers = #tpu.dot_dimension_numbers<[1], [0], [0], [1], [0, 0, 1, 1], [], []>} : vector<1x64xf32>, vector<64x64xf32>, vector<1x64xf32> -> vector<1x64xf32>
      %358 = arith.addf %356, %357 : vector<1x64xf32>
      %359 = arith.addf %358, %3 : vector<1x64xf32>
      %360 = math.tanh %359 : vector<1x64xf32>
      %c17 = arith.constant 17 : index
      %c0_227 = arith.constant 0 : index
      %361 = vector.load %arg23[%c17, %c0_227] : memref<64x64xf32, #tpu.memory_space<vmem>>, vector<1x64xf32>
      tpu.vector_store %arg23[%c17, %c0_227], %360 {strides = array<i32>} : memref<64x64xf32, #tpu.memory_space<vmem>>, vector<1x64xf32>,
      %c18_i32 = arith.constant 18 : i32
      %362 = arith.addi %145, %c18_i32 : i32
      %363 = arith.index_cast %362 : i32 to index
      %c0_228 = arith.constant 0 : index
      %364 = vector.load %arg22[%363, %c0_228] : memref<200x64xf32, #tpu.memory_space<vmem>>, vector<1x64xf32>
      %cst_229 = arith.constant dense<0.000000e+00> : vector<1x64xf32>
      %365 = tpu.matmul %355, %0, %cst_229 {dimension_numbers = #tpu.dot_dimension_numbers<[1], [0], [0], [1], [0, 0, 1, 1], [], []>} : vector<1x64xf32>, vector<64x64xf32>, vector<1x64xf32> -> vector<1x64xf32>
      %366 = arith.addf %364, %365 : vector<1x64xf32>
      %367 = math.tanh %366 : vector<1x64xf32>
      %cst_230 = arith.constant dense<0.000000e+00> : vector<1x64xf32>
      %368 = tpu.matmul %367, %1, %cst_230 {dimension_numbers = #tpu.dot_dimension_numbers<[1], [0], [0], [1], [0, 0, 1, 1], [], []>} : vector<1x64xf32>, vector<64x64xf32>, vector<1x64xf32> -> vector<1x64xf32>
      %cst_231 = arith.constant dense<0.000000e+00> : vector<1x64xf32>
      %369 = tpu.matmul %360, %2, %cst_231 {dimension_numbers = #tpu.dot_dimension_numbers<[1], [0], [0], [1], [0, 0, 1, 1], [], []>} : vector<1x64xf32>, vector<64x64xf32>, vector<1x64xf32> -> vector<1x64xf32>
      %370 = arith.addf %368, %369 : vector<1x64xf32>
      %371 = arith.addf %370, %3 : vector<1x64xf32>
      %372 = math.tanh %371 : vector<1x64xf32>
      %c18 = arith.constant 18 : index
      %c0_232 = arith.constant 0 : index
      %373 = vector.load %arg23[%c18, %c0_232] : memref<64x64xf32, #tpu.memory_space<vmem>>, vector<1x64xf32>
      tpu.vector_store %arg23[%c18, %c0_232], %372 {strides = array<i32>} : memref<64x64xf32, #tpu.memory_space<vmem>>, vector<1x64xf32>,
      %c19_i32 = arith.constant 19 : i32
      %374 = arith.addi %145, %c19_i32 : i32
      %375 = arith.index_cast %374 : i32 to index
      %c0_233 = arith.constant 0 : index
      %376 = vector.load %arg22[%375, %c0_233] : memref<200x64xf32, #tpu.memory_space<vmem>>, vector<1x64xf32>
      %cst_234 = arith.constant dense<0.000000e+00> : vector<1x64xf32>
      %377 = tpu.matmul %367, %0, %cst_234 {dimension_numbers = #tpu.dot_dimension_numbers<[1], [0], [0], [1], [0, 0, 1, 1], [], []>} : vector<1x64xf32>, vector<64x64xf32>, vector<1x64xf32> -> vector<1x64xf32>
      %378 = arith.addf %376, %377 : vector<1x64xf32>
      %379 = math.tanh %378 : vector<1x64xf32>
      %cst_235 = arith.constant dense<0.000000e+00> : vector<1x64xf32>
      %380 = tpu.matmul %379, %1, %cst_235 {dimension_numbers = #tpu.dot_dimension_numbers<[1], [0], [0], [1], [0, 0, 1, 1], [], []>} : vector<1x64xf32>, vector<64x64xf32>, vector<1x64xf32> -> vector<1x64xf32>
      %cst_236 = arith.constant dense<0.000000e+00> : vector<1x64xf32>
      %381 = tpu.matmul %372, %2, %cst_236 {dimension_numbers = #tpu.dot_dimension_numbers<[1], [0], [0], [1], [0, 0, 1, 1], [], []>} : vector<1x64xf32>, vector<64x64xf32>, vector<1x64xf32> -> vector<1x64xf32>
      %382 = arith.addf %380, %381 : vector<1x64xf32>
      %383 = arith.addf %382, %3 : vector<1x64xf32>
      %384 = math.tanh %383 : vector<1x64xf32>
      %c19 = arith.constant 19 : index
      %c0_237 = arith.constant 0 : index
      %385 = vector.load %arg23[%c19, %c0_237] : memref<64x64xf32, #tpu.memory_space<vmem>>, vector<1x64xf32>
      tpu.vector_store %arg23[%c19, %c0_237], %384 {strides = array<i32>} : memref<64x64xf32, #tpu.memory_space<vmem>>, vector<1x64xf32>,
      %c0_238 = arith.constant 0 : index
      %c0_239 = arith.constant 0 : index
      %386 = vector.load %arg23[%c0_238, %c0_239] : memref<64x64xf32, #tpu.memory_space<vmem>>, vector<64x64xf32>
      %cst_240 = arith.constant dense<0.000000e+00> : vector<1x64xf32>
      %387 = tpu.matmul %4, %386, %cst_240 {dimension_numbers = #tpu.dot_dimension_numbers<[1], [1], [0], [0], [0, 0, 1, 0], [], []>} : vector<1x64xf32>, vector<64x64xf32>, vector<1x64xf32> -> vector<1x64xf32>
      %388 = vector.broadcast %5 : vector<1x1xf32> to vector<1x64xf32>
      %389 = arith.addf %387, %388 : vector<1x64xf32>
      %390 = arith.index_cast %arg27 : i32 to index
      %c0_241 = arith.constant 0 : index
      %391 = vector.load %arg24[%390, %c0_241] : memref<10x64xf32, #tpu.memory_space<vmem>>, vector<1x64xf32>
      tpu.vector_store %arg24[%390, %c0_241], %389 {strides = array<i32>} : memref<10x64xf32, #tpu.memory_space<vmem>>, vector<1x64xf32>,
      scf.yield %379, %384 : vector<1x64xf32>, vector<1x64xf32>
    }
    %c10_i32_24 = arith.constant 10 : i32
    %c0_25 = arith.constant 0 : index
    %c0_26 = arith.constant 0 : index
    %21 = vector.load %arg20[%c0_25, %c0_26] : memref<2x64xf32, #tpu.memory_space<vmem>>, vector<1x64xf32>
    tpu.vector_store %arg20[%c0_25, %c0_26], %20#0 {strides = array<i32>} : memref<2x64xf32, #tpu.memory_space<vmem>>, vector<1x64xf32>,
    %c1_27 = arith.constant 1 : index
    %c0_28 = arith.constant 0 : index
    %22 = vector.load %arg20[%c1_27, %c0_28] : memref<2x64xf32, #tpu.memory_space<vmem>>, vector<1x64xf32>
    tpu.vector_store %arg20[%c1_27, %c0_28], %20#1 {strides = array<i32>} : memref<2x64xf32, #tpu.memory_space<vmem>>, vector<1x64xf32>,
    %c0_29 = arith.constant 0 : index
    %c0_30 = arith.constant 0 : index
    %23 = vector.load %arg13[%c0_29, %c0_30] : memref<64x64xf32, #tpu.memory_space<vmem>>, vector<64x64xf32>
    %c0_31 = arith.constant 0 : index
    %c0_32 = arith.constant 0 : index
    %24 = vector.load %arg14[%c0_31, %c0_32] : memref<64x64xf32, #tpu.memory_space<vmem>>, vector<64x64xf32>
    %c0_33 = arith.constant 0 : index
    %c0_34 = arith.constant 0 : index
    %25 = vector.load %arg15[%c0_33, %c0_34] : memref<64x64xf32, #tpu.memory_space<vmem>>, vector<64x64xf32>
    %c0_35 = arith.constant 0 : index
    %c0_36 = arith.constant 0 : index
    %26 = vector.load %arg16[%c0_35, %c0_36] : memref<1x64xf32, #tpu.memory_space<vmem>>, vector<1x64xf32>
    %c0_37 = arith.constant 0 : index
    %c0_38 = arith.constant 0 : index
    %27 = vector.load %arg24[%c0_37, %c0_38] : memref<10x64xf32, #tpu.memory_space<vmem>>, vector<10x64xf32>
    %c0_39 = arith.constant 0 : index
    %c0_40 = arith.constant 0 : index
    %28 = vector.load %arg11[%c0_39, %c0_40] : memref<64x64xf32, #tpu.memory_space<vmem>>, vector<64x64xf32>
    %cst_41 = arith.constant dense<0.000000e+00> : vector<10x64xf32>
    %29 = tpu.matmul %27, %28, %cst_41 {dimension_numbers = #tpu.dot_dimension_numbers<[1], [0], [0], [1], [0, 0, 1, 1], [], []>} : vector<10x64xf32>, vector<64x64xf32>, vector<10x64xf32> -> vector<10x64xf32>
    %c0_42 = arith.constant 0 : index
    %c0_43 = arith.constant 0 : index
    %30 = vector.load %arg12[%c0_42, %c0_43] : memref<1x64xf32, #tpu.memory_space<vmem>>, vector<1x64xf32>
    %31 = vector.broadcast %30 : vector<1x64xf32> to vector<10x64xf32>
    %32 = arith.addf %29, %31 : vector<10x64xf32>
    %c0_44 = arith.constant 0 : index
    %c0_45 = arith.constant 0 : index
    %33 = vector.load %arg25[%c0_44, %c0_45] : memref<10x64xf32, #tpu.memory_space<vmem>>, vector<10x64xf32>
    tpu.vector_store %arg25[%c0_44, %c0_45], %32 {strides = array<i32>} : memref<10x64xf32, #tpu.memory_space<vmem>>, vector<10x64xf32>,
    %c0_46 = arith.constant 0 : index
    %c0_47 = arith.constant 0 : index
    %34 = vector.load %arg2[%c0_46, %c0_47] : memref<2x64xf32, #tpu.memory_space<vmem>>, vector<1x64xf32>
    %c1_48 = arith.constant 1 : index
    %c0_49 = arith.constant 0 : index
    %35 = vector.load %arg2[%c1_48, %c0_49] : memref<2x64xf32, #tpu.memory_space<vmem>>, vector<1x64xf32>
    %c0_50 = arith.constant 0 : index
    %c0_51 = arith.constant 0 : index
    %36 = vector.load %arg25[%c0_50, %c0_51] : memref<10x64xf32, #tpu.memory_space<vmem>>, vector<1x64xf32>
    %cst_52 = arith.constant dense<0.000000e+00> : vector<1x64xf32>
    %37 = tpu.matmul %34, %23, %cst_52 {dimension_numbers = #tpu.dot_dimension_numbers<[1], [0], [0], [1], [0, 0, 1, 1], [], []>} : vector<1x64xf32>, vector<64x64xf32>, vector<1x64xf32> -> vector<1x64xf32>
    %38 = arith.addf %36, %37 : vector<1x64xf32>
    %39 = math.tanh %38 : vector<1x64xf32>
    %cst_53 = arith.constant dense<0.000000e+00> : vector<1x64xf32>
    %40 = tpu.matmul %39, %24, %cst_53 {dimension_numbers = #tpu.dot_dimension_numbers<[1], [0], [0], [1], [0, 0, 1, 1], [], []>} : vector<1x64xf32>, vector<64x64xf32>, vector<1x64xf32> -> vector<1x64xf32>
    %cst_54 = arith.constant dense<0.000000e+00> : vector<1x64xf32>
    %41 = tpu.matmul %35, %25, %cst_54 {dimension_numbers = #tpu.dot_dimension_numbers<[1], [0], [0], [1], [0, 0, 1, 1], [], []>} : vector<1x64xf32>, vector<64x64xf32>, vector<1x64xf32> -> vector<1x64xf32>
    %42 = arith.addf %40, %41 : vector<1x64xf32>
    %43 = arith.addf %42, %26 : vector<1x64xf32>
    %44 = math.tanh %43 : vector<1x64xf32>
    %c0_55 = arith.constant 0 : index
    %c0_56 = arith.constant 0 : index
    %45 = vector.load %arg26[%c0_55, %c0_56] : memref<10x64xf32, #tpu.memory_space<vmem>>, vector<1x64xf32>
    tpu.vector_store %arg26[%c0_55, %c0_56], %44 {strides = array<i32>} : memref<10x64xf32, #tpu.memory_space<vmem>>, vector<1x64xf32>,
    %c1_57 = arith.constant 1 : index
    %c0_58 = arith.constant 0 : index
    %46 = vector.load %arg25[%c1_57, %c0_58] : memref<10x64xf32, #tpu.memory_space<vmem>>, vector<1x64xf32>
    %cst_59 = arith.constant dense<0.000000e+00> : vector<1x64xf32>
    %47 = tpu.matmul %39, %23, %cst_59 {dimension_numbers = #tpu.dot_dimension_numbers<[1], [0], [0], [1], [0, 0, 1, 1], [], []>} : vector<1x64xf32>, vector<64x64xf32>, vector<1x64xf32> -> vector<1x64xf32>
    %48 = arith.addf %46, %47 : vector<1x64xf32>
    %49 = math.tanh %48 : vector<1x64xf32>
    %cst_60 = arith.constant dense<0.000000e+00> : vector<1x64xf32>
    %50 = tpu.matmul %49, %24, %cst_60 {dimension_numbers = #tpu.dot_dimension_numbers<[1], [0], [0], [1], [0, 0, 1, 1], [], []>} : vector<1x64xf32>, vector<64x64xf32>, vector<1x64xf32> -> vector<1x64xf32>
    %cst_61 = arith.constant dense<0.000000e+00> : vector<1x64xf32>
    %51 = tpu.matmul %44, %25, %cst_61 {dimension_numbers = #tpu.dot_dimension_numbers<[1], [0], [0], [1], [0, 0, 1, 1], [], []>} : vector<1x64xf32>, vector<64x64xf32>, vector<1x64xf32> -> vector<1x64xf32>
    %52 = arith.addf %50, %51 : vector<1x64xf32>
    %53 = arith.addf %52, %26 : vector<1x64xf32>
    %54 = math.tanh %53 : vector<1x64xf32>
    %c1_62 = arith.constant 1 : index
    %c0_63 = arith.constant 0 : index
    %55 = vector.load %arg26[%c1_62, %c0_63] : memref<10x64xf32, #tpu.memory_space<vmem>>, vector<1x64xf32>
    tpu.vector_store %arg26[%c1_62, %c0_63], %54 {strides = array<i32>} : memref<10x64xf32, #tpu.memory_space<vmem>>, vector<1x64xf32>,
    %c2 = arith.constant 2 : index
    %c0_64 = arith.constant 0 : index
    %56 = vector.load %arg25[%c2, %c0_64] : memref<10x64xf32, #tpu.memory_space<vmem>>, vector<1x64xf32>
    %cst_65 = arith.constant dense<0.000000e+00> : vector<1x64xf32>
    %57 = tpu.matmul %49, %23, %cst_65 {dimension_numbers = #tpu.dot_dimension_numbers<[1], [0], [0], [1], [0, 0, 1, 1], [], []>} : vector<1x64xf32>, vector<64x64xf32>, vector<1x64xf32> -> vector<1x64xf32>
    %58 = arith.addf %56, %57 : vector<1x64xf32>
    %59 = math.tanh %58 : vector<1x64xf32>
    %cst_66 = arith.constant dense<0.000000e+00> : vector<1x64xf32>
    %60 = tpu.matmul %59, %24, %cst_66 {dimension_numbers = #tpu.dot_dimension_numbers<[1], [0], [0], [1], [0, 0, 1, 1], [], []>} : vector<1x64xf32>, vector<64x64xf32>, vector<1x64xf32> -> vector<1x64xf32>
    %cst_67 = arith.constant dense<0.000000e+00> : vector<1x64xf32>
    %61 = tpu.matmul %54, %25, %cst_67 {dimension_numbers = #tpu.dot_dimension_numbers<[1], [0], [0], [1], [0, 0, 1, 1], [], []>} : vector<1x64xf32>, vector<64x64xf32>, vector<1x64xf32> -> vector<1x64xf32>
    %62 = arith.addf %60, %61 : vector<1x64xf32>
    %63 = arith.addf %62, %26 : vector<1x64xf32>
    %64 = math.tanh %63 : vector<1x64xf32>
    %c2_68 = arith.constant 2 : index
    %c0_69 = arith.constant 0 : index
    %65 = vector.load %arg26[%c2_68, %c0_69] : memref<10x64xf32, #tpu.memory_space<vmem>>, vector<1x64xf32>
    tpu.vector_store %arg26[%c2_68, %c0_69], %64 {strides = array<i32>} : memref<10x64xf32, #tpu.memory_space<vmem>>, vector<1x64xf32>,
    %c3 = arith.constant 3 : index
    %c0_70 = arith.constant 0 : index
    %66 = vector.load %arg25[%c3, %c0_70] : memref<10x64xf32, #tpu.memory_space<vmem>>, vector<1x64xf32>
    %cst_71 = arith.constant dense<0.000000e+00> : vector<1x64xf32>
    %67 = tpu.matmul %59, %23, %cst_71 {dimension_numbers = #tpu.dot_dimension_numbers<[1], [0], [0], [1], [0, 0, 1, 1], [], []>} : vector<1x64xf32>, vector<64x64xf32>, vector<1x64xf32> -> vector<1x64xf32>
    %68 = arith.addf %66, %67 : vector<1x64xf32>
    %69 = math.tanh %68 : vector<1x64xf32>
    %cst_72 = arith.constant dense<0.000000e+00> : vector<1x64xf32>
    %70 = tpu.matmul %69, %24, %cst_72 {dimension_numbers = #tpu.dot_dimension_numbers<[1], [0], [0], [1], [0, 0, 1, 1], [], []>} : vector<1x64xf32>, vector<64x64xf32>, vector<1x64xf32> -> vector<1x64xf32>
    %cst_73 = arith.constant dense<0.000000e+00> : vector<1x64xf32>
    %71 = tpu.matmul %64, %25, %cst_73 {dimension_numbers = #tpu.dot_dimension_numbers<[1], [0], [0], [1], [0, 0, 1, 1], [], []>} : vector<1x64xf32>, vector<64x64xf32>, vector<1x64xf32> -> vector<1x64xf32>
    %72 = arith.addf %70, %71 : vector<1x64xf32>
    %73 = arith.addf %72, %26 : vector<1x64xf32>
    %74 = math.tanh %73 : vector<1x64xf32>
    %c3_74 = arith.constant 3 : index
    %c0_75 = arith.constant 0 : index
    %75 = vector.load %arg26[%c3_74, %c0_75] : memref<10x64xf32, #tpu.memory_space<vmem>>, vector<1x64xf32>
    tpu.vector_store %arg26[%c3_74, %c0_75], %74 {strides = array<i32>} : memref<10x64xf32, #tpu.memory_space<vmem>>, vector<1x64xf32>,
    %c4 = arith.constant 4 : index
    %c0_76 = arith.constant 0 : index
    %76 = vector.load %arg25[%c4, %c0_76] : memref<10x64xf32, #tpu.memory_space<vmem>>, vector<1x64xf32>
    %cst_77 = arith.constant dense<0.000000e+00> : vector<1x64xf32>
    %77 = tpu.matmul %69, %23, %cst_77 {dimension_numbers = #tpu.dot_dimension_numbers<[1], [0], [0], [1], [0, 0, 1, 1], [], []>} : vector<1x64xf32>, vector<64x64xf32>, vector<1x64xf32> -> vector<1x64xf32>
    %78 = arith.addf %76, %77 : vector<1x64xf32>
    %79 = math.tanh %78 : vector<1x64xf32>
    %cst_78 = arith.constant dense<0.000000e+00> : vector<1x64xf32>
    %80 = tpu.matmul %79, %24, %cst_78 {dimension_numbers = #tpu.dot_dimension_numbers<[1], [0], [0], [1], [0, 0, 1, 1], [], []>} : vector<1x64xf32>, vector<64x64xf32>, vector<1x64xf32> -> vector<1x64xf32>
    %cst_79 = arith.constant dense<0.000000e+00> : vector<1x64xf32>
    %81 = tpu.matmul %74, %25, %cst_79 {dimension_numbers = #tpu.dot_dimension_numbers<[1], [0], [0], [1], [0, 0, 1, 1], [], []>} : vector<1x64xf32>, vector<64x64xf32>, vector<1x64xf32> -> vector<1x64xf32>
    %82 = arith.addf %80, %81 : vector<1x64xf32>
    %83 = arith.addf %82, %26 : vector<1x64xf32>
    %84 = math.tanh %83 : vector<1x64xf32>
    %c4_80 = arith.constant 4 : index
    %c0_81 = arith.constant 0 : index
    %85 = vector.load %arg26[%c4_80, %c0_81] : memref<10x64xf32, #tpu.memory_space<vmem>>, vector<1x64xf32>
    tpu.vector_store %arg26[%c4_80, %c0_81], %84 {strides = array<i32>} : memref<10x64xf32, #tpu.memory_space<vmem>>, vector<1x64xf32>,
    %c5 = arith.constant 5 : index
    %c0_82 = arith.constant 0 : index
    %86 = vector.load %arg25[%c5, %c0_82] : memref<10x64xf32, #tpu.memory_space<vmem>>, vector<1x64xf32>
    %cst_83 = arith.constant dense<0.000000e+00> : vector<1x64xf32>
    %87 = tpu.matmul %79, %23, %cst_83 {dimension_numbers = #tpu.dot_dimension_numbers<[1], [0], [0], [1], [0, 0, 1, 1], [], []>} : vector<1x64xf32>, vector<64x64xf32>, vector<1x64xf32> -> vector<1x64xf32>
    %88 = arith.addf %86, %87 : vector<1x64xf32>
    %89 = math.tanh %88 : vector<1x64xf32>
    %cst_84 = arith.constant dense<0.000000e+00> : vector<1x64xf32>
    %90 = tpu.matmul %89, %24, %cst_84 {dimension_numbers = #tpu.dot_dimension_numbers<[1], [0], [0], [1], [0, 0, 1, 1], [], []>} : vector<1x64xf32>, vector<64x64xf32>, vector<1x64xf32> -> vector<1x64xf32>
    %cst_85 = arith.constant dense<0.000000e+00> : vector<1x64xf32>
    %91 = tpu.matmul %84, %25, %cst_85 {dimension_numbers = #tpu.dot_dimension_numbers<[1], [0], [0], [1], [0, 0, 1, 1], [], []>} : vector<1x64xf32>, vector<64x64xf32>, vector<1x64xf32> -> vector<1x64xf32>
    %92 = arith.addf %90, %91 : vector<1x64xf32>
    %93 = arith.addf %92, %26 : vector<1x64xf32>
    %94 = math.tanh %93 : vector<1x64xf32>
    %c5_86 = arith.constant 5 : index
    %c0_87 = arith.constant 0 : index
    %95 = vector.load %arg26[%c5_86, %c0_87] : memref<10x64xf32, #tpu.memory_space<vmem>>, vector<1x64xf32>
    tpu.vector_store %arg26[%c5_86, %c0_87], %94 {strides = array<i32>} : memref<10x64xf32, #tpu.memory_space<vmem>>, vector<1x64xf32>,
    %c6 = arith.constant 6 : index
    %c0_88 = arith.constant 0 : index
    %96 = vector.load %arg25[%c6, %c0_88] : memref<10x64xf32, #tpu.memory_space<vmem>>, vector<1x64xf32>
    %cst_89 = arith.constant dense<0.000000e+00> : vector<1x64xf32>
    %97 = tpu.matmul %89, %23, %cst_89 {dimension_numbers = #tpu.dot_dimension_numbers<[1], [0], [0], [1], [0, 0, 1, 1], [], []>} : vector<1x64xf32>, vector<64x64xf32>, vector<1x64xf32> -> vector<1x64xf32>
    %98 = arith.addf %96, %97 : vector<1x64xf32>
    %99 = math.tanh %98 : vector<1x64xf32>
    %cst_90 = arith.constant dense<0.000000e+00> : vector<1x64xf32>
    %100 = tpu.matmul %99, %24, %cst_90 {dimension_numbers = #tpu.dot_dimension_numbers<[1], [0], [0], [1], [0, 0, 1, 1], [], []>} : vector<1x64xf32>, vector<64x64xf32>, vector<1x64xf32> -> vector<1x64xf32>
    %cst_91 = arith.constant dense<0.000000e+00> : vector<1x64xf32>
    %101 = tpu.matmul %94, %25, %cst_91 {dimension_numbers = #tpu.dot_dimension_numbers<[1], [0], [0], [1], [0, 0, 1, 1], [], []>} : vector<1x64xf32>, vector<64x64xf32>, vector<1x64xf32> -> vector<1x64xf32>
    %102 = arith.addf %100, %101 : vector<1x64xf32>
    %103 = arith.addf %102, %26 : vector<1x64xf32>
    %104 = math.tanh %103 : vector<1x64xf32>
    %c6_92 = arith.constant 6 : index
    %c0_93 = arith.constant 0 : index
    %105 = vector.load %arg26[%c6_92, %c0_93] : memref<10x64xf32, #tpu.memory_space<vmem>>, vector<1x64xf32>
    tpu.vector_store %arg26[%c6_92, %c0_93], %104 {strides = array<i32>} : memref<10x64xf32, #tpu.memory_space<vmem>>, vector<1x64xf32>,
    %c7 = arith.constant 7 : index
    %c0_94 = arith.constant 0 : index
    %106 = vector.load %arg25[%c7, %c0_94] : memref<10x64xf32, #tpu.memory_space<vmem>>, vector<1x64xf32>
    %cst_95 = arith.constant dense<0.000000e+00> : vector<1x64xf32>
    %107 = tpu.matmul %99, %23, %cst_95 {dimension_numbers = #tpu.dot_dimension_numbers<[1], [0], [0], [1], [0, 0, 1, 1], [], []>} : vector<1x64xf32>, vector<64x64xf32>, vector<1x64xf32> -> vector<1x64xf32>
    %108 = arith.addf %106, %107 : vector<1x64xf32>
    %109 = math.tanh %108 : vector<1x64xf32>
    %cst_96 = arith.constant dense<0.000000e+00> : vector<1x64xf32>
    %110 = tpu.matmul %109, %24, %cst_96 {dimension_numbers = #tpu.dot_dimension_numbers<[1], [0], [0], [1], [0, 0, 1, 1], [], []>} : vector<1x64xf32>, vector<64x64xf32>, vector<1x64xf32> -> vector<1x64xf32>
    %cst_97 = arith.constant dense<0.000000e+00> : vector<1x64xf32>
    %111 = tpu.matmul %104, %25, %cst_97 {dimension_numbers = #tpu.dot_dimension_numbers<[1], [0], [0], [1], [0, 0, 1, 1], [], []>} : vector<1x64xf32>, vector<64x64xf32>, vector<1x64xf32> -> vector<1x64xf32>
    %112 = arith.addf %110, %111 : vector<1x64xf32>
    %113 = arith.addf %112, %26 : vector<1x64xf32>
    %114 = math.tanh %113 : vector<1x64xf32>
    %c7_98 = arith.constant 7 : index
    %c0_99 = arith.constant 0 : index
    %115 = vector.load %arg26[%c7_98, %c0_99] : memref<10x64xf32, #tpu.memory_space<vmem>>, vector<1x64xf32>
    tpu.vector_store %arg26[%c7_98, %c0_99], %114 {strides = array<i32>} : memref<10x64xf32, #tpu.memory_space<vmem>>, vector<1x64xf32>,
    %c8 = arith.constant 8 : index
    %c0_100 = arith.constant 0 : index
    %116 = vector.load %arg25[%c8, %c0_100] : memref<10x64xf32, #tpu.memory_space<vmem>>, vector<1x64xf32>
    %cst_101 = arith.constant dense<0.000000e+00> : vector<1x64xf32>
    %117 = tpu.matmul %109, %23, %cst_101 {dimension_numbers = #tpu.dot_dimension_numbers<[1], [0], [0], [1], [0, 0, 1, 1], [], []>} : vector<1x64xf32>, vector<64x64xf32>, vector<1x64xf32> -> vector<1x64xf32>
    %118 = arith.addf %116, %117 : vector<1x64xf32>
    %119 = math.tanh %118 : vector<1x64xf32>
    %cst_102 = arith.constant dense<0.000000e+00> : vector<1x64xf32>
    %120 = tpu.matmul %119, %24, %cst_102 {dimension_numbers = #tpu.dot_dimension_numbers<[1], [0], [0], [1], [0, 0, 1, 1], [], []>} : vector<1x64xf32>, vector<64x64xf32>, vector<1x64xf32> -> vector<1x64xf32>
    %cst_103 = arith.constant dense<0.000000e+00> : vector<1x64xf32>
    %121 = tpu.matmul %114, %25, %cst_103 {dimension_numbers = #tpu.dot_dimension_numbers<[1], [0], [0], [1], [0, 0, 1, 1], [], []>} : vector<1x64xf32>, vector<64x64xf32>, vector<1x64xf32> -> vector<1x64xf32>
    %122 = arith.addf %120, %121 : vector<1x64xf32>
    %123 = arith.addf %122, %26 : vector<1x64xf32>
    %124 = math.tanh %123 : vector<1x64xf32>
    %c8_104 = arith.constant 8 : index
    %c0_105 = arith.constant 0 : index
    %125 = vector.load %arg26[%c8_104, %c0_105] : memref<10x64xf32, #tpu.memory_space<vmem>>, vector<1x64xf32>
    tpu.vector_store %arg26[%c8_104, %c0_105], %124 {strides = array<i32>} : memref<10x64xf32, #tpu.memory_space<vmem>>, vector<1x64xf32>,
    %c9 = arith.constant 9 : index
    %c0_106 = arith.constant 0 : index
    %126 = vector.load %arg25[%c9, %c0_106] : memref<10x64xf32, #tpu.memory_space<vmem>>, vector<1x64xf32>
    %cst_107 = arith.constant dense<0.000000e+00> : vector<1x64xf32>
    %127 = tpu.matmul %119, %23, %cst_107 {dimension_numbers = #tpu.dot_dimension_numbers<[1], [0], [0], [1], [0, 0, 1, 1], [], []>} : vector<1x64xf32>, vector<64x64xf32>, vector<1x64xf32> -> vector<1x64xf32>
    %128 = arith.addf %126, %127 : vector<1x64xf32>
    %129 = math.tanh %128 : vector<1x64xf32>
    %cst_108 = arith.constant dense<0.000000e+00> : vector<1x64xf32>
    %130 = tpu.matmul %129, %24, %cst_108 {dimension_numbers = #tpu.dot_dimension_numbers<[1], [0], [0], [1], [0, 0, 1, 1], [], []>} : vector<1x64xf32>, vector<64x64xf32>, vector<1x64xf32> -> vector<1x64xf32>
    %cst_109 = arith.constant dense<0.000000e+00> : vector<1x64xf32>
    %131 = tpu.matmul %124, %25, %cst_109 {dimension_numbers = #tpu.dot_dimension_numbers<[1], [0], [0], [1], [0, 0, 1, 1], [], []>} : vector<1x64xf32>, vector<64x64xf32>, vector<1x64xf32> -> vector<1x64xf32>
    %132 = arith.addf %130, %131 : vector<1x64xf32>
    %133 = arith.addf %132, %26 : vector<1x64xf32>
    %134 = math.tanh %133 : vector<1x64xf32>
    %c9_110 = arith.constant 9 : index
    %c0_111 = arith.constant 0 : index
    %135 = vector.load %arg26[%c9_110, %c0_111] : memref<10x64xf32, #tpu.memory_space<vmem>>, vector<1x64xf32>
    tpu.vector_store %arg26[%c9_110, %c0_111], %134 {strides = array<i32>} : memref<10x64xf32, #tpu.memory_space<vmem>>, vector<1x64xf32>,
    %c0_112 = arith.constant 0 : index
    %c0_113 = arith.constant 0 : index
    %136 = vector.load %arg21[%c0_112, %c0_113] : memref<2x64xf32, #tpu.memory_space<vmem>>, vector<1x64xf32>
    tpu.vector_store %arg21[%c0_112, %c0_113], %129 {strides = array<i32>} : memref<2x64xf32, #tpu.memory_space<vmem>>, vector<1x64xf32>,
    %c1_114 = arith.constant 1 : index
    %c0_115 = arith.constant 0 : index
    %137 = vector.load %arg21[%c1_114, %c0_115] : memref<2x64xf32, #tpu.memory_space<vmem>>, vector<1x64xf32>
    tpu.vector_store %arg21[%c1_114, %c0_115], %134 {strides = array<i32>} : memref<2x64xf32, #tpu.memory_space<vmem>>, vector<1x64xf32>,
    %c0_116 = arith.constant 0 : index
    %c0_117 = arith.constant 0 : index
    %138 = vector.load %arg26[%c0_116, %c0_117] : memref<10x64xf32, #tpu.memory_space<vmem>>, vector<10x64xf32>
    %c0_118 = arith.constant 0 : index
    %c0_119 = arith.constant 0 : index
    %139 = vector.load %arg17[%c0_118, %c0_119] : memref<64x5xf32, #tpu.memory_space<vmem>>, vector<64x5xf32>
    %cst_120 = arith.constant dense<0.000000e+00> : vector<10x5xf32>
    %140 = tpu.matmul %138, %139, %cst_120 {dimension_numbers = #tpu.dot_dimension_numbers<[1], [0], [0], [1], [0, 0, 1, 1], [], []>} : vector<10x64xf32>, vector<64x5xf32>, vector<10x5xf32> -> vector<10x5xf32>
    %c0_121 = arith.constant 0 : index
    %c0_122 = arith.constant 0 : index
    %141 = vector.load %arg18[%c0_121, %c0_122] : memref<1x5xf32, #tpu.memory_space<vmem>>, vector<1x5xf32>
    %142 = vector.broadcast %141 : vector<1x5xf32> to vector<10x5xf32>
    %143 = arith.addf %140, %142 : vector<10x5xf32>
    %c0_123 = arith.constant 0 : index
    %c0_124 = arith.constant 0 : index
    %144 = vector.load %arg19[%c0_123, %c0_124] : memref<10x5xf32, #tpu.memory_space<vmem>>, vector<10x5xf32>
    tpu.vector_store %arg19[%c0_123, %c0_124], %143 {strides = array<i32>} : memref<10x5xf32, #tpu.memory_space<vmem>>, vector<10x5xf32>,
    return
  }
}

</mosaic_0001>

<bundles_post_ra>
// kernel: rrnn_forward.1
= control target key start
LH: loop header
LB: loop body
LE: loop exit
PB: predicated region body
PF: predicated region fallthrough
CT: control target
= control target key end

     0   :  { %s13721_s0 = inlined_call_operand.vmem [shape: f32[200,1], index: 0, kind: input, shape index: {}]   ;;  %s13722_s1 = inlined_call_operand.vmem [shape: f32[2,64], index: 1, kind: input, shape index: {}]   ;;  %s13723_s2 = inlined_call_operand.vmem [shape: f32[2,64], index: 2, kind: input, shape index: {}]   ;;  %s13724_s3 = inlined_call_operand.vmem [shape: f32[1,64], index: 3, kind: input, shape index: {}]   ;;  %s13725_s4 = inlined_call_operand.hbm [shape: f32[1,64], index: 4, kind: input, shape index: {}]   ;;  %s13726_s5 = inlined_call_operand.vmem [shape: f32[64,64], index: 5, kind: input, shape index: {}]   ;;  %s13727_s6 = inlined_call_operand.vmem [shape: f32[64,64], index: 6, kind: input, shape index: {}]   ;;  %s13728_s7 = inlined_call_operand.vmem [shape: f32[64,64], index: 7, kind: input, shape index: {}]   ;;  %s13729_s8 = inlined_call_operand.hbm [shape: f32[1,64], index: 8, kind: input, shape index: {}]   ;;  %s13730_s9 = inlined_call_operand.vmem [shape: f32[1,64], index: 9, kind: input, shape index: {}]   ;;  %s13731_s10 = inlined_call_operand.<no memory space> [shape: f32[1,1], index: 10, kind: input, shape index: {}]   ;;  %s13732_s11 = inlined_call_operand.vmem [shape: f32[64,64], index: 11, kind: input, shape index: {}]   ;;  %s13733_s12 = inlined_call_operand.hbm [shape: f32[1,64], index: 12, kind: input, shape index: {}]   ;;  %s13734_s13 = inlined_call_operand.vmem [shape: f32[64,64], index: 13, kind: input, shape index: {}]   ;;  %s13735_s14 = inlined_call_operand.hbm [shape: f32[64,64], index: 14, kind: input, shape index: {}]   ;;  %s13736_s15 = inlined_call_operand.hbm [shape: f32[64,64], index: 15, kind: input, shape index: {}]   ;;  %s13737_s16 = inlined_call_operand.hbm [shape: f32[1,64], index: 16, kind: input, shape index: {}]   ;;  %s13738_s17 = inlined_call_operand.vmem [shape: f32[64,5], index: 17, kind: input, shape index: {}]   ;;  %s13739_s18 = inlined_call_operand.hbm [shape: f32[1,5], index: 18, kind: input, shape index: {}]   ;;  %s13740_s19 = inlined_call_operand.vmem [shape: f32[10,5], index: 19, kind: output, shape index: {0}]   ;;  %s13741_s20 = inlined_call_operand.hbm [shape: f32[2,64], index: 20, kind: output, shape index: {1}]   ;;  %s13742_s21 = inlined_call_operand.hbm [shape: f32[2,64], index: 21, kind: output, shape index: {2}]  }
   0x1   :  { %13748 = sst [smem:[#allocation29_spill]] %s13721_s0  ;;  %v27_v0 = vstv %s13731_s10 }
   0x2   :  { %13749 = sst [smem:[#allocation30_spill]] %s13722_s1  ;;  %28 = vst [vmem:[#allocation7] sm:$0x1] %v27_v0 }
   0x3   :  { %13750 = sst [smem:[#allocation31_spill]] %s13723_s2 }
   0x4   :  { %13751 = sst [smem:[#allocation32_spill]] %s13724_s3 }
   0x5   :  { %13752 = sst [smem:[#allocation33_spill]] %s13725_s4 }
   0x6   :  { %13753 = sst [smem:[#allocation34_spill]] %s13726_s5 }
   0x7   :  { %29 = vsyncpa [#allocation9], 0 }
   0x8   :  { %30 = vsyncpa [#allocation12], 0 }
   0x9   :  { %31 = vsyncpa [#allocation15], 0 }
   0xa   :  { %32 = vsyncpa [#allocation18], 0 }
   0xb   :  { %33 = vsyncpa [#allocation10], 0 }
   0xc   :  { %34 = vsyncpa [#allocation22], 0  ;;  %s11864_s26 = smov [#allocation11]   ;;  %s11865_s3 = smov [#allocation14]  }
   0xd   :  { %s65_s27 = sshll.u32 %s11864_s26, 4  ;;  %s92_s28 = sshll.u32 %s11865_s3, 4  ;;  %s66_s27 = int_to_ptr.vmem [resolvable:$true] %s65_s27  ;;  %s11996_s28 = int_to_ptr.vmem [resolvable:$true] %s92_s28 }
   0xe   :  { %s11630_s4 = scalar_lea.hbm %s13729_s8, 16 }
   0xf   :  { %p11631_p0 = scmp.ne.s32.totalorder %s13729_s8, %s11630_s4  ;;  %p11634_p1 = scmp.lt.u32.totalorder %s11630_s4, %s13729_s8 }
  0x11   :  { %p11636_p2 = pnand %p11634_p1, %p11631_p0 }
  0x13   :  { %11639 = shalt.err (!%p11636_p2)
}
  0x14   :  { %s11640_s23 = scalar_lea.vmem %s66_s27, 16  ;;  %s11644_s1 = scalar_lea.vmem %s66_s27, 32 }
  0x15   :  { %p11641_p3 = scmp.ne.s32.totalorder %s66_s27, %s11640_s23  ;;  %p11645_p4 = scmp.lt.s32.totalorder %s66_s27, %s66_s27 }
  0x16   :  { %p11646_p5 = scmp.lt.s32.totalorder %s11644_s1, %s11640_s23 }
  0x18   :  { %p11647_p6 = por %p11646_p5, %p11645_p4 }
  0x1a   :  { %p11648_p7 = pnand %p11647_p6, %p11641_p3 }
  0x1c   :  { %11651 = shalt.err (!%p11648_p7)
}
  0x1d   :  { %68 = dma.hbm_to_vmem [thread:$0]  %s13729_s8, 16, %s66_s27, [#allocation12]  }
  0x1e   :  { %s11652_s3 = scalar_lea.hbm %s13735_s14, 1024 }
  0x1f   :  { %p11653_p8 = scmp.ne.s32.totalorder %s13735_s14, %s11652_s3  ;;  %p11656_p9 = scmp.lt.u32.totalorder %s11652_s3, %s13735_s14 }
  0x21   :  { %p11658_p10 = pnand %p11656_p9, %p11653_p8 }
  0x23   :  { %11661 = shalt.err (!%p11658_p10)
}
  0x24   :  { %s11662_s10 = scalar_lea.vmem %s11996_s28, 1024  ;;  %p11667_p12 = scmp.lt.s32.totalorder %s11996_s28, %s11996_s28 }
  0x25   :  { %p11663_p11 = scmp.ne.s32.totalorder %s11996_s28, %s11662_s10  ;;  %p11668_p13 = scmp.lt.s32.totalorder %s11662_s10, %s11662_s10 }
  0x27   :  { %p11669_p0 = por %p11668_p13, %p11667_p12 }
  0x29   :  { %p11670_p1 = pnand %p11669_p0, %p11663_p11 }
  0x2b   :  { %11673 = shalt.err (!%p11670_p1)
}
  0x2c   :  { %s11866_s8 = smov 128   ;;  %s11867_s27 = smov 8  }
  0x2d   :  { %98 = dma.hbm_to_vmem [thread:$0]  %s13735_s14, 1024, %s11996_s28, [#allocation15], %s11866_s8, %s11866_s8, %s11867_s27  }
  0x2e   :  { %s11868_s23 = smov [#allocation17]   ;;  %s11869_s24 = smov [#allocation8]  }
  0x2f   :  { %s117_s1 = sshll.u32 %s11868_s23, 4  ;;  %s49_s2 = sshll.u32 %s11869_s24, 4  ;;  %s118_s1 = int_to_ptr.vmem [resolvable:$true] %s117_s1  ;;  %s50_s2 = int_to_ptr.vmem [resolvable:$true] %s49_s2 }
  0x30   :  { %s11674_s3 = scalar_lea.hbm %s13737_s16, 16 }
  0x31   :  { %p11675_p2 = scmp.ne.s32.totalorder %s13737_s16, %s11674_s3  ;;  %p11678_p3 = scmp.lt.u32.totalorder %s11674_s3, %s13737_s16 }
  0x33   :  { %p11680_p4 = pnand %p11678_p3, %p11675_p2 }
  0x35   :  { %11683 = shalt.err (!%p11680_p4)
}
  0x36   :  { %s11684_s14 = scalar_lea.vmem %s118_s1, 16  ;;  %s11688_s28 = scalar_lea.vmem %s118_s1, 32 }
  0x37   :  { %p11685_p5 = scmp.ne.s32.totalorder %s118_s1, %s11684_s14  ;;  %p11689_p6 = scmp.lt.s32.totalorder %s118_s1, %s118_s1 }
  0x38   :  { %p11690_p7 = scmp.lt.s32.totalorder %s11688_s28, %s11684_s14 }
  0x3a   :  { %p11691_p8 = por %p11690_p7, %p11689_p6 }
  0x3c   :  { %p11692_p9 = pnand %p11691_p8, %p11685_p5 }
  0x3e   :  { %11695 = shalt.err (!%p11692_p9)
}
  0x3f   :  { %120 = dma.hbm_to_vmem [thread:$0]  %s13737_s16, 16, %s118_s1, [#allocation18]  }
  0x40   :  { %s13754_s24 = sld [smem:[#allocation33_spill]] }
  0x46   :  { %s11696_s25 = scalar_lea.hbm %s13754_s24, 16 }
  0x47   :  { %p11697_p10 = scmp.ne.s32.totalorder %s13754_s24, %s11696_s25  ;;  %p11700_p11 = scmp.lt.u32.totalorder %s11696_s25, %s13754_s24 }
  0x49   :  { %p11702_p12 = pnand %p11700_p11, %p11697_p10 }
  0x4b   :  { %11705 = shalt.err (!%p11702_p12)
}
  0x4c   :  { %s11706_s4 = scalar_lea.vmem %s50_s2, 16  ;;  %s11710_s30 = scalar_lea.vmem %s50_s2, 32 }
  0x4d   :  { %p11707_p13 = scmp.ne.s32.totalorder %s50_s2, %s11706_s4  ;;  %p11711_p0 = scmp.lt.s32.totalorder %s50_s2, %s50_s2 }
  0x4e   :  { %p11712_p1 = scmp.lt.s32.totalorder %s11710_s30, %s11706_s4 }
  0x50   :  { %p11713_p2 = por %p11712_p1, %p11711_p0 }
  0x52   :  { %p11714_p3 = pnand %p11713_p2, %p11707_p13 }
  0x54   :  { %11717 = shalt.err (!%p11714_p3)
}
  0x55   :  { %52 = dma.hbm_to_vmem [thread:$0]  %s13754_s24, 16, %s50_s2, [#allocation9]  }
  0x56   :  { %s11870_s14 = smov [#allocation13]   ;;  %s11871_s10 = smov [#allocation16]  }
  0x57   :  { %s81_s28 = sshll.u32 %s11870_s14, 4  ;;  %s104_s5 = sshll.u32 %s11871_s10, 4  ;;  %s82_s28 = int_to_ptr.vmem [resolvable:$true] %s81_s28  ;;  %s12054_s5 = int_to_ptr.vmem [resolvable:$true] %s104_s5 }
  0x58   :  { %s11718_s25 = scalar_lea.hbm %s13733_s12, 16 }
  0x59   :  { %p11719_p4 = scmp.ne.s32.totalorder %s13733_s12, %s11718_s25  ;;  %p11722_p5 = scmp.lt.u32.totalorder %s11718_s25, %s13733_s12 }
  0x5b   :  { %p11724_p6 = pnand %p11722_p5, %p11719_p4 }
  0x5d   :  { %11727 = shalt.err (!%p11724_p6)
}
  0x5e   :  { %s11728_s2 = scalar_lea.vmem %s82_s28, 16  ;;  %s11732_s24 = scalar_lea.vmem %s82_s28, 32 }
  0x5f   :  { %p11729_p7 = scmp.ne.s32.totalorder %s82_s28, %s11728_s2  ;;  %p11733_p8 = scmp.lt.s32.totalorder %s82_s28, %s82_s28 }
  0x60   :  { %p11734_p9 = scmp.lt.s32.totalorder %s11732_s24, %s11728_s2 }
  0x62   :  { %p11735_p10 = por %p11734_p9, %p11733_p8 }
  0x64   :  { %p11736_p11 = pnand %p11735_p10, %p11729_p7 }
  0x66   :  { %11739 = shalt.err (!%p11736_p11)
}
  0x67   :  { %84 = dma.hbm_to_vmem [thread:$0]  %s13733_s12, 16, %s82_s28, [#allocation12]  }
  0x68   :  { %s11740_s14 = scalar_lea.hbm %s13736_s15, 1024 }
  0x69   :  { %p11741_p12 = scmp.ne.s32.totalorder %s13736_s15, %s11740_s14  ;;  %p11744_p13 = scmp.lt.u32.totalorder %s11740_s14, %s13736_s15 }
  0x6b   :  { %p11746_p0 = pnand %p11744_p13, %p11741_p12 }
  0x6d   :  { %11749 = shalt.err (!%p11746_p0)
}
  0x6e   :  { %s11750_s26 = scalar_lea.vmem %s12054_s5, 1024  ;;  %p11755_p2 = scmp.lt.s32.totalorder %s12054_s5, %s12054_s5 }
  0x6f   :  { %p11751_p1 = scmp.ne.s32.totalorder %s12054_s5, %s11750_s26  ;;  %p11756_p3 = scmp.lt.s32.totalorder %s11750_s26, %s11750_s26 }
  0x71   :  { %p11757_p4 = por %p11756_p3, %p11755_p2 }
  0x73   :  { %p11758_p5 = pnand %p11757_p4, %p11751_p1 }
  0x75   :  { %11761 = shalt.err (!%p11758_p5)
}
  0x76   :  { %110 = dma.hbm_to_vmem [thread:$0]  %s13736_s15, 1024, %s12054_s5, [#allocation15], %s11866_s8, %s11866_s8, %s11867_s27  }
  0x77   :  { %s11872_s3 = smov [#allocation19]   ;;  %s11762_s24 = scalar_lea.hbm %s13739_s18, 16 }
  0x78   :  { %s129_s29 = sshll.u32 %s11872_s3, 4  ;;  %p11763_p6 = scmp.ne.s32.totalorder %s13739_s18, %s11762_s24  ;;  %s130_s29 = int_to_ptr.vmem [resolvable:$true] %s129_s29 }
  0x79   :  { %p11766_p7 = scmp.lt.u32.totalorder %s11762_s24, %s13739_s18 }
  0x7b   :  { %p11768_p8 = pnand %p11766_p7, %p11763_p6 }
  0x7d   :  { %11771 = shalt.err (!%p11768_p8)
}
  0x7e   :  { %s11772_s14 = scalar_lea.vmem %s130_s29, 16  ;;  %s11776_s15 = scalar_lea.vmem %s130_s29, 32 }
  0x7f   :  { %p11773_p9 = scmp.ne.s32.totalorder %s130_s29, %s11772_s14  ;;  %p11777_p10 = scmp.lt.s32.totalorder %s130_s29, %s130_s29 }
  0x80   :  { %p11778_p11 = scmp.lt.s32.totalorder %s11776_s15, %s11772_s14 }
  0x82   :  { %p11779_p12 = por %p11778_p11, %p11777_p10 }
  0x84   :  { %p11780_p13 = pnand %p11779_p12, %p11773_p9 }
  0x86   :  { %11783 = shalt.err (!%p11780_p13)
}
  0x87   :  { %132 = dma.hbm_to_vmem [thread:$0]  %s13739_s18, 16, %s130_s29, [#allocation18]  }
  0x88   :  { %11840 = dma.done.wait [#allocation9], 16  }
  0x89   :  { %11841 = vsyncadd [#allocation9], 4294967280 }
  0x8a   :  { %11842 = dma.done.wait [#allocation12], 32  }
  0x8b   :  { %11843 = vsyncadd [#allocation12], 4294967264 }
  0x8c   :  { %11844 = dma.done.wait [#allocation15], 2048  }
  0x8d   :  { %11845 = vsyncadd [#allocation15], 4294965248 }
  0x8e   :  { %11846 = dma.done.wait [#allocation18], 32  }
  0x8f   :  { %11847 = vsyncadd [#allocation18], 4294967264  ;;  %vm395_vm0 = vcmask 523264   ;;  %v11873_v1 = vmov 0   ;;  %v11874_v2 = vmov 0.0   ;;  %s13755_s10 = sld [smem:[#allocation34_spill]] }
  0x90   :  { %11508 = vset.pattern.permute.xlu1 %v11873_v1  ;;  %11507 = vset.pattern.permute.xlu0 %v11873_v1  ;;  %421 = vst.msk [vmem:[#allocation3] sm:$0xff] %vm395_vm0, %v11874_v2  ;;  %422 = vst.msk [vmem:[#allocation3 + $0x8] sm:$0xff] %vm395_vm0, %v11874_v2  ;;  %v12159_v11 = vld [vmem:[%s13727_s6] sm:$0xff]  ;;  %v12164_v12 = vld [vmem:[%s13727_s6 + $0x8] sm:$0xff]  ;;  %s13756_s28 = sld [smem:[#allocation30_spill]]  ;;  %s13757_s2 = sld [smem:[#allocation29_spill]] }
  0x91   :  { %423 = vst.msk [vmem:[#allocation3 + $0x10] sm:$0xff] %vm395_vm0, %v11874_v2  ;;  %424 = vst.msk [vmem:[#allocation3 + $0x18] sm:$0xff] %vm395_vm0, %v11874_v2  ;;  %v12169_v13 = vld [vmem:[%s13727_s6 + $0x10] sm:$0xff]  ;;  %v12174_v14 = vld [vmem:[%s13727_s6 + $0x18] sm:$0xff]  ;;  %s13758_s4 = sld [smem:[#allocation32_spill]] }
  0x92   :  { %425 = vst.msk [vmem:[#allocation3 + $0x20] sm:$0xff] %vm395_vm0, %v11874_v2  ;;  %426 = vst.msk [vmem:[#allocation3 + $0x28] sm:$0xff] %vm395_vm0, %v11874_v2  ;;  %v12179_v15 = vld [vmem:[%s13727_s6 + $0x20] sm:$0xff]  ;;  %v12184_v16 = vld [vmem:[%s13727_s6 + $0x28] sm:$0xff] }
  0x93   :  { %427 = vst.msk [vmem:[#allocation3 + $0x30] sm:$0xff] %vm395_vm0, %v11874_v2  ;;  %428 = vst.msk [vmem:[#allocation3 + $0x38] sm:$0xff] %vm395_vm0, %v11874_v2  ;;  %v12189_v17 = vld [vmem:[%s13727_s6 + $0x30] sm:$0xff]  ;;  %v12194_v18 = vld [vmem:[%s13727_s6 + $0x38] sm:$0xff] }
  0x94   :  { %v12199_v19 = vld [vmem:[%s13728_s7] sm:$0xff]  ;;  %v12204_v20 = vld [vmem:[%s13728_s7 + $0x8] sm:$0xff]  ;;  %v12209_v21 = vld [vmem:[%s13728_s7 + $0x10] sm:$0xff] }
  0x95   :  { %v12119_v3 = vld [vmem:[%s13755_s10] sm:$0xff]  ;;  %v12124_v4 = vld [vmem:[%s13755_s10 + $0x8] sm:$0xff]  ;;  %v12129_v5 = vld [vmem:[%s13755_s10 + $0x10] sm:$0xff] }
  0x96   :  { %v12134_v6 = vld [vmem:[%s13755_s10 + $0x18] sm:$0xff]  ;;  %v12139_v7 = vld [vmem:[%s13755_s10 + $0x20] sm:$0xff]  ;;  %v12144_v8 = vld [vmem:[%s13755_s10 + $0x28] sm:$0xff] }
  0x97   :  { %v12149_v9 = vld [vmem:[%s13755_s10 + $0x30] sm:$0xff]  ;;  %v12154_v10 = vld [vmem:[%s13755_s10 + $0x38] sm:$0xff]  ;;  %v12219_v23 = vld [vmem:[%s13728_s7 + $0x20] sm:$0xff] }
  0x98   :  { %v12214_v22 = vld [vmem:[%s13728_s7 + $0x18] sm:$0xff]  ;;  %v12224_v24 = vld [vmem:[%s13728_s7 + $0x28] sm:$0xff]  ;;  %v12229_v25 = vld [vmem:[%s13728_s7 + $0x30] sm:$0xff] }
  0x99   :  { %v12234_v26 = vld [vmem:[%s13728_s7 + $0x38] sm:$0xff]  ;;  %v12241_v28 = vld [vmem:[%s13730_s9] sm:$0x1]  ;;  %v12253_v31 = vld [vmem:[%s13756_s28 + $0x1] sm:$0x1]  }
  0x9a   :  { %v12236_v27 = vld [vmem:[#allocation11] sm:$0x1]  ;;  %v12243_v29 = vld [vmem:[#allocation7] sm:$0x1]  ;;  %v12248_v30 = vld [vmem:[%s13756_s28] sm:$0x1]  }
  0x9b   :  { %v183_v32 = vld [vmem:[%s13757_s2 + $0x10] sm:$0xff]  ;;  %v181_v33 = vld [vmem:[%s13757_s2] sm:$0xff]  ;;  %v184_v34 = vld [vmem:[%s13757_s2 + $0x18] sm:$0xff] }
  0x9c   :  { %219 = vperm.xlu1 %11508, %v183_v32   ;;  %209 = vperm.xlu0 %11507, %v181_v33   ;;  %v182_v35 = vld [vmem:[%s13757_s2 + $0x8] sm:$0xff]  ;;  %v185_v37 = vld [vmem:[%s13757_s2 + $0x20] sm:$0xff]  ;;  %v188_v38 = vld [vmem:[%s13757_s2 + $0x38] sm:$0xff] }
  0x9d   :  { %v186_v36 = vld [vmem:[%s13757_s2 + $0x28] sm:$0xff]  ;;  %v187_v39 = vld [vmem:[%s13757_s2 + $0x30] sm:$0xff]  ;;  %v189_v41 = vld [vmem:[%s13757_s2 + $0x40] sm:$0xff] }
  0x9e   :  { %v190_v40 = vld [vmem:[%s13757_s2 + $0x48] sm:$0xff]  ;;  %v192_v42 = vld [vmem:[%s13757_s2 + $0x58] sm:$0xff]  ;;  %v191_v43 = vld [vmem:[%s13757_s2 + $0x50] sm:$0xff] }
  0x9f   :  { %v194_v44 = vld [vmem:[%s13757_s2 + $0x68] sm:$0xff]  ;;  %v193_v45 = vld [vmem:[%s13757_s2 + $0x60] sm:$0xff]  ;;  %v196_v46 = vld [vmem:[%s13757_s2 + $0x78] sm:$0xff] }
  0xa0   :  { %224 = vperm.xlu1 %11508, %v184_v34   ;;  %214 = vperm.xlu0 %11507, %v182_v35   ;;  %v195_v47 = vld [vmem:[%s13757_s2 + $0x70] sm:$0xff]  ;;  %v198_v48 = vld [vmem:[%s13757_s2 + $0x88] sm:$0xff]  ;;  %v197_v49 = vld [vmem:[%s13757_s2 + $0x80] sm:$0xff] }
  0xa1   :  { %v200_v50 = vld [vmem:[%s13757_s2 + $0x98] sm:$0xff]  ;;  %v199_v51 = vld [vmem:[%s13757_s2 + $0x90] sm:$0xff]  ;;  %v202_v52 = vld [vmem:[%s13757_s2 + $0xa8] sm:$0xff] }
  0xa2   :  { %v201_v53 = vld [vmem:[%s13757_s2 + $0xa0] sm:$0xff]  ;;  %v204_v54 = vld [vmem:[%s13757_s2 + $0xb8] sm:$0xff]  ;;  %v203_v55 = vld [vmem:[%s13757_s2 + $0xb0] sm:$0xff] }
  0xa3   :  { %v205_v56 = vld [vmem:[%s13757_s2 + $0xc0] sm:$0xff]  ;;  %v12335_v59 = vld [vmem:[#allocation8] ss:$0 sm:$0xff]  ;;  %s12418_s2 = smov 0  }
  0xa4   :  { %234 = vperm.xlu1 %11508, %v186_v36   ;;  %229 = vperm.xlu0 %11507, %v185_v37   ;;  %v12333_v57 = vld [vmem:[%s13758_s4] ss:$0 sm:$0xff] }
  0xa8   :  { %244 = vperm.xlu1 %11508, %v188_v38   ;;  %239 = vperm.xlu0 %11507, %v187_v39  }
  0xac   :  { %254 = vperm.xlu1 %11508, %v190_v40   ;;  %249 = vperm.xlu0 %11507, %v189_v41  }
  0xb0   :  { %264 = vperm.xlu1 %11508, %v192_v42   ;;  %259 = vperm.xlu0 %11507, %v191_v43  }
  0xb4   :  { %274 = vperm.xlu1 %11508, %v194_v44   ;;  %269 = vperm.xlu0 %11507, %v193_v45  }
  0xb8   :  { %284 = vperm.xlu1 %11508, %v196_v46   ;;  %279 = vperm.xlu0 %11507, %v195_v47  }
  0xbc   :  { %294 = vperm.xlu1 %11508, %v198_v48   ;;  %289 = vperm.xlu0 %11507, %v197_v49  }
  0xc0   :  { %304 = vperm.xlu1 %11508, %v200_v50   ;;  %299 = vperm.xlu0 %11507, %v199_v51  }
  0xc4   :  { %314 = vperm.xlu1 %11508, %v202_v52   ;;  %309 = vperm.xlu0 %11507, %v201_v53  }
  0xc8   :  { %324 = vperm.xlu1 %11508, %v204_v54   ;;  %319 = vperm.xlu0 %11507, %v203_v55  }
  0xcc   :  { %329 = vperm.xlu0 %11507, %v205_v56  }
 0x11b   :  { %v220_v58 = vpop.permute.xlu1 %219  ;;  %v210_v61 = vpop.permute.xlu0 %209 }
 0x11c   :  { %v340_v60 = vmul.f32 %v12333_v57, %v220_v58  ;;  %v338_v62 = vmul.f32 %v12333_v57, %v210_v61 }
 0x11e   :  { %v372_v63 = vadd.f32 %v12335_v59, %v340_v60  ;;  %v370_v0 = vadd.f32 %v12335_v59, %v338_v62 }
 0x11f   :  { %v225_v1 = vpop.permute.xlu1 %224  ;;  %v215_v33 = vpop.permute.xlu0 %214 }
 0x120   :  { %398 = vst.msk [vmem:[#allocation2 + $0x10] sm:$0xff] %vm395_vm0, %v372_v63  ;;  %v341_v32 = vmul.f32 %v12333_v57, %v225_v1  ;;  %396 = vst.msk [vmem:[#allocation2] sm:$0xff] %vm395_vm0, %v370_v0  ;;  %v339_v34 = vmul.f32 %v12333_v57, %v215_v33 }
 0x122   :  { %v373_v35 = vadd.f32 %v12335_v59, %v341_v32  ;;  %v371_v36 = vadd.f32 %v12335_v59, %v339_v34 }
 0x123   :  { %v235_v37 = vpop.permute.xlu1 %234  ;;  %v230_v39 = vpop.permute.xlu0 %229 }
 0x124   :  { %399 = vst.msk [vmem:[#allocation2 + $0x18] sm:$0xff] %vm395_vm0, %v373_v35  ;;  %v343_v38 = vmul.f32 %v12333_v57, %v235_v37  ;;  %397 = vst.msk [vmem:[#allocation2 + $0x8] sm:$0xff] %vm395_vm0, %v371_v36  ;;  %v342_v40 = vmul.f32 %v12333_v57, %v230_v39 }
 0x126   :  { %v375_v41 = vadd.f32 %v12335_v59, %v343_v38  ;;  %v374_v42 = vadd.f32 %v12335_v59, %v342_v40 }
 0x127   :  { %v245_v43 = vpop.permute.xlu1 %244  ;;  %v240_v45 = vpop.permute.xlu0 %239 }
 0x128   :  { %401 = vst.msk [vmem:[#allocation2 + $0x28] sm:$0xff] %vm395_vm0, %v375_v41  ;;  %v345_v44 = vmul.f32 %v12333_v57, %v245_v43  ;;  %400 = vst.msk [vmem:[#allocation2 + $0x20] sm:$0xff] %vm395_vm0, %v374_v42  ;;  %v344_v46 = vmul.f32 %v12333_v57, %v240_v45 }
 0x12a   :  { %v377_v47 = vadd.f32 %v12335_v59, %v345_v44  ;;  %v376_v48 = vadd.f32 %v12335_v59, %v344_v46 }
 0x12b   :  { %v255_v49 = vpop.permute.xlu1 %254  ;;  %v250_v51 = vpop.permute.xlu0 %249 }
 0x12c   :  { %403 = vst.msk [vmem:[#allocation2 + $0x38] sm:$0xff] %vm395_vm0, %v377_v47  ;;  %v347_v50 = vmul.f32 %v12333_v57, %v255_v49  ;;  %402 = vst.msk [vmem:[#allocation2 + $0x30] sm:$0xff] %vm395_vm0, %v376_v48  ;;  %v346_v52 = vmul.f32 %v12333_v57, %v250_v51 }
 0x12e   :  { %v379_v53 = vadd.f32 %v12335_v59, %v347_v50  ;;  %v378_v54 = vadd.f32 %v12335_v59, %v346_v52 }
 0x12f   :  { %v265_v55 = vpop.permute.xlu1 %264  ;;  %v260_v58 = vpop.permute.xlu0 %259 }
 0x130   :  { %405 = vst.msk [vmem:[#allocation2 + $0x48] sm:$0xff] %vm395_vm0, %v379_v53  ;;  %v349_v56 = vmul.f32 %v12333_v57, %v265_v55  ;;  %404 = vst.msk [vmem:[#allocation2 + $0x40] sm:$0xff] %vm395_vm0, %v378_v54  ;;  %v348_v60 = vmul.f32 %v12333_v57, %v260_v58 }
 0x132   :  { %v381_v61 = vadd.f32 %v12335_v59, %v349_v56  ;;  %v380_v62 = vadd.f32 %v12335_v59, %v348_v60 }
 0x133   :  { %v275_v63 = vpop.permute.xlu1 %274  ;;  %v270_v1 = vpop.permute.xlu0 %269 }
 0x134   :  { %407 = vst.msk [vmem:[#allocation2 + $0x58] sm:$0xff] %vm395_vm0, %v381_v61  ;;  %v351_v0 = vmul.f32 %v12333_v57, %v275_v63  ;;  %406 = vst.msk [vmem:[#allocation2 + $0x50] sm:$0xff] %vm395_vm0, %v380_v62  ;;  %v350_v32 = vmul.f32 %v12333_v57, %v270_v1 }
 0x136   :  { %v383_v33 = vadd.f32 %v12335_v59, %v351_v0  ;;  %v382_v34 = vadd.f32 %v12335_v59, %v350_v32 }
 0x137   :  { %v285_v35 = vpop.permute.xlu1 %284  ;;  %v280_v37 = vpop.permute.xlu0 %279 }
 0x138   :  { %409 = vst.msk [vmem:[#allocation2 + $0x68] sm:$0xff] %vm395_vm0, %v383_v33  ;;  %v353_v36 = vmul.f32 %v12333_v57, %v285_v35  ;;  %408 = vst.msk [vmem:[#allocation2 + $0x60] sm:$0xff] %vm395_vm0, %v382_v34  ;;  %v352_v38 = vmul.f32 %v12333_v57, %v280_v37 }
 0x13a   :  { %v385_v39 = vadd.f32 %v12335_v59, %v353_v36  ;;  %v384_v40 = vadd.f32 %v12335_v59, %v352_v38 }
 0x13b   :  { %v295_v41 = vpop.permute.xlu1 %294  ;;  %v290_v43 = vpop.permute.xlu0 %289 }
 0x13c   :  { %411 = vst.msk [vmem:[#allocation2 + $0x78] sm:$0xff] %vm395_vm0, %v385_v39  ;;  %v355_v42 = vmul.f32 %v12333_v57, %v295_v41  ;;  %410 = vst.msk [vmem:[#allocation2 + $0x70] sm:$0xff] %vm395_vm0, %v384_v40  ;;  %v354_v44 = vmul.f32 %v12333_v57, %v290_v43 }
 0x13e   :  { %v387_v45 = vadd.f32 %v12335_v59, %v355_v42  ;;  %v386_v46 = vadd.f32 %v12335_v59, %v354_v44 }
 0x13f   :  { %v305_v47 = vpop.permute.xlu1 %304  ;;  %v300_v49 = vpop.permute.xlu0 %299 }
 0x140   :  { %413 = vst.msk [vmem:[#allocation2 + $0x88] sm:$0xff] %vm395_vm0, %v387_v45  ;;  %v357_v48 = vmul.f32 %v12333_v57, %v305_v47  ;;  %412 = vst.msk [vmem:[#allocation2 + $0x80] sm:$0xff] %vm395_vm0, %v386_v46  ;;  %v356_v50 = vmul.f32 %v12333_v57, %v300_v49 }
 0x142   :  { %v389_v51 = vadd.f32 %v12335_v59, %v357_v48  ;;  %v388_v52 = vadd.f32 %v12335_v59, %v356_v50 }
 0x143   :  { %v315_v53 = vpop.permute.xlu1 %314  ;;  %v310_v55 = vpop.permute.xlu0 %309 }
 0x144   :  { %415 = vst.msk [vmem:[#allocation2 + $0x98] sm:$0xff] %vm395_vm0, %v389_v51  ;;  %v359_v54 = vmul.f32 %v12333_v57, %v315_v53  ;;  %414 = vst.msk [vmem:[#allocation2 + $0x90] sm:$0xff] %vm395_vm0, %v388_v52  ;;  %v358_v56 = vmul.f32 %v12333_v57, %v310_v55 }
 0x146   :  { %v391_v58 = vadd.f32 %v12335_v59, %v359_v54  ;;  %v390_v60 = vadd.f32 %v12335_v59, %v358_v56 }
 0x147   :  { %v325_v61 = vpop.permute.xlu1 %324  ;;  %v320_v63 = vpop.permute.xlu0 %319 }
 0x148   :  { %417 = vst.msk [vmem:[#allocation2 + $0xa8] sm:$0xff] %vm395_vm0, %v391_v58  ;;  %v361_v62 = vmul.f32 %v12333_v57, %v325_v61  ;;  %416 = vst.msk [vmem:[#allocation2 + $0xa0] sm:$0xff] %vm395_vm0, %v390_v60  ;;  %v360_v0 = vmul.f32 %v12333_v57, %v320_v63 }
 0x14a   :  { %v393_v1 = vadd.f32 %v12335_v59, %v361_v62  ;;  %v392_v32 = vadd.f32 %v12335_v59, %v360_v0 }
 0x14b   :  { %v330_v33 = vpop.permute.xlu0 %329 }
 0x14c   :  { %419 = vst.msk [vmem:[#allocation2 + $0xb8] sm:$0xff] %vm395_vm0, %v393_v1  ;;  %418 = vst.msk [vmem:[#allocation2 + $0xb0] sm:$0xff] %vm395_vm0, %v392_v32  ;;  %v362_v34 = vmul.f32 %v12333_v57, %v330_v33 }
 0x14e   :  { %v394_v35 = vadd.f32 %v12335_v59, %v362_v34 }
 0x150   :  { %420 = vst.msk [vmem:[#allocation2 + $0xc0] sm:$0xff] %vm395_vm0, %v394_v35 }
 0x151 LB: > { %v12427_v57 = vpack.c.bf16 %v12124_v4, %v12119_v3  ;;  %v11875_v59 = vmov 0.0|0.0   ;;  %v12434_v36 = vpack.c.bf16 %v12134_v6, %v12129_v5  ;;  %vm11876_vm1 = vmmov 0   ;;  %s439_s30 = smul.u32 20, %s11862_s2  ;;  %vm13194_vm3 = vmpackc.low %vm395_vm0, %vm395_vm0  ;;  %s5037_s1 = scalar_lea.vmem [#allocation4], %s11862_s2  ;;  %s11862_s2 = sphi %s12418_s2, %s436_s2   ;;  %v11858_v30 = vphi %v12248_v30, %v13762_v30   ;;  %v11854_v31 = vphi %v12253_v31, %v13761_v31  }
 0x152   : > { %10336 = vmatprep.subr.bf16.mxu1 %v11875_v59  ;;  %10360 = vmatprep.subr.bf16.mxu0 %v11875_v59  ;;  %v11877_v37 = vmov 0.0   ;;  %v12441_v38 = vpack.c.bf16 %v12164_v12, %v12159_v11  ;;  %v12449_v39 = vpack.c.bf16 %v12144_v8, %v12139_v7  ;;  %v12456_v40 = vpack.c.bf16 %v12154_v10, %v12149_v9  ;;  %s436_s2 = sadd.s32 1, %s11862_s2  }
 0x153   : > { %10338 = vmatpush3.bf16.msra.mxu1 %v12427_v57  ;;  %8585 = vmatprep.mubr.msk.f32.mxu1 %vm11876_vm1, %v11877_v37  ;;  %v12462_v41 = vpack.c.bf16 %v12204_v20, %v12199_v19  ;;  %v12469_v42 = vpack.c.bf16 %v12214_v22, %v12209_v21  ;;  %v12477_v43 = vpack.c.bf16 %v12224_v24, %v12219_v23  ;;  %s12518_s16 = scalar_lea.vmem [#allocation2], %s439_s30  ;;  %vm665_vm2 = vcmask 516096   ;;  %p433_p0 = scmp.ge.s32.totalorder %s436_s2, 10  }
 0x154   : > { %10339 = vmatprep.subr.bf16.mxu1 %v11875_v59  ;;  %8623 = vmatprep.mubr.msk.f32.mxu0 %vm11876_vm1, %v11877_v37  ;;  %v12506_v44 = vpack.c.bf16 %v12184_v16, %v12179_v15  ;;  %v12512_v45 = vpack.c.bf16 %v12194_v18, %v12189_v17  ;;  %v5072_v3 = vld [vmem:[%s13732_s11 + $0x18] sm:$0xff] (%p433_p0)  ;;  %v5073_v4 = vld [vmem:[%s13732_s11 + $0x20] sm:$0xff] (%p433_p0)  ;;  %v11879_v5 = vmov (%p433_p0), 0.0|0.0   ;;  %vm11880_vm4 = vmmov (%p433_p0), 0   ;;  %v5074_v7 = vld [vmem:[%s13732_s11 + $0x28] sm:$0xff] (%p433_p0)  ;;  %s13763_s10 = sld [smem:[#allocation31_spill]] (%p433_p0) }
 0x155   : > { %10362 = vmatpush3.bf16.msra.mxu0 %v12441_v38  ;;  %v5042_v8 = vld [vmem:[%s13734_s13] sm:$0xff] (%p433_p0)  ;;  %v5043_v9 = vld [vmem:[%s13734_s13 + $0x8] sm:$0xff] (%p433_p0)  ;;  %v5044_v12 = vld [vmem:[%s13734_s13 + $0x10] sm:$0xff] (%p433_p0)  ;;  %vm5166_vm5 = vcmask (%p433_p0), 517120   ;;  %s11882_s15 = smov (%p433_p0), [#allocation21]  }
 0x156   : > { %10363 = vmatprep.subr.bf16.mxu0 %v11875_v59  ;;  %v13257_v10 = vpack.c.bf16 (%p433_p0), %v5043_v9, %v5042_v8  ;;  %v5075_v15 = vld [vmem:[%s13732_s11 + $0x30] sm:$0xff] (%p433_p0)  ;;  %v5076_v17 = vld [vmem:[%s13732_s11 + $0x38] sm:$0xff] (%p433_p0)  ;;  %v5046_v18 = vld [vmem:[%s13734_s13 + $0x20] sm:$0xff] (%p433_p0) }
 0x157   : > { %10341 = vmatpush3.bf16.msra.mxu1 %v12434_v36  ;;  %v441_v46 = vld [vmem:[%s12518_s16] sm:$0x1]  ;;  %v7609_v53 = vld [vmem:[%s12518_s16 + $0x1] sm:$0x1]  ;;  %v5047_v19 = vld [vmem:[%s13734_s13 + $0x28] sm:$0xff] (%p433_p0)  ;;  %v11084_v20 = vpack.c.bf16 (%p433_p0), %v5076_v17, %v5075_v15 }
 0x158   : > { %10342 = vmatprep.subr.bf16.mxu1 %v11875_v59  ;;  %v13283_v21 = vpack.c.bf16 (%p433_p0), %v5047_v19, %v5046_v18  ;;  %v5048_v22 = vld [vmem:[%s13734_s13 + $0x30] sm:$0xff] (%p433_p0)  ;;  %v5049_v23 = vld [vmem:[%s13734_s13 + $0x38] sm:$0xff] (%p433_p0) }
 0x159   :  { %v13293_v24 = vpack.c.bf16 (%p433_p0), %v5049_v23, %v5048_v22 }
 0x15b   : > { %10344 = vmatpush3.bf16.msra.mxu1 %v12449_v39 }
 0x15c   : > { %10345 = vmatprep.subr.bf16.mxu1 %v11875_v59 }
 0x15f   : > { %10347 = vmatpush3.bf16.msra.mxu1 %v12456_v40 }
 0x160   : > { %10348 = vmatprep.subr.bf16.mxu1 %v11875_v59 }
 0x162   : > { %8586 = vmatmul.mubr.msk.f32.vlgmr.msra.gmra.mrb[0].mxu1 %vm395_vm0, %v11858_v30  ;;  %v12483_v30 = vpack.c.bf16 %v12234_v26, %v12229_v25  ;;  %v5058_v25 = vld [vmem:[#allocation16] sm:$0xff] (%p433_p0)  ;;  %v5059_v26 = vld [vmem:[#allocation16 + $0x8] sm:$0xff] (%p433_p0) }
 0x163   : > { %10350 = vmatpush3.bf16.msra.mxu1 %v12462_v41  ;;  %8604 = vmatprep.mubr.msk.f32.mxu1 %vm11876_vm1, %v11877_v37 }
 0x164   : > { %10351 = vmatprep.subr.bf16.mxu1 %v11875_v59 }
 0x167   : > { %10353 = vmatpush3.bf16.msra.mxu1 %v12469_v42 }
 0x168   : > { %10354 = vmatprep.subr.bf16.mxu1 %v11875_v59 }
 0x16b   : > { %10356 = vmatpush3.bf16.msra.mxu1 %v12477_v43 }
 0x16c   : > { %10357 = vmatprep.subr.bf16.mxu1 %v11875_v59 }
 0x16f   : > { %10359 = vmatpush3.bf16.msra.mxu1 %v12483_v30 }
 0x170   : > { %10372 = vmatprep.subr.bf16.mxu1 %v11875_v59 }
 0x172   : > { %8605 = vmatmul.mubr.msk.f32.vlgmr.msra.gmra.mrb[2].mxu1 %vm395_vm0, %v11854_v31  ;;  %v12501_v31 = vpack.c.bf16 %v12174_v14, %v12169_v13  ;;  %v5045_v13 = vld [vmem:[%s13734_s13 + $0x18] sm:$0xff] (%p433_p0)  ;;  %v11080_v14 = vpack.c.bf16 (%p433_p0), %v5074_v7, %v5073_v4 }
 0x173   : > { %10374 = vmatpush3.bf16.msra.mxu1 %v12427_v57  ;;  %8642 = vmatprep.mubr.msk.f32.mxu1 %vm11876_vm1, %v11877_v37  ;;  %v13270_v16 = vpack.c.bf16 (%p433_p0), %v5045_v13, %v5044_v12 }
 0x174   : > { %10375 = vmatprep.subr.bf16.mxu1 %v11875_v59  ;;  %10365 = vmatpush3.bf16.msra.mxu0 %v12501_v31 }
 0x175   : > { %10366 = vmatprep.subr.bf16.mxu0 %v11875_v59 }
 0x177   : > { %10377 = vmatpush3.bf16.msra.mxu1 %v12434_v36 }
 0x178   : > { %10378 = vmatprep.subr.bf16.mxu1 %v11875_v59  ;;  %10368 = vmatpush3.bf16.msra.mxu0 %v12506_v44 }
 0x179   : > { %10369 = vmatprep.subr.bf16.mxu0 %v11875_v59 }
 0x17b   : > { %10380 = vmatpush3.bf16.msra.mxu1 %v12449_v39 }
 0x17c   : > { %10381 = vmatprep.subr.bf16.mxu1 %v11875_v59  ;;  %10371 = vmatpush3.bf16.msra.mxu0 %v12512_v45 }
 0x17d   : > { %10384 = vmatprep.subr.bf16.mxu0 %v11875_v59 }
 0x17f   : > { %10383 = vmatpush3.bf16.msra.mxu1 %v12456_v40 }
 0x180   : > { %10396 = vmatprep.subr.bf16.mxu1 %v11875_v59 }
 0x235   : > { %v511_v47 = vpop.f32.mrb[0].mxu1 }
 0x236   : > { %v515_v48 = vadd.f32 %v511_v47, %v441_v46  ;;  %v8587_v49 = vpop.f32.mrb[1].mxu1  ;;  %v7613_v47 = vld [vmem:[%s12518_s16 + $0x2] sm:$0x1] }
 0x238   : > { %11510 = vtanh.f32 %v515_v48 }
 0x242   : > { %v11511_v50 = vpop.eup %11510 }
 0x243   : > { %8624 = vmatmul.mubr.msk.f32.vlgmr.msra.gmra.mrb[0].mxu0 %vm395_vm0, %v11511_v50  ;;  %8643 = vmatmul.mubr.msk.f32.vlgmr.msra.gmra.mrb[4].mxu1 %vm395_vm0, %v11511_v50 }
 0x244   : > { %10398 = vmatpush3.bf16.msra.mxu1 %v12441_v38  ;;  %10386 = vmatpush3.bf16.msra.mxu0 %v12462_v41 }
 0x245   : > { %v586_v51 = vpop.f32.mrb[2].mxu1  ;;  %10399 = vmatprep.subr.bf16.mxu1 %v11875_v59  ;;  %10387 = vmatprep.subr.bf16.mxu0 %v11875_v59 }
 0x246   : > { %v8606_v52 = vpop.f32.mrb[3].mxu1  ;;  %8680 = vmatprep.mubr.msk.f32.mxu1 %vm11876_vm1, %v11877_v37  ;;  %8661 = vmatprep.mubr.msk.f32.mxu0 %vm11876_vm1, %v11877_v37 }
 0x248   : > { %10401 = vmatpush3.bf16.msra.mxu1 %v12501_v31  ;;  %10389 = vmatpush3.bf16.msra.mxu0 %v12469_v42 }
 0x249   : > { %10402 = vmatprep.subr.bf16.mxu1 %v11875_v59  ;;  %10390 = vmatprep.subr.bf16.mxu0 %v11875_v59 }
 0x24c   : > { %10404 = vmatpush3.bf16.msra.mxu1 %v12506_v44  ;;  %10392 = vmatpush3.bf16.msra.mxu0 %v12477_v43 }
 0x24d   : > { %10405 = vmatprep.subr.bf16.mxu1 %v11875_v59  ;;  %10393 = vmatprep.subr.bf16.mxu0 %v11875_v59 }
 0x250   : > { %10407 = vmatpush3.bf16.msra.mxu1 %v12512_v45  ;;  %10395 = vmatpush3.bf16.msra.mxu0 %v12483_v30 }
 0x251   : > { %10408 = vmatprep.subr.bf16.mxu0 %v11875_v59  ;;  %10420 = vmatprep.subr.bf16.mxu1 %v11875_v59 }
 0x316   : > { %v659_v54 = vpop.f32.mrb[0].mxu0  ;;  %v736_v55 = vpop.f32.mrb[4].mxu1 }
 0x317   : > { %v660_v56 = vadd.f32 %v659_v54, %v586_v51  ;;  %v740_v58 = vadd.f32 %v7609_v53, %v736_v55  ;;  %v8625_v60 = vpop.f32.mrb[1].mxu0  ;;  %v8644_v61 = vpop.f32.mrb[5].mxu1 }
 0x319   : > { %v663_v62 = vadd.f32 %v660_v56, %v12236_v27  ;;  %11512 = vtanh.f32 %v740_v58  ;;  %v7617_v56 = vld [vmem:[%s12518_s16 + $0x3] sm:$0x1] }
 0x31b   : > { %11514 = vtanh.f32 %v663_v62 }
 0x323   : > { %v11513_v63 = vpop.eup %11512 }
 0x324   : > { %8681 = vmatmul.mubr.msk.f32.vlgmr.msra.gmra.mrb[6].mxu1 %vm395_vm0, %v11513_v63 }
 0x325   : > { %v11515_v0 = vpop.eup %11514  ;;  %10422 = vmatpush3.bf16.msra.mxu1 %v12462_v41  ;;  %8718 = vmatprep.mubr.msk.f32.mxu1 %vm11876_vm1, %v11877_v37 }
 0x326   : > { %666 = vst.msk [vmem:[#allocation3] sm:$0x1] %vm665_vm2, %v11515_v0  ;;  %8662 = vmatmul.mubr.msk.f32.vlgmr.msra.gmra.mrb[2].mxu0 %vm395_vm0, %v11515_v0  ;;  %10423 = vmatprep.subr.bf16.mxu1 %v11875_v59 }
 0x327   : > { %10410 = vmatpush3.bf16.msra.mxu0 %v12427_v57  ;;  %8699 = vmatprep.mubr.msk.f32.mxu0 %vm11876_vm1, %v11877_v37 }
 0x328   : > { %10411 = vmatprep.subr.bf16.mxu0 %v11875_v59 }
 0x329   : > { %10425 = vmatpush3.bf16.msra.mxu1 %v12469_v42 }
 0x32a   : > { %10426 = vmatprep.subr.bf16.mxu1 %v11875_v59 }
 0x32b   : > { %10413 = vmatpush3.bf16.msra.mxu0 %v12434_v36 }
 0x32c   : > { %10414 = vmatprep.subr.bf16.mxu0 %v11875_v59 }
 0x32d   : > { %10428 = vmatpush3.bf16.msra.mxu1 %v12477_v43 }
 0x32e   : > { %10429 = vmatprep.subr.bf16.mxu1 %v11875_v59 }
 0x32f   : > { %10416 = vmatpush3.bf16.msra.mxu0 %v12449_v39 }
 0x330   : > { %10417 = vmatprep.subr.bf16.mxu0 %v11875_v59 }
 0x331   : > { %10431 = vmatpush3.bf16.msra.mxu1 %v12483_v30 }
 0x332   : > { %10444 = vmatprep.subr.bf16.mxu1 %v11875_v59 }
 0x333   : > { %10419 = vmatpush3.bf16.msra.mxu0 %v12456_v40 }
 0x334   : > { %10432 = vmatprep.subr.bf16.mxu0 %v11875_v59 }
 0x336   : > { %8700 = vmatmul.mubr.msk.f32.vlgmr.msra.gmra.mrb[4].mxu0 %vm395_vm0, %v11513_v63 }
 0x337   : > { %10434 = vmatpush3.bf16.msra.mxu0 %v12441_v38  ;;  %8737 = vmatprep.mubr.msk.f32.mxu0 %vm11876_vm1, %v11877_v37 }
 0x338   : > { %10435 = vmatprep.subr.bf16.mxu0 %v11875_v59 }
 0x33b   : > { %10437 = vmatpush3.bf16.msra.mxu0 %v12501_v31 }
 0x33c   : > { %10438 = vmatprep.subr.bf16.mxu0 %v11875_v59 }
 0x33f   : > { %10440 = vmatpush3.bf16.msra.mxu0 %v12506_v44 }
 0x340   : > { %10441 = vmatprep.subr.bf16.mxu0 %v11875_v59 }
 0x343   : > { %10443 = vmatpush3.bf16.msra.mxu0 %v12512_v45 }
 0x344   : > { %10456 = vmatprep.subr.bf16.mxu0 %v11875_v59 }
 0x3f7   : > { %v884_v1 = vpop.f32.mrb[6].mxu1 }
 0x3f8   : > { %v8682_v32 = vpop.f32.mrb[7].mxu1 }
 0x3f9   : > { %v811_v33 = vpop.f32.mrb[2].mxu0 }
 0x3fa   : > { %v885_v34 = vadd.f32 %v884_v1, %v811_v33  ;;  %v8663_v35 = vpop.f32.mrb[3].mxu0 }
 0x3fc   : > { %v888_v46 = vadd.f32 %v885_v34, %v12236_v27 }
 0x3fe   : > { %11516 = vtanh.f32 %v888_v46 }
 0x408   : > { %v11517_v48 = vpop.eup %11516 }
 0x409   : > { %890 = vst.msk [vmem:[#allocation3 + $0x1] sm:$0x1] %vm665_vm2, %v11517_v48  ;;  %v960_v49 = vpop.f32.mrb[4].mxu0  ;;  %8719 = vmatmul.mubr.msk.f32.vlgmr.msra.gmra.mrb[8].mxu1 %vm395_vm0, %v11517_v48 }
 0x40a   : > { %v964_v50 = vadd.f32 %v7613_v47, %v960_v49  ;;  %v8701_v51 = vpop.f32.mrb[5].mxu0  ;;  %10446 = vmatpush3.bf16.msra.mxu1 %v12427_v57  ;;  %8756 = vmatprep.mubr.msk.f32.mxu1 %vm11876_vm1, %v11877_v37  ;;  %v7621_v49 = vld [vmem:[%s12518_s16 + $0x4] sm:$0x1] }
 0x40b   : > { %10447 = vmatprep.subr.bf16.mxu1 %v11875_v59 }
 0x40c   : > { %11518 = vtanh.f32 %v964_v50 }
 0x40e   : > { %10449 = vmatpush3.bf16.msra.mxu1 %v12434_v36 }
 0x40f   : > { %10450 = vmatprep.subr.bf16.mxu1 %v11875_v59 }
 0x412   : > { %10452 = vmatpush3.bf16.msra.mxu1 %v12449_v39 }
 0x413   : > { %10453 = vmatprep.subr.bf16.mxu1 %v11875_v59 }
 0x416   : > { %v11519_v52 = vpop.eup %11518  ;;  %10455 = vmatpush3.bf16.msra.mxu1 %v12456_v40 }
 0x417   : > { %8738 = vmatmul.mubr.msk.f32.vlgmr.msra.gmra.mrb[6].mxu0 %vm395_vm0, %v11519_v52  ;;  %10468 = vmatprep.subr.bf16.mxu1 %v11875_v59 }
 0x418   : > { %10458 = vmatpush3.bf16.msra.mxu0 %v12462_v41  ;;  %8775 = vmatprep.mubr.msk.f32.mxu0 %vm11876_vm1, %v11877_v37 }
 0x419   : > { %8757 = vmatmul.mubr.msk.f32.vlgmr.msra.gmra.mrb[10].mxu1 %vm395_vm0, %v11519_v52  ;;  %10459 = vmatprep.subr.bf16.mxu0 %v11875_v59 }
 0x41a   : > { %10470 = vmatpush3.bf16.msra.mxu1 %v12441_v38  ;;  %8794 = vmatprep.mubr.msk.f32.mxu1 %vm11876_vm1, %v11877_v37 }
 0x41b   : > { %10471 = vmatprep.subr.bf16.mxu1 %v11875_v59 }
 0x41c   : > { %10461 = vmatpush3.bf16.msra.mxu0 %v12469_v42 }
 0x41d   : > { %10462 = vmatprep.subr.bf16.mxu0 %v11875_v59 }
 0x41e   : > { %10473 = vmatpush3.bf16.msra.mxu1 %v12501_v31 }
 0x41f   : > { %10474 = vmatprep.subr.bf16.mxu1 %v11875_v59 }
 0x420   : > { %10464 = vmatpush3.bf16.msra.mxu0 %v12477_v43 }
 0x421   : > { %10465 = vmatprep.subr.bf16.mxu0 %v11875_v59 }
 0x422   : > { %10476 = vmatpush3.bf16.msra.mxu1 %v12506_v44 }
 0x423   : > { %10477 = vmatprep.subr.bf16.mxu1 %v11875_v59 }
 0x424   : > { %10467 = vmatpush3.bf16.msra.mxu0 %v12483_v30 }
 0x425   : > { %10480 = vmatprep.subr.bf16.mxu0 %v11875_v59 }
 0x426   : > { %10479 = vmatpush3.bf16.msra.mxu1 %v12512_v45 }
 0x427   : > { %10492 = vmatprep.subr.bf16.mxu1 %v11875_v59 }
 0x4dc   : > { %v1035_v53 = vpop.f32.mrb[8].mxu1 }
 0x4dd   : > { %v8720_v54 = vpop.f32.mrb[9].mxu1 }
 0x4ea   : > { %v1108_v55 = vpop.f32.mrb[6].mxu0 }
 0x4eb   : > { %v1109_v58 = vadd.f32 %v1108_v55, %v1035_v53  ;;  %v8739_v60 = vpop.f32.mrb[7].mxu0 }
 0x4ec   : > { %v1184_v61 = vpop.f32.mrb[10].mxu1 }
 0x4ed   : > { %v1112_v62 = vadd.f32 %v1109_v58, %v12236_v27  ;;  %v1188_v63 = vadd.f32 %v7617_v56, %v1184_v61  ;;  %v8758_v0 = vpop.f32.mrb[11].mxu1 }
 0x4ef   : > { %11520 = vtanh.f32 %v1112_v62  ;;  %v7625_v62 = vld [vmem:[%s12518_s16 + $0x5] sm:$0x1] }
 0x4f0   : > { %11522 = vtanh.f32 %v1188_v63 }
 0x4f9   : > { %v11521_v1 = vpop.eup %11520 }
 0x4fa   : > { %v11523_v32 = vpop.eup %11522  ;;  %1114 = vst.msk [vmem:[#allocation3 + $0x2] sm:$0x1] %vm665_vm2, %v11521_v1  ;;  %8776 = vmatmul.mubr.msk.f32.vlgmr.msra.gmra.mrb[8].mxu0 %vm395_vm0, %v11521_v1 }
 0x4fb   : > { %8795 = vmatmul.mubr.msk.f32.vlgmr.msra.gmra.mrb[12].mxu1 %vm395_vm0, %v11523_v32  ;;  %10482 = vmatpush3.bf16.msra.mxu0 %v12427_v57 }
 0x4fc   : > { %10483 = vmatprep.subr.bf16.mxu0 %v11875_v59  ;;  %8813 = vmatprep.mubr.msk.f32.mxu0 %vm11876_vm1, %v11877_v37 }
 0x4fd   : > { %10494 = vmatpush3.bf16.msra.mxu1 %v12462_v41  ;;  %8832 = vmatprep.mubr.msk.f32.mxu1 %vm11876_vm1, %v11877_v37 }
 0x4fe   : > { %10495 = vmatprep.subr.bf16.mxu1 %v11875_v59 }
 0x4ff   : > { %10485 = vmatpush3.bf16.msra.mxu0 %v12434_v36 }
 0x500   : > { %10486 = vmatprep.subr.bf16.mxu0 %v11875_v59 }
 0x501   : > { %10497 = vmatpush3.bf16.msra.mxu1 %v12469_v42 }
 0x502   : > { %10498 = vmatprep.subr.bf16.mxu1 %v11875_v59 }
 0x503   : > { %10488 = vmatpush3.bf16.msra.mxu0 %v12449_v39 }
 0x504   : > { %10489 = vmatprep.subr.bf16.mxu0 %v11875_v59 }
 0x505   : > { %10500 = vmatpush3.bf16.msra.mxu1 %v12477_v43 }
 0x506   : > { %10501 = vmatprep.subr.bf16.mxu1 %v11875_v59 }
 0x507   : > { %10491 = vmatpush3.bf16.msra.mxu0 %v12456_v40 }
 0x508   : > { %10504 = vmatprep.subr.bf16.mxu0 %v11875_v59 }
 0x509   : > { %10503 = vmatpush3.bf16.msra.mxu1 %v12483_v30 }
 0x50a   : > { %8814 = vmatmul.mubr.msk.f32.vlgmr.msra.gmra.mrb[10].mxu0 %vm395_vm0, %v11523_v32  ;;  %10516 = vmatprep.subr.bf16.mxu1 %v11875_v59 }
 0x50b   : > { %10506 = vmatpush3.bf16.msra.mxu0 %v12441_v38  ;;  %8851 = vmatprep.mubr.msk.f32.mxu0 %vm11876_vm1, %v11877_v37 }
 0x50c   : > { %10507 = vmatprep.subr.bf16.mxu0 %v11875_v59 }
 0x50f   : > { %10509 = vmatpush3.bf16.msra.mxu0 %v12501_v31 }
 0x510   : > { %10510 = vmatprep.subr.bf16.mxu0 %v11875_v59 }
 0x513   : > { %10512 = vmatpush3.bf16.msra.mxu0 %v12506_v44 }
 0x514   : > { %10513 = vmatprep.subr.bf16.mxu0 %v11875_v59 }
 0x517   : > { %10515 = vmatpush3.bf16.msra.mxu0 %v12512_v45 }
 0x518   : > { %10528 = vmatprep.subr.bf16.mxu0 %v11875_v59 }
 0x5cd   : > { %v1259_v33 = vpop.f32.mrb[8].mxu0 }
 0x5ce   : > { %v1332_v34 = vpop.f32.mrb[12].mxu1  ;;  %v8777_v35 = vpop.f32.mrb[9].mxu0 }
 0x5cf   : > { %v1333_v46 = vadd.f32 %v1332_v34, %v1259_v33  ;;  %v8796_v47 = vpop.f32.mrb[13].mxu1 }
 0x5d1   : > { %v1336_v48 = vadd.f32 %v1333_v46, %v12236_v27 }
 0x5d3   : > { %11524 = vtanh.f32 %v1336_v48 }
 0x5dd   : > { %v11525_v50 = vpop.eup %11524  ;;  %v1408_v51 = vpop.f32.mrb[10].mxu0 }
 0x5de   : > { %1338 = vst.msk [vmem:[#allocation3 + $0x3] sm:$0x1] %vm665_vm2, %v11525_v50  ;;  %v1412_v52 = vadd.f32 %v7621_v49, %v1408_v51  ;;  %v8815_v53 = vpop.f32.mrb[11].mxu0  ;;  %8833 = vmatmul.mubr.msk.f32.vlgmr.msra.gmra.mrb[14].mxu1 %vm395_vm0, %v11525_v50  ;;  %v7629_v51 = vld [vmem:[%s12518_s16 + $0x6] sm:$0x1] }
 0x5df   : > { %10518 = vmatpush3.bf16.msra.mxu1 %v12427_v57  ;;  %8870 = vmatprep.mubr.msk.f32.mxu1 %vm11876_vm1, %v11877_v37 }
 0x5e0   : > { %11526 = vtanh.f32 %v1412_v52  ;;  %10519 = vmatprep.subr.bf16.mxu1 %v11875_v59 }
 0x5e3   : > { %10521 = vmatpush3.bf16.msra.mxu1 %v12434_v36 }
 0x5e4   : > { %10522 = vmatprep.subr.bf16.mxu1 %v11875_v59 }
 0x5e7   : > { %10524 = vmatpush3.bf16.msra.mxu1 %v12449_v39 }
 0x5e8   : > { %10525 = vmatprep.subr.bf16.mxu1 %v11875_v59 }
 0x5ea   : > { %v11527_v54 = vpop.eup %11526 }
 0x5eb   : > { %10527 = vmatpush3.bf16.msra.mxu1 %v12456_v40  ;;  %8852 = vmatmul.mubr.msk.f32.vlgmr.msra.gmra.mrb[12].mxu0 %vm395_vm0, %v11527_v54 }
 0x5ec   : > { %10530 = vmatpush3.bf16.msra.mxu0 %v12462_v41  ;;  %10540 = vmatprep.subr.bf16.mxu1 %v11875_v59 }
 0x5ed   : > { %10531 = vmatprep.subr.bf16.mxu0 %v11875_v59  ;;  %8889 = vmatprep.mubr.msk.f32.mxu0 %vm11876_vm1, %v11877_v37 }
 0x5ee   : > { %8871 = vmatmul.mubr.msk.f32.vlgmr.msra.gmra.mrb[16].mxu1 %vm395_vm0, %v11527_v54 }
 0x5ef   : > { %10542 = vmatpush3.bf16.msra.mxu1 %v12441_v38  ;;  %8908 = vmatprep.mubr.msk.f32.mxu1 %vm11876_vm1, %v11877_v37 }
 0x5f0   : > { %10533 = vmatpush3.bf16.msra.mxu0 %v12469_v42  ;;  %10543 = vmatprep.subr.bf16.mxu1 %v11875_v59 }
 0x5f1   : > { %10534 = vmatprep.subr.bf16.mxu0 %v11875_v59 }
 0x5f3   : > { %10545 = vmatpush3.bf16.msra.mxu1 %v12501_v31 }
 0x5f4   : > { %10536 = vmatpush3.bf16.msra.mxu0 %v12477_v43  ;;  %10546 = vmatprep.subr.bf16.mxu1 %v11875_v59 }
 0x5f5   : > { %10537 = vmatprep.subr.bf16.mxu0 %v11875_v59 }
 0x5f7   : > { %10548 = vmatpush3.bf16.msra.mxu1 %v12506_v44 }
 0x5f8   : > { %10539 = vmatpush3.bf16.msra.mxu0 %v12483_v30  ;;  %10549 = vmatprep.subr.bf16.mxu1 %v11875_v59 }
 0x5f9   : > { %10552 = vmatprep.subr.bf16.mxu0 %v11875_v59 }
 0x5fb   : > { %10551 = vmatpush3.bf16.msra.mxu1 %v12512_v45 }
 0x5fc   : > { %10564 = vmatprep.subr.bf16.mxu1 %v11875_v59 }
 0x6b1   : > { %v1483_v55 = vpop.f32.mrb[14].mxu1 }
 0x6b2   : > { %v8834_v56 = vpop.f32.mrb[15].mxu1 }
 0x6be   : > { %v1556_v58 = vpop.f32.mrb[12].mxu0 }
 0x6bf   : > { %v1557_v60 = vadd.f32 %v1556_v58, %v1483_v55  ;;  %v8853_v61 = vpop.f32.mrb[13].mxu0 }
 0x6c1   : > { %v1560_v63 = vadd.f32 %v1557_v60, %v12236_v27  ;;  %v1632_v0 = vpop.f32.mrb[16].mxu1 }
 0x6c2   : > { %v1636_v1 = vadd.f32 %v7625_v62, %v1632_v0  ;;  %v8872_v32 = vpop.f32.mrb[17].mxu1  ;;  %v7633_v0 = vld [vmem:[%s12518_s16 + $0x7] sm:$0x1] }
 0x6c3   : > { %11528 = vtanh.f32 %v1560_v63 }
 0x6c4   : > { %11530 = vtanh.f32 %v1636_v1 }
 0x6cd   : > { %v11529_v33 = vpop.eup %11528 }
 0x6ce   : > { %v11531_v34 = vpop.eup %11530  ;;  %1562 = vst.msk [vmem:[#allocation3 + $0x4] sm:$0x1] %vm665_vm2, %v11529_v33  ;;  %8890 = vmatmul.mubr.msk.f32.vlgmr.msra.gmra.mrb[14].mxu0 %vm395_vm0, %v11529_v33 }
 0x6cf   : > { %8909 = vmatmul.mubr.msk.f32.vlgmr.msra.gmra.mrb[18].mxu1 %vm395_vm0, %v11531_v34  ;;  %10554 = vmatpush3.bf16.msra.mxu0 %v12427_v57 }
 0x6d0   : > { %10555 = vmatprep.subr.bf16.mxu0 %v11875_v59  ;;  %8927 = vmatprep.mubr.msk.f32.mxu0 %vm11876_vm1, %v11877_v37 }
 0x6d1   : > { %10566 = vmatpush3.bf16.msra.mxu1 %v12462_v41  ;;  %8946 = vmatprep.mubr.msk.f32.mxu1 %vm11876_vm1, %v11877_v37 }
 0x6d2   : > { %10567 = vmatprep.subr.bf16.mxu1 %v11875_v59 }
 0x6d3   : > { %10557 = vmatpush3.bf16.msra.mxu0 %v12434_v36 }
 0x6d4   : > { %10558 = vmatprep.subr.bf16.mxu0 %v11875_v59 }
 0x6d5   : > { %10569 = vmatpush3.bf16.msra.mxu1 %v12469_v42 }
 0x6d6   : > { %10570 = vmatprep.subr.bf16.mxu1 %v11875_v59 }
 0x6d7   : > { %10560 = vmatpush3.bf16.msra.mxu0 %v12449_v39 }
 0x6d8   : > { %10561 = vmatprep.subr.bf16.mxu0 %v11875_v59 }
 0x6d9   : > { %10572 = vmatpush3.bf16.msra.mxu1 %v12477_v43 }
 0x6da   : > { %10573 = vmatprep.subr.bf16.mxu1 %v11875_v59 }
 0x6db   : > { %10563 = vmatpush3.bf16.msra.mxu0 %v12456_v40 }
 0x6dc   : > { %10576 = vmatprep.subr.bf16.mxu0 %v11875_v59 }
 0x6dd   : > { %10575 = vmatpush3.bf16.msra.mxu1 %v12483_v30 }
 0x6de   : > { %8928 = vmatmul.mubr.msk.f32.vlgmr.msra.gmra.mrb[16].mxu0 %vm395_vm0, %v11531_v34  ;;  %10588 = vmatprep.subr.bf16.mxu1 %v11875_v59 }
 0x6df   : > { %10578 = vmatpush3.bf16.msra.mxu0 %v12441_v38  ;;  %8965 = vmatprep.mubr.msk.f32.mxu0 %vm11876_vm1, %v11877_v37 }
 0x6e0   : > { %10579 = vmatprep.subr.bf16.mxu0 %v11875_v59 }
 0x6e3   : > { %10581 = vmatpush3.bf16.msra.mxu0 %v12501_v31 }
 0x6e4   : > { %10582 = vmatprep.subr.bf16.mxu0 %v11875_v59 }
 0x6e7   : > { %10584 = vmatpush3.bf16.msra.mxu0 %v12506_v44 }
 0x6e8   : > { %10585 = vmatprep.subr.bf16.mxu0 %v11875_v59 }
 0x6eb   : > { %10587 = vmatpush3.bf16.msra.mxu0 %v12512_v45 }
 0x6ec   : > { %10600 = vmatprep.subr.bf16.mxu0 %v11875_v59 }
 0x7a1   : > { %v1707_v35 = vpop.f32.mrb[14].mxu0 }
 0x7a2   : > { %v1780_v46 = vpop.f32.mrb[18].mxu1  ;;  %v8891_v47 = vpop.f32.mrb[15].mxu0 }
 0x7a3   : > { %v1781_v48 = vadd.f32 %v1780_v46, %v1707_v35  ;;  %v8910_v49 = vpop.f32.mrb[19].mxu1 }
 0x7a5   : > { %v1784_v50 = vadd.f32 %v1781_v48, %v12236_v27 }
 0x7a7   : > { %11532 = vtanh.f32 %v1784_v50 }
 0x7b1   : > { %v11533_v52 = vpop.eup %11532  ;;  %v1856_v53 = vpop.f32.mrb[16].mxu0 }
 0x7b2   : > { %1786 = vst.msk [vmem:[#allocation3 + $0x5] sm:$0x1] %vm665_vm2, %v11533_v52  ;;  %v1860_v54 = vadd.f32 %v7629_v51, %v1856_v53  ;;  %v8929_v55 = vpop.f32.mrb[17].mxu0  ;;  %8947 = vmatmul.mubr.msk.f32.vlgmr.msra.gmra.mrb[20].mxu1 %vm395_vm0, %v11533_v52  ;;  %v7637_v53 = vld [vmem:[%s12518_s16 + $0x8] sm:$0x1] }
 0x7b3   : > { %10590 = vmatpush3.bf16.msra.mxu1 %v12427_v57  ;;  %8984 = vmatprep.mubr.msk.f32.mxu1 %vm11876_vm1, %v11877_v37 }
 0x7b4   : > { %11534 = vtanh.f32 %v1860_v54  ;;  %10591 = vmatprep.subr.bf16.mxu1 %v11875_v59 }
 0x7b7   : > { %10593 = vmatpush3.bf16.msra.mxu1 %v12434_v36 }
 0x7b8   : > { %10594 = vmatprep.subr.bf16.mxu1 %v11875_v59 }
 0x7bb   : > { %10596 = vmatpush3.bf16.msra.mxu1 %v12449_v39 }
 0x7bc   : > { %10597 = vmatprep.subr.bf16.mxu1 %v11875_v59 }
 0x7be   : > { %v11535_v56 = vpop.eup %11534 }
 0x7bf   : > { %10599 = vmatpush3.bf16.msra.mxu1 %v12456_v40  ;;  %8966 = vmatmul.mubr.msk.f32.vlgmr.msra.gmra.mrb[18].mxu0 %vm395_vm0, %v11535_v56 }
 0x7c0   : > { %10602 = vmatpush3.bf16.msra.mxu0 %v12462_v41  ;;  %10612 = vmatprep.subr.bf16.mxu1 %v11875_v59 }
 0x7c1   : > { %10603 = vmatprep.subr.bf16.mxu0 %v11875_v59  ;;  %9003 = vmatprep.mubr.msk.f32.mxu0 %vm11876_vm1, %v11877_v37 }
 0x7c2   : > { %8985 = vmatmul.mubr.msk.f32.vlgmr.msra.gmra.mrb[22].mxu1 %vm395_vm0, %v11535_v56 }
 0x7c3   : > { %10614 = vmatpush3.bf16.msra.mxu1 %v12441_v38  ;;  %9022 = vmatprep.mubr.msk.f32.mxu1 %vm11876_vm1, %v11877_v37 }
 0x7c4   : > { %10605 = vmatpush3.bf16.msra.mxu0 %v12469_v42  ;;  %10615 = vmatprep.subr.bf16.mxu1 %v11875_v59 }
 0x7c5   : > { %10606 = vmatprep.subr.bf16.mxu0 %v11875_v59 }
 0x7c7   : > { %10617 = vmatpush3.bf16.msra.mxu1 %v12501_v31 }
 0x7c8   : > { %10608 = vmatpush3.bf16.msra.mxu0 %v12477_v43  ;;  %10618 = vmatprep.subr.bf16.mxu1 %v11875_v59 }
 0x7c9   : > { %10609 = vmatprep.subr.bf16.mxu0 %v11875_v59 }
 0x7cb   : > { %10620 = vmatpush3.bf16.msra.mxu1 %v12506_v44 }
 0x7cc   : > { %10611 = vmatpush3.bf16.msra.mxu0 %v12483_v30  ;;  %10621 = vmatprep.subr.bf16.mxu1 %v11875_v59 }
 0x7cd   : > { %10624 = vmatprep.subr.bf16.mxu0 %v11875_v59 }
 0x7cf   : > { %10623 = vmatpush3.bf16.msra.mxu1 %v12512_v45 }
 0x7d0   : > { %10636 = vmatprep.subr.bf16.mxu1 %v11875_v59 }
 0x885   : > { %v1931_v58 = vpop.f32.mrb[20].mxu1 }
 0x886   : > { %v8948_v60 = vpop.f32.mrb[21].mxu1 }
 0x892   : > { %v2004_v61 = vpop.f32.mrb[18].mxu0 }
 0x893   : > { %v2005_v62 = vadd.f32 %v2004_v61, %v1931_v58  ;;  %v8967_v63 = vpop.f32.mrb[19].mxu0 }
 0x895   : > { %v2008_v1 = vadd.f32 %v2005_v62, %v12236_v27  ;;  %v2080_v32 = vpop.f32.mrb[22].mxu1 }
 0x896   : > { %v2084_v33 = vadd.f32 %v7633_v0, %v2080_v32  ;;  %v8986_v34 = vpop.f32.mrb[23].mxu1  ;;  %v7641_v32 = vld [vmem:[%s12518_s16 + $0x9] sm:$0x1] }
 0x897   : > { %11536 = vtanh.f32 %v2008_v1 }
 0x898   : > { %11538 = vtanh.f32 %v2084_v33 }
 0x8a1   : > { %v11537_v35 = vpop.eup %11536 }
 0x8a2   : > { %v11539_v46 = vpop.eup %11538  ;;  %2010 = vst.msk [vmem:[#allocation3 + $0x6] sm:$0x1] %vm665_vm2, %v11537_v35  ;;  %9004 = vmatmul.mubr.msk.f32.vlgmr.msra.gmra.mrb[20].mxu0 %vm395_vm0, %v11537_v35 }
 0x8a3   : > { %9023 = vmatmul.mubr.msk.f32.vlgmr.msra.gmra.mrb[24].mxu1 %vm395_vm0, %v11539_v46  ;;  %10626 = vmatpush3.bf16.msra.mxu0 %v12427_v57 }
 0x8a4   : > { %10627 = vmatprep.subr.bf16.mxu0 %v11875_v59  ;;  %9041 = vmatprep.mubr.msk.f32.mxu0 %vm11876_vm1, %v11877_v37 }
 0x8a5   : > { %10638 = vmatpush3.bf16.msra.mxu1 %v12462_v41  ;;  %9060 = vmatprep.mubr.msk.f32.mxu1 %vm11876_vm1, %v11877_v37 }
 0x8a6   : > { %10639 = vmatprep.subr.bf16.mxu1 %v11875_v59 }
 0x8a7   : > { %10629 = vmatpush3.bf16.msra.mxu0 %v12434_v36 }
 0x8a8   : > { %10630 = vmatprep.subr.bf16.mxu0 %v11875_v59 }
 0x8a9   : > { %10641 = vmatpush3.bf16.msra.mxu1 %v12469_v42 }
 0x8aa   : > { %10642 = vmatprep.subr.bf16.mxu1 %v11875_v59 }
 0x8ab   : > { %10632 = vmatpush3.bf16.msra.mxu0 %v12449_v39 }
 0x8ac   : > { %10633 = vmatprep.subr.bf16.mxu0 %v11875_v59 }
 0x8ad   : > { %10644 = vmatpush3.bf16.msra.mxu1 %v12477_v43 }
 0x8ae   : > { %10645 = vmatprep.subr.bf16.mxu1 %v11875_v59 }
 0x8af   : > { %10635 = vmatpush3.bf16.msra.mxu0 %v12456_v40 }
 0x8b0   : > { %10648 = vmatprep.subr.bf16.mxu0 %v11875_v59 }
 0x8b1   : > { %10647 = vmatpush3.bf16.msra.mxu1 %v12483_v30 }
 0x8b2   : > { %9042 = vmatmul.mubr.msk.f32.vlgmr.msra.gmra.mrb[22].mxu0 %vm395_vm0, %v11539_v46  ;;  %10660 = vmatprep.subr.bf16.mxu1 %v11875_v59 }
 0x8b3   : > { %10650 = vmatpush3.bf16.msra.mxu0 %v12441_v38  ;;  %9079 = vmatprep.mubr.msk.f32.mxu0 %vm11876_vm1, %v11877_v37 }
 0x8b4   : > { %10651 = vmatprep.subr.bf16.mxu0 %v11875_v59 }
 0x8b7   : > { %10653 = vmatpush3.bf16.msra.mxu0 %v12501_v31 }
 0x8b8   : > { %10654 = vmatprep.subr.bf16.mxu0 %v11875_v59 }
 0x8bb   : > { %10656 = vmatpush3.bf16.msra.mxu0 %v12506_v44 }
 0x8bc   : > { %10657 = vmatprep.subr.bf16.mxu0 %v11875_v59 }
 0x8bf   : > { %10659 = vmatpush3.bf16.msra.mxu0 %v12512_v45 }
 0x8c0   : > { %10672 = vmatprep.subr.bf16.mxu0 %v11875_v59 }
 0x975   : > { %v2155_v47 = vpop.f32.mrb[20].mxu0 }
 0x976   : > { %v2228_v48 = vpop.f32.mrb[24].mxu1  ;;  %v9005_v49 = vpop.f32.mrb[21].mxu0 }
 0x977   : > { %v2229_v50 = vadd.f32 %v2228_v48, %v2155_v47  ;;  %v9024_v51 = vpop.f32.mrb[25].mxu1 }
 0x979   : > { %v2232_v52 = vadd.f32 %v2229_v50, %v12236_v27 }
 0x97b   : > { %11540 = vtanh.f32 %v2232_v52 }
 0x985   : > { %v11541_v54 = vpop.eup %11540  ;;  %v2304_v55 = vpop.f32.mrb[22].mxu0 }
 0x986   : > { %2234 = vst.msk [vmem:[#allocation3 + $0x7] sm:$0x1] %vm665_vm2, %v11541_v54  ;;  %v2308_v56 = vadd.f32 %v7637_v53, %v2304_v55  ;;  %v9043_v58 = vpop.f32.mrb[23].mxu0  ;;  %9061 = vmatmul.mubr.msk.f32.vlgmr.msra.gmra.mrb[26].mxu1 %vm395_vm0, %v11541_v54  ;;  %v7645_v55 = vld [vmem:[%s12518_s16 + $0xa] sm:$0x1] }
 0x987   : > { %10662 = vmatpush3.bf16.msra.mxu1 %v12427_v57  ;;  %9098 = vmatprep.mubr.msk.f32.mxu1 %vm11876_vm1, %v11877_v37 }
 0x988   : > { %11542 = vtanh.f32 %v2308_v56  ;;  %10663 = vmatprep.subr.bf16.mxu1 %v11875_v59 }
 0x98b   : > { %10665 = vmatpush3.bf16.msra.mxu1 %v12434_v36 }
 0x98c   : > { %10666 = vmatprep.subr.bf16.mxu1 %v11875_v59 }
 0x98f   : > { %10668 = vmatpush3.bf16.msra.mxu1 %v12449_v39 }
 0x990   : > { %10669 = vmatprep.subr.bf16.mxu1 %v11875_v59 }
 0x992   : > { %v11543_v60 = vpop.eup %11542 }
 0x993   : > { %10671 = vmatpush3.bf16.msra.mxu1 %v12456_v40  ;;  %9080 = vmatmul.mubr.msk.f32.vlgmr.msra.gmra.mrb[24].mxu0 %vm395_vm0, %v11543_v60 }
 0x994   : > { %10674 = vmatpush3.bf16.msra.mxu0 %v12462_v41  ;;  %10684 = vmatprep.subr.bf16.mxu1 %v11875_v59 }
 0x995   : > { %10675 = vmatprep.subr.bf16.mxu0 %v11875_v59  ;;  %9117 = vmatprep.mubr.msk.f32.mxu0 %vm11876_vm1, %v11877_v37 }
 0x996   : > { %9099 = vmatmul.mubr.msk.f32.vlgmr.msra.gmra.mrb[28].mxu1 %vm395_vm0, %v11543_v60 }
 0x997   : > { %10686 = vmatpush3.bf16.msra.mxu1 %v12441_v38  ;;  %9136 = vmatprep.mubr.msk.f32.mxu1 %vm11876_vm1, %v11877_v37 }
 0x998   : > { %10677 = vmatpush3.bf16.msra.mxu0 %v12469_v42  ;;  %10687 = vmatprep.subr.bf16.mxu1 %v11875_v59 }
 0x999   : > { %10678 = vmatprep.subr.bf16.mxu0 %v11875_v59 }
 0x99b   : > { %10689 = vmatpush3.bf16.msra.mxu1 %v12501_v31 }
 0x99c   : > { %10680 = vmatpush3.bf16.msra.mxu0 %v12477_v43  ;;  %10690 = vmatprep.subr.bf16.mxu1 %v11875_v59 }
 0x99d   : > { %10681 = vmatprep.subr.bf16.mxu0 %v11875_v59 }
 0x99f   : > { %10692 = vmatpush3.bf16.msra.mxu1 %v12506_v44 }
 0x9a0   : > { %10683 = vmatpush3.bf16.msra.mxu0 %v12483_v30  ;;  %10693 = vmatprep.subr.bf16.mxu1 %v11875_v59 }
 0x9a1   : > { %10696 = vmatprep.subr.bf16.mxu0 %v11875_v59 }
 0x9a3   : > { %10695 = vmatpush3.bf16.msra.mxu1 %v12512_v45 }
 0x9a4   : > { %10708 = vmatprep.subr.bf16.mxu1 %v11875_v59 }
 0xa59   : > { %v2379_v61 = vpop.f32.mrb[26].mxu1 }
 0xa5a   : > { %v9062_v62 = vpop.f32.mrb[27].mxu1 }
 0xa66   : > { %v2452_v63 = vpop.f32.mrb[24].mxu0 }
 0xa67   : > { %v2453_v0 = vadd.f32 %v2452_v63, %v2379_v61  ;;  %v9081_v1 = vpop.f32.mrb[25].mxu0 }
 0xa69   : > { %v2456_v33 = vadd.f32 %v2453_v0, %v12236_v27  ;;  %v2528_v34 = vpop.f32.mrb[28].mxu1 }
 0xa6a   : > { %v2532_v35 = vadd.f32 %v7641_v32, %v2528_v34  ;;  %v9100_v46 = vpop.f32.mrb[29].mxu1  ;;  %v7649_v34 = vld [vmem:[%s12518_s16 + $0xb] sm:$0x1] }
 0xa6b   : > { %11544 = vtanh.f32 %v2456_v33 }
 0xa6c   : > { %11546 = vtanh.f32 %v2532_v35 }
 0xa75   : > { %v11545_v47 = vpop.eup %11544 }
 0xa76   : > { %v11547_v48 = vpop.eup %11546  ;;  %2458 = vst.msk [vmem:[#allocation3 + $0x8] sm:$0x1] %vm665_vm2, %v11545_v47  ;;  %9118 = vmatmul.mubr.msk.f32.vlgmr.msra.gmra.mrb[26].mxu0 %vm395_vm0, %v11545_v47 }
 0xa77   : > { %9137 = vmatmul.mubr.msk.f32.vlgmr.msra.gmra.mrb[30].mxu1 %vm395_vm0, %v11547_v48  ;;  %10698 = vmatpush3.bf16.msra.mxu0 %v12427_v57 }
 0xa78   : > { %10699 = vmatprep.subr.bf16.mxu0 %v11875_v59  ;;  %9155 = vmatprep.mubr.msk.f32.mxu0 %vm11876_vm1, %v11877_v37 }
 0xa79   : > { %10710 = vmatpush3.bf16.msra.mxu1 %v12462_v41  ;;  %9174 = vmatprep.mubr.msk.f32.mxu1 %vm11876_vm1, %v11877_v37 }
 0xa7a   : > { %10711 = vmatprep.subr.bf16.mxu1 %v11875_v59 }
 0xa7b   : > { %10701 = vmatpush3.bf16.msra.mxu0 %v12434_v36 }
 0xa7c   : > { %10702 = vmatprep.subr.bf16.mxu0 %v11875_v59 }
 0xa7d   : > { %10713 = vmatpush3.bf16.msra.mxu1 %v12469_v42 }
 0xa7e   : > { %10714 = vmatprep.subr.bf16.mxu1 %v11875_v59 }
 0xa7f   : > { %10704 = vmatpush3.bf16.msra.mxu0 %v12449_v39 }
 0xa80   : > { %10705 = vmatprep.subr.bf16.mxu0 %v11875_v59 }
 0xa81   : > { %10716 = vmatpush3.bf16.msra.mxu1 %v12477_v43 }
 0xa82   : > { %10717 = vmatprep.subr.bf16.mxu1 %v11875_v59 }
 0xa83   : > { %10707 = vmatpush3.bf16.msra.mxu0 %v12456_v40 }
 0xa84   : > { %10720 = vmatprep.subr.bf16.mxu0 %v11875_v59 }
 0xa85   : > { %10719 = vmatpush3.bf16.msra.mxu1 %v12483_v30 }
 0xa86   : > { %9156 = vmatmul.mubr.msk.f32.vlgmr.msra.gmra.mrb[28].mxu0 %vm395_vm0, %v11547_v48  ;;  %10732 = vmatprep.subr.bf16.mxu1 %v11875_v59 }
 0xa87   : > { %10722 = vmatpush3.bf16.msra.mxu0 %v12441_v38  ;;  %9193 = vmatprep.mubr.msk.f32.mxu0 %vm11876_vm1, %v11877_v37 }
 0xa88   : > { %10723 = vmatprep.subr.bf16.mxu0 %v11875_v59 }
 0xa8b   : > { %10725 = vmatpush3.bf16.msra.mxu0 %v12501_v31 }
 0xa8c   : > { %10726 = vmatprep.subr.bf16.mxu0 %v11875_v59 }
 0xa8f   : > { %10728 = vmatpush3.bf16.msra.mxu0 %v12506_v44 }
 0xa90   : > { %10729 = vmatprep.subr.bf16.mxu0 %v11875_v59 }
 0xa93   : > { %10731 = vmatpush3.bf16.msra.mxu0 %v12512_v45 }
 0xa94   : > { %10744 = vmatprep.subr.bf16.mxu0 %v11875_v59 }
 0xb49   : > { %v2603_v49 = vpop.f32.mrb[26].mxu0 }
 0xb4a   : > { %v2676_v50 = vpop.f32.mrb[30].mxu1  ;;  %v9119_v51 = vpop.f32.mrb[27].mxu0 }
 0xb4b   : > { %v2677_v52 = vadd.f32 %v2676_v50, %v2603_v49  ;;  %v9138_v53 = vpop.f32.mrb[31].mxu1 }
 0xb4d   : > { %v2680_v54 = vadd.f32 %v2677_v52, %v12236_v27 }
 0xb4f   : > { %11548 = vtanh.f32 %v2680_v54 }
 0xb59   : > { %v11549_v56 = vpop.eup %11548  ;;  %v2752_v58 = vpop.f32.mrb[28].mxu0 }
 0xb5a   : > { %2682 = vst.msk [vmem:[#allocation3 + $0x9] sm:$0x1] %vm665_vm2, %v11549_v56  ;;  %v2756_v60 = vadd.f32 %v7645_v55, %v2752_v58  ;;  %v9157_v61 = vpop.f32.mrb[29].mxu0  ;;  %9175 = vmatmul.mubr.msk.f32.vlgmr.msra.gmra.mrb[32].mxu1 %vm395_vm0, %v11549_v56  ;;  %v7653_v58 = vld [vmem:[%s12518_s16 + $0xc] sm:$0x1] }
 0xb5b   : > { %10734 = vmatpush3.bf16.msra.mxu1 %v12427_v57  ;;  %9212 = vmatprep.mubr.msk.f32.mxu1 %vm11876_vm1, %v11877_v37 }
 0xb5c   : > { %11550 = vtanh.f32 %v2756_v60  ;;  %10735 = vmatprep.subr.bf16.mxu1 %v11875_v59 }
 0xb5f   : > { %10737 = vmatpush3.bf16.msra.mxu1 %v12434_v36 }
 0xb60   : > { %10738 = vmatprep.subr.bf16.mxu1 %v11875_v59 }
 0xb63   : > { %10740 = vmatpush3.bf16.msra.mxu1 %v12449_v39 }
 0xb64   : > { %10741 = vmatprep.subr.bf16.mxu1 %v11875_v59 }
 0xb66   : > { %v11551_v62 = vpop.eup %11550 }
 0xb67   : > { %10743 = vmatpush3.bf16.msra.mxu1 %v12456_v40  ;;  %9194 = vmatmul.mubr.msk.f32.vlgmr.msra.gmra.mrb[30].mxu0 %vm395_vm0, %v11551_v62 }
 0xb68   : > { %10746 = vmatpush3.bf16.msra.mxu0 %v12462_v41  ;;  %10756 = vmatprep.subr.bf16.mxu1 %v11875_v59 }
 0xb69   : > { %10747 = vmatprep.subr.bf16.mxu0 %v11875_v59  ;;  %9231 = vmatprep.mubr.msk.f32.mxu0 %vm11876_vm1, %v11877_v37 }
 0xb6a   : > { %9213 = vmatmul.mubr.msk.f32.vlgmr.msra.gmra.mrb[34].mxu1 %vm395_vm0, %v11551_v62 }
 0xb6b   : > { %10758 = vmatpush3.bf16.msra.mxu1 %v12441_v38  ;;  %9250 = vmatprep.mubr.msk.f32.mxu1 %vm11876_vm1, %v11877_v37 }
 0xb6c   : > { %10749 = vmatpush3.bf16.msra.mxu0 %v12469_v42  ;;  %10759 = vmatprep.subr.bf16.mxu1 %v11875_v59 }
 0xb6d   : > { %10750 = vmatprep.subr.bf16.mxu0 %v11875_v59 }
 0xb6f   : > { %10761 = vmatpush3.bf16.msra.mxu1 %v12501_v31 }
 0xb70   : > { %10752 = vmatpush3.bf16.msra.mxu0 %v12477_v43  ;;  %10762 = vmatprep.subr.bf16.mxu1 %v11875_v59 }
 0xb71   : > { %10753 = vmatprep.subr.bf16.mxu0 %v11875_v59 }
 0xb73   : > { %10764 = vmatpush3.bf16.msra.mxu1 %v12506_v44 }
 0xb74   : > { %10755 = vmatpush3.bf16.msra.mxu0 %v12483_v30  ;;  %10765 = vmatprep.subr.bf16.mxu1 %v11875_v59 }
 0xb75   : > { %10768 = vmatprep.subr.bf16.mxu0 %v11875_v59 }
 0xb77   : > { %10767 = vmatpush3.bf16.msra.mxu1 %v12512_v45 }
 0xb78   : > { %10780 = vmatprep.subr.bf16.mxu1 %v11875_v59 }
 0xc2d   : > { %v2827_v63 = vpop.f32.mrb[32].mxu1 }
 0xc2e   : > { %v9176_v0 = vpop.f32.mrb[33].mxu1 }
 0xc3a   : > { %v2900_v1 = vpop.f32.mrb[30].mxu0 }
 0xc3b   : > { %v2901_v32 = vadd.f32 %v2900_v1, %v2827_v63  ;;  %v9195_v33 = vpop.f32.mrb[31].mxu0 }
 0xc3d   : > { %v2904_v35 = vadd.f32 %v2901_v32, %v12236_v27  ;;  %v2976_v46 = vpop.f32.mrb[34].mxu1 }
 0xc3e   : > { %v2980_v47 = vadd.f32 %v7649_v34, %v2976_v46  ;;  %v9214_v48 = vpop.f32.mrb[35].mxu1  ;;  %v7657_v46 = vld [vmem:[%s12518_s16 + $0xd] sm:$0x1] }
 0xc3f   : > { %11552 = vtanh.f32 %v2904_v35 }
 0xc40   : > { %11554 = vtanh.f32 %v2980_v47 }
 0xc49   : > { %v11553_v49 = vpop.eup %11552 }
 0xc4a   : > { %v11555_v50 = vpop.eup %11554  ;;  %2906 = vst.msk [vmem:[#allocation3 + $0xa] sm:$0x1] %vm665_vm2, %v11553_v49  ;;  %9232 = vmatmul.mubr.msk.f32.vlgmr.msra.gmra.mrb[32].mxu0 %vm395_vm0, %v11553_v49 }
 0xc4b   : > { %9251 = vmatmul.mubr.msk.f32.vlgmr.msra.gmra.mrb[36].mxu1 %vm395_vm0, %v11555_v50  ;;  %10770 = vmatpush3.bf16.msra.mxu0 %v12427_v57 }
 0xc4c   : > { %10771 = vmatprep.subr.bf16.mxu0 %v11875_v59  ;;  %9269 = vmatprep.mubr.msk.f32.mxu0 %vm11876_vm1, %v11877_v37 }
 0xc4d   : > { %10782 = vmatpush3.bf16.msra.mxu1 %v12462_v41  ;;  %9288 = vmatprep.mubr.msk.f32.mxu1 %vm11876_vm1, %v11877_v37 }
 0xc4e   : > { %10783 = vmatprep.subr.bf16.mxu1 %v11875_v59 }
 0xc4f   : > { %10773 = vmatpush3.bf16.msra.mxu0 %v12434_v36 }
 0xc50   : > { %10774 = vmatprep.subr.bf16.mxu0 %v11875_v59 }
 0xc51   : > { %10785 = vmatpush3.bf16.msra.mxu1 %v12469_v42 }
 0xc52   : > { %10786 = vmatprep.subr.bf16.mxu1 %v11875_v59 }
 0xc53   : > { %10776 = vmatpush3.bf16.msra.mxu0 %v12449_v39 }
 0xc54   : > { %10777 = vmatprep.subr.bf16.mxu0 %v11875_v59 }
 0xc55   : > { %10788 = vmatpush3.bf16.msra.mxu1 %v12477_v43 }
 0xc56   : > { %10789 = vmatprep.subr.bf16.mxu1 %v11875_v59 }
 0xc57   : > { %10779 = vmatpush3.bf16.msra.mxu0 %v12456_v40 }
 0xc58   : > { %10792 = vmatprep.subr.bf16.mxu0 %v11875_v59 }
 0xc59   : > { %10791 = vmatpush3.bf16.msra.mxu1 %v12483_v30 }
 0xc5a   : > { %9270 = vmatmul.mubr.msk.f32.vlgmr.msra.gmra.mrb[34].mxu0 %vm395_vm0, %v11555_v50  ;;  %10804 = vmatprep.subr.bf16.mxu1 %v11875_v59 }
 0xc5b   : > { %10794 = vmatpush3.bf16.msra.mxu0 %v12441_v38  ;;  %9307 = vmatprep.mubr.msk.f32.mxu0 %vm11876_vm1, %v11877_v37 }
 0xc5c   : > { %10795 = vmatprep.subr.bf16.mxu0 %v11875_v59 }
 0xc5f   : > { %10797 = vmatpush3.bf16.msra.mxu0 %v12501_v31 }
 0xc60   : > { %10798 = vmatprep.subr.bf16.mxu0 %v11875_v59 }
 0xc63   : > { %10800 = vmatpush3.bf16.msra.mxu0 %v12506_v44 }
 0xc64   : > { %10801 = vmatprep.subr.bf16.mxu0 %v11875_v59 }
 0xc67   : > { %10803 = vmatpush3.bf16.msra.mxu0 %v12512_v45 }
 0xc68   : > { %10816 = vmatprep.subr.bf16.mxu0 %v11875_v59 }
 0xd1d   : > { %v3051_v51 = vpop.f32.mrb[32].mxu0 }
 0xd1e   : > { %v3124_v52 = vpop.f32.mrb[36].mxu1  ;;  %v9233_v53 = vpop.f32.mrb[33].mxu0 }
 0xd1f   : > { %v3125_v54 = vadd.f32 %v3124_v52, %v3051_v51  ;;  %v9252_v55 = vpop.f32.mrb[37].mxu1 }
 0xd21   : > { %v3128_v56 = vadd.f32 %v3125_v54, %v12236_v27 }
 0xd23   : > { %11556 = vtanh.f32 %v3128_v56 }
 0xd2d   : > { %v11557_v60 = vpop.eup %11556  ;;  %v3200_v61 = vpop.f32.mrb[34].mxu0 }
 0xd2e   : > { %3130 = vst.msk [vmem:[#allocation3 + $0xb] sm:$0x1] %vm665_vm2, %v11557_v60  ;;  %v3204_v62 = vadd.f32 %v7653_v58, %v3200_v61  ;;  %v9271_v63 = vpop.f32.mrb[35].mxu0  ;;  %9289 = vmatmul.mubr.msk.f32.vlgmr.msra.gmra.mrb[38].mxu1 %vm395_vm0, %v11557_v60  ;;  %v7661_v61 = vld [vmem:[%s12518_s16 + $0xe] sm:$0x1] }
 0xd2f   : > { %10806 = vmatpush3.bf16.msra.mxu1 %v12427_v57  ;;  %9326 = vmatprep.mubr.msk.f32.mxu1 %vm11876_vm1, %v11877_v37 }
 0xd30   : > { %11558 = vtanh.f32 %v3204_v62  ;;  %10807 = vmatprep.subr.bf16.mxu1 %v11875_v59 }
 0xd33   : > { %10809 = vmatpush3.bf16.msra.mxu1 %v12434_v36 }
 0xd34   : > { %10810 = vmatprep.subr.bf16.mxu1 %v11875_v59 }
 0xd37   : > { %10812 = vmatpush3.bf16.msra.mxu1 %v12449_v39 }
 0xd38   : > { %10813 = vmatprep.subr.bf16.mxu1 %v11875_v59 }
 0xd3a   : > { %v11559_v0 = vpop.eup %11558 }
 0xd3b   : > { %10815 = vmatpush3.bf16.msra.mxu1 %v12456_v40  ;;  %9308 = vmatmul.mubr.msk.f32.vlgmr.msra.gmra.mrb[36].mxu0 %vm395_vm0, %v11559_v0 }
 0xd3c   : > { %10818 = vmatpush3.bf16.msra.mxu0 %v12462_v41  ;;  %10828 = vmatprep.subr.bf16.mxu1 %v11875_v59 }
 0xd3d   : > { %10819 = vmatprep.subr.bf16.mxu0 %v11875_v59  ;;  %9345 = vmatprep.mubr.msk.f32.mxu0 %vm11876_vm1, %v11877_v37 }
 0xd3e   : > { %9327 = vmatmul.mubr.msk.f32.vlgmr.msra.gmra.mrb[40].mxu1 %vm395_vm0, %v11559_v0 }
 0xd3f   : > { %10830 = vmatpush3.bf16.msra.mxu1 %v12441_v38  ;;  %9364 = vmatprep.mubr.msk.f32.mxu1 %vm11876_vm1, %v11877_v37 }
 0xd40   : > { %10821 = vmatpush3.bf16.msra.mxu0 %v12469_v42  ;;  %10831 = vmatprep.subr.bf16.mxu1 %v11875_v59 }
 0xd41   : > { %10822 = vmatprep.subr.bf16.mxu0 %v11875_v59 }
 0xd43   : > { %10833 = vmatpush3.bf16.msra.mxu1 %v12501_v31 }
 0xd44   : > { %10824 = vmatpush3.bf16.msra.mxu0 %v12477_v43  ;;  %10834 = vmatprep.subr.bf16.mxu1 %v11875_v59 }
 0xd45   : > { %10825 = vmatprep.subr.bf16.mxu0 %v11875_v59 }
 0xd47   : > { %10836 = vmatpush3.bf16.msra.mxu1 %v12506_v44 }
 0xd48   : > { %10827 = vmatpush3.bf16.msra.mxu0 %v12483_v30  ;;  %10837 = vmatprep.subr.bf16.mxu1 %v11875_v59 }
 0xd49   : > { %10840 = vmatprep.subr.bf16.mxu0 %v11875_v59 }
 0xd4b   : > { %10839 = vmatpush3.bf16.msra.mxu1 %v12512_v45 }
 0xd4c   : > { %10852 = vmatprep.subr.bf16.mxu1 %v11875_v59 }
 0xe01   : > { %v3275_v1 = vpop.f32.mrb[38].mxu1 }
 0xe02   : > { %v9290_v32 = vpop.f32.mrb[39].mxu1 }
 0xe0e   : > { %v3348_v33 = vpop.f32.mrb[36].mxu0 }
 0xe0f   : > { %v3349_v34 = vadd.f32 %v3348_v33, %v3275_v1  ;;  %v9309_v35 = vpop.f32.mrb[37].mxu0 }
 0xe11   : > { %v3352_v47 = vadd.f32 %v3349_v34, %v12236_v27  ;;  %v3424_v48 = vpop.f32.mrb[40].mxu1 }
 0xe12   : > { %v3428_v49 = vadd.f32 %v7657_v46, %v3424_v48  ;;  %v9328_v50 = vpop.f32.mrb[41].mxu1  ;;  %v7665_v48 = vld [vmem:[%s12518_s16 + $0xf] sm:$0x1] }
 0xe13   : > { %11560 = vtanh.f32 %v3352_v47 }
 0xe14   : > { %11562 = vtanh.f32 %v3428_v49 }
 0xe1d   : > { %v11561_v51 = vpop.eup %11560 }
 0xe1e   : > { %v11563_v52 = vpop.eup %11562  ;;  %3354 = vst.msk [vmem:[#allocation3 + $0xc] sm:$0x1] %vm665_vm2, %v11561_v51  ;;  %9346 = vmatmul.mubr.msk.f32.vlgmr.msra.gmra.mrb[38].mxu0 %vm395_vm0, %v11561_v51 }
 0xe1f   : > { %9365 = vmatmul.mubr.msk.f32.vlgmr.msra.gmra.mrb[42].mxu1 %vm395_vm0, %v11563_v52  ;;  %10842 = vmatpush3.bf16.msra.mxu0 %v12427_v57 }
 0xe20   : > { %10843 = vmatprep.subr.bf16.mxu0 %v11875_v59  ;;  %9383 = vmatprep.mubr.msk.f32.mxu0 %vm11876_vm1, %v11877_v37 }
 0xe21   : > { %10854 = vmatpush3.bf16.msra.mxu1 %v12462_v41  ;;  %9402 = vmatprep.mubr.msk.f32.mxu1 %vm11876_vm1, %v11877_v37 }
 0xe22   : > { %10855 = vmatprep.subr.bf16.mxu1 %v11875_v59 }
 0xe23   : > { %10845 = vmatpush3.bf16.msra.mxu0 %v12434_v36 }
 0xe24   : > { %10846 = vmatprep.subr.bf16.mxu0 %v11875_v59 }
 0xe25   : > { %10857 = vmatpush3.bf16.msra.mxu1 %v12469_v42 }
 0xe26   : > { %10858 = vmatprep.subr.bf16.mxu1 %v11875_v59 }
 0xe27   : > { %10848 = vmatpush3.bf16.msra.mxu0 %v12449_v39 }
 0xe28   : > { %10849 = vmatprep.subr.bf16.mxu0 %v11875_v59 }
 0xe29   : > { %10860 = vmatpush3.bf16.msra.mxu1 %v12477_v43 }
 0xe2a   : > { %10861 = vmatprep.subr.bf16.mxu1 %v11875_v59 }
 0xe2b   : > { %10851 = vmatpush3.bf16.msra.mxu0 %v12456_v40 }
 0xe2c   : > { %10864 = vmatprep.subr.bf16.mxu0 %v11875_v59 }
 0xe2d   : > { %10863 = vmatpush3.bf16.msra.mxu1 %v12483_v30 }
 0xe2e   : > { %9384 = vmatmul.mubr.msk.f32.vlgmr.msra.gmra.mrb[40].mxu0 %vm395_vm0, %v11563_v52  ;;  %10876 = vmatprep.subr.bf16.mxu1 %v11875_v59 }
 0xe2f   : > { %10866 = vmatpush3.bf16.msra.mxu0 %v12441_v38  ;;  %9421 = vmatprep.mubr.msk.f32.mxu0 %vm11876_vm1, %v11877_v37 }
 0xe30   : > { %10867 = vmatprep.subr.bf16.mxu0 %v11875_v59 }
 0xe33   : > { %10869 = vmatpush3.bf16.msra.mxu0 %v12501_v31 }
 0xe34   : > { %10870 = vmatprep.subr.bf16.mxu0 %v11875_v59 }
 0xe37   : > { %10872 = vmatpush3.bf16.msra.mxu0 %v12506_v44 }
 0xe38   : > { %10873 = vmatprep.subr.bf16.mxu0 %v11875_v59 }
 0xe3b   : > { %10875 = vmatpush3.bf16.msra.mxu0 %v12512_v45 }
 0xe3c   : > { %10888 = vmatprep.subr.bf16.mxu0 %v11875_v59 }
 0xef1   : > { %v3499_v53 = vpop.f32.mrb[38].mxu0 }
 0xef2   : > { %v3572_v54 = vpop.f32.mrb[42].mxu1  ;;  %v9347_v55 = vpop.f32.mrb[39].mxu0 }
 0xef3   : > { %v3573_v56 = vadd.f32 %v3572_v54, %v3499_v53  ;;  %v9366_v58 = vpop.f32.mrb[43].mxu1 }
 0xef5   : > { %v3576_v60 = vadd.f32 %v3573_v56, %v12236_v27 }
 0xef7   : > { %11564 = vtanh.f32 %v3576_v60 }
 0xf01   : > { %v11565_v62 = vpop.eup %11564  ;;  %v3648_v63 = vpop.f32.mrb[40].mxu0 }
 0xf02   : > { %3578 = vst.msk [vmem:[#allocation3 + $0xd] sm:$0x1] %vm665_vm2, %v11565_v62  ;;  %v3652_v0 = vadd.f32 %v7661_v61, %v3648_v63  ;;  %v9385_v1 = vpop.f32.mrb[41].mxu0  ;;  %9403 = vmatmul.mubr.msk.f32.vlgmr.msra.gmra.mrb[44].mxu1 %vm395_vm0, %v11565_v62  ;;  %v7669_v63 = vld [vmem:[%s12518_s16 + $0x10] sm:$0x1] }
 0xf03   : > { %10878 = vmatpush3.bf16.msra.mxu1 %v12427_v57  ;;  %9440 = vmatprep.mubr.msk.f32.mxu1 %vm11876_vm1, %v11877_v37 }
 0xf04   : > { %11566 = vtanh.f32 %v3652_v0  ;;  %10879 = vmatprep.subr.bf16.mxu1 %v11875_v59 }
 0xf07   : > { %10881 = vmatpush3.bf16.msra.mxu1 %v12434_v36 }
 0xf08   : > { %10882 = vmatprep.subr.bf16.mxu1 %v11875_v59 }
 0xf0b   : > { %10884 = vmatpush3.bf16.msra.mxu1 %v12449_v39 }
 0xf0c   : > { %10885 = vmatprep.subr.bf16.mxu1 %v11875_v59 }
 0xf0e   : > { %v11567_v32 = vpop.eup %11566 }
 0xf0f   : > { %10887 = vmatpush3.bf16.msra.mxu1 %v12456_v40  ;;  %9422 = vmatmul.mubr.msk.f32.vlgmr.msra.gmra.mrb[42].mxu0 %vm395_vm0, %v11567_v32 }
 0xf10   : > { %10890 = vmatpush3.bf16.msra.mxu0 %v12462_v41  ;;  %10900 = vmatprep.subr.bf16.mxu1 %v11875_v59 }
 0xf11   : > { %10891 = vmatprep.subr.bf16.mxu0 %v11875_v59  ;;  %9459 = vmatprep.mubr.msk.f32.mxu0 %vm11876_vm1, %v11877_v37 }
 0xf12   : > { %9441 = vmatmul.mubr.msk.f32.vlgmr.msra.gmra.mrb[46].mxu1 %vm395_vm0, %v11567_v32 }
 0xf13   : > { %10902 = vmatpush3.bf16.msra.mxu1 %v12441_v38  ;;  %9478 = vmatprep.mubr.msk.f32.mxu1 %vm11876_vm1, %v11877_v37 }
 0xf14   : > { %10893 = vmatpush3.bf16.msra.mxu0 %v12469_v42  ;;  %10903 = vmatprep.subr.bf16.mxu1 %v11875_v59 }
 0xf15   : > { %10894 = vmatprep.subr.bf16.mxu0 %v11875_v59 }
 0xf17   : > { %10905 = vmatpush3.bf16.msra.mxu1 %v12501_v31 }
 0xf18   : > { %10896 = vmatpush3.bf16.msra.mxu0 %v12477_v43  ;;  %10906 = vmatprep.subr.bf16.mxu1 %v11875_v59 }
 0xf19   : > { %10897 = vmatprep.subr.bf16.mxu0 %v11875_v59 }
 0xf1b   : > { %10908 = vmatpush3.bf16.msra.mxu1 %v12506_v44 }
 0xf1c   : > { %10899 = vmatpush3.bf16.msra.mxu0 %v12483_v30  ;;  %10909 = vmatprep.subr.bf16.mxu1 %v11875_v59 }
 0xf1d   : > { %10912 = vmatprep.subr.bf16.mxu0 %v11875_v59 }
 0xf1f   : > { %10911 = vmatpush3.bf16.msra.mxu1 %v12512_v45 }
 0xf20   : > { %10924 = vmatprep.subr.bf16.mxu1 %v11875_v59 }
 0xfd5   : > { %v3723_v33 = vpop.f32.mrb[44].mxu1 }
 0xfd6   : > { %v9404_v34 = vpop.f32.mrb[45].mxu1 }
 0xfe2   : > { %v3796_v35 = vpop.f32.mrb[42].mxu0 }
 0xfe3   : > { %v3797_v46 = vadd.f32 %v3796_v35, %v3723_v33  ;;  %v9423_v47 = vpop.f32.mrb[43].mxu0 }
 0xfe5   : > { %v3800_v49 = vadd.f32 %v3797_v46, %v12236_v27  ;;  %v3872_v50 = vpop.f32.mrb[46].mxu1 }
 0xfe6   : > { %v3876_v51 = vadd.f32 %v7665_v48, %v3872_v50  ;;  %v9442_v52 = vpop.f32.mrb[47].mxu1  ;;  %v7673_v50 = vld [vmem:[%s12518_s16 + $0x11] sm:$0x1] }
 0xfe7   : > { %11568 = vtanh.f32 %v3800_v49 }
 0xfe8   : > { %11570 = vtanh.f32 %v3876_v51 }
 0xff1   : > { %v11569_v53 = vpop.eup %11568 }
 0xff2   : > { %v11571_v54 = vpop.eup %11570  ;;  %3802 = vst.msk [vmem:[#allocation3 + $0xe] sm:$0x1] %vm665_vm2, %v11569_v53  ;;  %9460 = vmatmul.mubr.msk.f32.vlgmr.msra.gmra.mrb[44].mxu0 %vm395_vm0, %v11569_v53 }
 0xff3   : > { %9479 = vmatmul.mubr.msk.f32.vlgmr.msra.gmra.mrb[48].mxu1 %vm395_vm0, %v11571_v54  ;;  %10914 = vmatpush3.bf16.msra.mxu0 %v12427_v57 }
 0xff4   : > { %10915 = vmatprep.subr.bf16.mxu0 %v11875_v59  ;;  %9497 = vmatprep.mubr.msk.f32.mxu0 %vm11876_vm1, %v11877_v37 }
 0xff5   : > { %10926 = vmatpush3.bf16.msra.mxu1 %v12462_v41  ;;  %9516 = vmatprep.mubr.msk.f32.mxu1 %vm11876_vm1, %v11877_v37 }
 0xff6   : > { %10927 = vmatprep.subr.bf16.mxu1 %v11875_v59 }
 0xff7   : > { %10917 = vmatpush3.bf16.msra.mxu0 %v12434_v36 }
 0xff8   : > { %10918 = vmatprep.subr.bf16.mxu0 %v11875_v59 }
 0xff9   : > { %10929 = vmatpush3.bf16.msra.mxu1 %v12469_v42 }
 0xffa   : > { %10930 = vmatprep.subr.bf16.mxu1 %v11875_v59 }
 0xffb   : > { %10920 = vmatpush3.bf16.msra.mxu0 %v12449_v39 }
 0xffc   : > { %10921 = vmatprep.subr.bf16.mxu0 %v11875_v59 }
 0xffd   : > { %10932 = vmatpush3.bf16.msra.mxu1 %v12477_v43 }
 0xffe   : > { %10933 = vmatprep.subr.bf16.mxu1 %v11875_v59 }
 0xfff   : > { %10923 = vmatpush3.bf16.msra.mxu0 %v12456_v40 }
0x1000   : > { %10936 = vmatprep.subr.bf16.mxu0 %v11875_v59 }
0x1001   : > { %10935 = vmatpush3.bf16.msra.mxu1 %v12483_v30 }
0x1002   : > { %9498 = vmatmul.mubr.msk.f32.vlgmr.msra.gmra.mrb[46].mxu0 %vm395_vm0, %v11571_v54  ;;  %10948 = vmatprep.subr.bf16.mxu1 %v11875_v59 }
0x1003   : > { %10938 = vmatpush3.bf16.msra.mxu0 %v12441_v38  ;;  %9535 = vmatprep.mubr.msk.f32.mxu0 %vm11876_vm1, %v11877_v37 }
0x1004   : > { %10939 = vmatprep.subr.bf16.mxu0 %v11875_v59 }
0x1007   : > { %10941 = vmatpush3.bf16.msra.mxu0 %v12501_v31 }
0x1008   : > { %10942 = vmatprep.subr.bf16.mxu0 %v11875_v59 }
0x100b   : > { %10944 = vmatpush3.bf16.msra.mxu0 %v12506_v44 }
0x100c   : > { %10945 = vmatprep.subr.bf16.mxu0 %v11875_v59 }
0x100f   : > { %10947 = vmatpush3.bf16.msra.mxu0 %v12512_v45 }
0x1010   : > { %10960 = vmatprep.subr.bf16.mxu0 %v11875_v59 }
0x10c5   : > { %v3947_v55 = vpop.f32.mrb[44].mxu0 }
0x10c6   : > { %v4020_v56 = vpop.f32.mrb[48].mxu1  ;;  %v9461_v58 = vpop.f32.mrb[45].mxu0 }
0x10c7   : > { %v4021_v60 = vadd.f32 %v4020_v56, %v3947_v55  ;;  %v9480_v61 = vpop.f32.mrb[49].mxu1 }
0x10c9   : > { %v4024_v62 = vadd.f32 %v4021_v60, %v12236_v27 }
0x10cb   : > { %11572 = vtanh.f32 %v4024_v62 }
0x10d5   : > { %v11573_v0 = vpop.eup %11572  ;;  %v4096_v1 = vpop.f32.mrb[46].mxu0 }
0x10d6   : > { %4026 = vst.msk [vmem:[#allocation3 + $0xf] sm:$0x1] %vm665_vm2, %v11573_v0  ;;  %v4100_v32 = vadd.f32 %v7669_v63, %v4096_v1  ;;  %v9499_v33 = vpop.f32.mrb[47].mxu0  ;;  %9517 = vmatmul.mubr.msk.f32.vlgmr.msra.gmra.mrb[50].mxu1 %vm395_vm0, %v11573_v0  ;;  %v7677_v1 = vld [vmem:[%s12518_s16 + $0x12] sm:$0x1] }
0x10d7   : > { %10950 = vmatpush3.bf16.msra.mxu1 %v12427_v57  ;;  %9554 = vmatprep.mubr.msk.f32.mxu1 %vm11876_vm1, %v11877_v37 }
0x10d8   : > { %11574 = vtanh.f32 %v4100_v32  ;;  %10951 = vmatprep.subr.bf16.mxu1 %v11875_v59 }
0x10db   : > { %10953 = vmatpush3.bf16.msra.mxu1 %v12434_v36 }
0x10dc   : > { %10954 = vmatprep.subr.bf16.mxu1 %v11875_v59 }
0x10df   : > { %10956 = vmatpush3.bf16.msra.mxu1 %v12449_v39 }
0x10e0   : > { %10957 = vmatprep.subr.bf16.mxu1 %v11875_v59 }
0x10e2   : > { %v11575_v34 = vpop.eup %11574 }
0x10e3   : > { %10959 = vmatpush3.bf16.msra.mxu1 %v12456_v40  ;;  %9536 = vmatmul.mubr.msk.f32.vlgmr.msra.gmra.mrb[48].mxu0 %vm395_vm0, %v11575_v34 }
0x10e4   : > { %10962 = vmatpush3.bf16.msra.mxu0 %v12462_v41  ;;  %10972 = vmatprep.subr.bf16.mxu1 %v11875_v59 }
0x10e5   : > { %10963 = vmatprep.subr.bf16.mxu0 %v11875_v59  ;;  %9573 = vmatprep.mubr.msk.f32.mxu0 %vm11876_vm1, %v11877_v37 }
0x10e6   : > { %9555 = vmatmul.mubr.msk.f32.vlgmr.msra.gmra.mrb[52].mxu1 %vm395_vm0, %v11575_v34 }
0x10e7   : > { %10974 = vmatpush3.bf16.msra.mxu1 %v12441_v38  ;;  %9592 = vmatprep.mubr.msk.f32.mxu1 %vm11876_vm1, %v11877_v37 }
0x10e8   : > { %10965 = vmatpush3.bf16.msra.mxu0 %v12469_v42  ;;  %10975 = vmatprep.subr.bf16.mxu1 %v11875_v59 }
0x10e9   : > { %10966 = vmatprep.subr.bf16.mxu0 %v11875_v59 }
0x10eb   : > { %10977 = vmatpush3.bf16.msra.mxu1 %v12501_v31 }
0x10ec   : > { %10968 = vmatpush3.bf16.msra.mxu0 %v12477_v43  ;;  %10978 = vmatprep.subr.bf16.mxu1 %v11875_v59 }
0x10ed   : > { %10969 = vmatprep.subr.bf16.mxu0 %v11875_v59 }
0x10ef   : > { %10980 = vmatpush3.bf16.msra.mxu1 %v12506_v44 }
0x10f0   : > { %10971 = vmatpush3.bf16.msra.mxu0 %v12483_v30  ;;  %10981 = vmatprep.subr.bf16.mxu1 %v11875_v59 }
0x10f1   : > { %10984 = vmatprep.subr.bf16.mxu0 %v11875_v59 }
0x10f3   : > { %10983 = vmatpush3.bf16.msra.mxu1 %v12512_v45 }
0x10f4   : > { %10996 = vmatprep.subr.bf16.mxu1 %v11875_v59 }
0x11a9   : > { %v4171_v35 = vpop.f32.mrb[50].mxu1 }
0x11aa   : > { %v9518_v46 = vpop.f32.mrb[51].mxu1 }
0x11b6   : > { %v4244_v47 = vpop.f32.mrb[48].mxu0 }
0x11b7   : > { %v4245_v48 = vadd.f32 %v4244_v47, %v4171_v35  ;;  %v9537_v49 = vpop.f32.mrb[49].mxu0 }
0x11b9   : > { %v4248_v51 = vadd.f32 %v4245_v48, %v12236_v27  ;;  %v4320_v52 = vpop.f32.mrb[52].mxu1  ;;  %v5062_v48 = vld [vmem:[#allocation16 + $0x20] sm:$0xff] (%p433_p0) }
0x11ba   : > { %v4324_v53 = vadd.f32 %v7673_v50, %v4320_v52  ;;  %v9556_v54 = vpop.f32.mrb[53].mxu1 }
0x11bb   : > { %11576 = vtanh.f32 %v4248_v51  ;;  %v11878_v51 = vmov 0  }
0x11bc   : > { %11578 = vtanh.f32 %v4324_v53  ;;  %11509 = vset.pattern.permute.xlu0 %v11878_v51  ;;  %v5065_v51 = vld [vmem:[#allocation16 + $0x38] sm:$0xff] (%p433_p0) }
0x11bd   : > { %4933 = vperm.xlu0 %11509, %v12243_v29   ;;  %v5168_v29 = vld [vmem:[%s13763_s10] sm:$0x1] (%p433_p0) }
0x11c5   : > { %v11577_v55 = vpop.eup %11576 }
0x11c6   : > { %v11579_v56 = vpop.eup %11578  ;;  %4250 = vst.msk [vmem:[#allocation3 + $0x10] sm:$0x1] %vm665_vm2, %v11577_v55  ;;  %9574 = vmatmul.mubr.msk.f32.vlgmr.msra.gmra.mrb[50].mxu0 %vm395_vm0, %v11577_v55 }
0x11c7   : > { %9593 = vmatmul.mubr.msk.f32.vlgmr.msra.gmra.mrb[54].mxu1 %vm395_vm0, %v11579_v56  ;;  %10986 = vmatpush3.bf16.msra.mxu0 %v12427_v57 }
0x11c8   : > { %10987 = vmatprep.subr.bf16.mxu0 %v11875_v59  ;;  %9611 = vmatprep.mubr.msk.f32.mxu0 %vm11876_vm1, %v11877_v37 }
0x11c9   : > { %10998 = vmatpush3.bf16.msra.mxu1 %v12462_v41  ;;  %9630 = vmatprep.mubr.msk.f32.mxu1 %vm11876_vm1, %v11877_v37 }
0x11ca   : > { %10999 = vmatprep.subr.bf16.mxu1 %v11875_v59 }
0x11cb   : > { %10989 = vmatpush3.bf16.msra.mxu0 %v12434_v36 }
0x11cc   : > { %10990 = vmatprep.subr.bf16.mxu0 %v11875_v59 }
0x11cd   : > { %11001 = vmatpush3.bf16.msra.mxu1 %v12469_v42 }
0x11ce   : > { %11002 = vmatprep.subr.bf16.mxu1 %v11875_v59 }
0x11cf   : > { %10992 = vmatpush3.bf16.msra.mxu0 %v12449_v39 }
0x11d0   : > { %10993 = vmatprep.subr.bf16.mxu0 %v11875_v59 }
0x11d1   : > { %11004 = vmatpush3.bf16.msra.mxu1 %v12477_v43 }
0x11d2   : > { %11005 = vmatprep.subr.bf16.mxu1 %v11875_v59 }
0x11d3   : > { %10995 = vmatpush3.bf16.msra.mxu0 %v12456_v40 }
0x11d4   : > { %11008 = vmatprep.subr.bf16.mxu0 %v11875_v59 }
0x11d5   : > { %11007 = vmatpush3.bf16.msra.mxu1 %v12483_v30 }
0x11d6   : > { %9612 = vmatmul.mubr.msk.f32.vlgmr.msra.gmra.mrb[52].mxu0 %vm395_vm0, %v11579_v56  ;;  %11020 = vmatprep.subr.bf16.mxu1 %v11875_v59 }
0x11d7   : > { %11010 = vmatpush3.bf16.msra.mxu0 %v12441_v38  ;;  %9649 = vmatprep.mubr.msk.f32.mxu0 %vm11876_vm1, %v11877_v37 }
0x11d8   : > { %11011 = vmatprep.subr.bf16.mxu0 %v11875_v59 }
0x11db   : > { %11013 = vmatpush3.bf16.msra.mxu0 %v12501_v31 }
0x11dc   : > { %11014 = vmatprep.subr.bf16.mxu0 %v11875_v59 }
0x11df   : > { %11016 = vmatpush3.bf16.msra.mxu0 %v12506_v44 }
0x11e0   : > { %11017 = vmatprep.subr.bf16.mxu0 %v11875_v59 }
0x11e3   : > { %11019 = vmatpush3.bf16.msra.mxu0 %v12512_v45 }
0x11e4   : > { %11032 = vmatprep.subr.bf16.mxu0 %v11875_v59 }
0x1299   : > { %v4395_v58 = vpop.f32.mrb[50].mxu0 }
0x129a   : > { %v4468_v60 = vpop.f32.mrb[54].mxu1  ;;  %v9575_v61 = vpop.f32.mrb[51].mxu0 }
0x129b   : > { %v4469_v62 = vadd.f32 %v4468_v60, %v4395_v58  ;;  %v9594_v63 = vpop.f32.mrb[55].mxu1  ;;  %v4926_v61 = vld [vmem:[#allocation3 + $0x18] sm:$0xff] }
0x129d   : > { %v4472_v0 = vadd.f32 %v4469_v62, %v12236_v27 }
0x129f   : > { %11580 = vtanh.f32 %v4472_v0  ;;  %v4928_v0 = vld [vmem:[#allocation3 + $0x28] sm:$0xff] }
0x12a9   : > { %v11581_v32 = vpop.eup %11580  ;;  %v4544_v33 = vpop.f32.mrb[52].mxu0 }
0x12aa   : > { %4474 = vst.msk [vmem:[#allocation3 + $0x11] sm:$0x1] %vm665_vm2, %v11581_v32  ;;  %v4548_v34 = vadd.f32 %v7677_v1, %v4544_v33  ;;  %v9613_v35 = vpop.f32.mrb[53].mxu0  ;;  %9631 = vmatmul.mubr.msk.f32.vlgmr.msra.gmra.mrb[56].mxu1 %vm395_vm0, %v11581_v32  ;;  %v4929_v32 = vld [vmem:[#allocation3 + $0x30] sm:$0xff]  ;;  %v4930_v33 = vld [vmem:[#allocation3 + $0x38] sm:$0xff] }
0x12ab   : > { %11022 = vmatpush3.bf16.msra.mxu1 %v12427_v57  ;;  %9668 = vmatprep.mubr.msk.f32.mxu1 %vm11876_vm1, %v11877_v37  ;;  %v4936_v35 = vlaneseq }
0x12ac   : > { %11582 = vtanh.f32 %v4548_v34  ;;  %11023 = vmatprep.subr.bf16.mxu1 %v11875_v59  ;;  %v11069_v34 = vpack.c.bf16 %v4930_v33, %v4929_v32  ;;  %v7694_v33 = vld [vmem:[#allocation13] ss:$0 sm:$0xff] (%p433_p0) }
0x12af   : > { %11025 = vmatpush3.bf16.msra.mxu1 %v12434_v36 }
0x12b0   : > { %11026 = vmatprep.subr.bf16.mxu1 %v11875_v59 }
0x12b3   : > { %11028 = vmatpush3.bf16.msra.mxu1 %v12449_v39 }
0x12b4   : > { %11029 = vmatprep.subr.bf16.mxu1 %v11875_v59 }
0x12b6   : > { %v11583_v46 = vpop.eup %11582 }
0x12b7   : > { %11031 = vmatpush3.bf16.msra.mxu1 %v12456_v40  ;;  %9650 = vmatmul.mubr.msk.f32.vlgmr.msra.gmra.mrb[54].mxu0 %vm395_vm0, %v11583_v46 }
0x12b8   : > { %11034 = vmatpush3.bf16.msra.mxu0 %v12462_v41  ;;  %11044 = vmatprep.subr.bf16.mxu1 %v11875_v59  ;;  %v7681_v41 = vld [vmem:[%s12518_s16 + $0x13] sm:$0x1] }
0x12b9   : > { %11035 = vmatprep.subr.bf16.mxu0 %v11875_v59  ;;  %9687 = vmatprep.mubr.msk.f32.mxu0 %vm11876_vm1, %v11877_v37 }
0x12ba   : > { %9669 = vmatmul.mubr.msk.f32.vlgmr.msra.gmra.mrb[58].mxu1 %vm395_vm0, %v11583_v46  ;;  %v4937_v46 = vshrl.u32 %v4936_v35, 7 }
0x12bb   : > { %11046 = vmatpush3.bf16.msra.mxu1 %v12441_v38  ;;  %9706 = vmatprep.mubr.msk.f32.mxu1 %vm11876_vm1, %v11877_v37 }
0x12bc   : > { %11037 = vmatpush3.bf16.msra.mxu0 %v12469_v42  ;;  %11047 = vmatprep.subr.bf16.mxu1 %v11875_v59 }
0x12bd   : > { %11038 = vmatprep.subr.bf16.mxu0 %v11875_v59 }
0x12bf   : > { %11049 = vmatpush3.bf16.msra.mxu1 %v12501_v31 }
0x12c0   : > { %11040 = vmatpush3.bf16.msra.mxu0 %v12477_v43  ;;  %11050 = vmatprep.subr.bf16.mxu1 %v11875_v59 }
0x12c1   : > { %11041 = vmatprep.subr.bf16.mxu0 %v11875_v59 }
0x12c3   : > { %11052 = vmatpush3.bf16.msra.mxu1 %v12506_v44  ;;  %v4923_v44 = vld [vmem:[#allocation3] sm:$0xff] }
0x12c4   : > { %11043 = vmatpush3.bf16.msra.mxu0 %v12483_v30  ;;  %11053 = vmatprep.subr.bf16.mxu1 %v11875_v59  ;;  %v4924_v30 = vld [vmem:[#allocation3 + $0x8] sm:$0xff] }
0x12c5   : > { %11056 = vmatprep.subr.bf16.mxu0 %v11875_v59  ;;  %v11057_v49 = vpack.c.bf16 %v4924_v30, %v4923_v44 }
0x12c7   : > { %11055 = vmatpush3.bf16.msra.mxu1 %v12512_v45 }
0x12c8   :  { %11088 = vmatprep.subr.bf16.mxu1 (%p433_p0), %v11879_v5 }
0x137d   : > { %v4619_v57 = vpop.f32.mrb[56].mxu1 }
0x137e   : > { %v9632_v36 = vpop.f32.mrb[57].mxu1 }
0x137f   : > { %v4934_v36 = vpop.permute.xlu0 %4933 }
0x138a   : > { %v4692_v38 = vpop.f32.mrb[54].mxu0 }
0x138b   : > { %v4693_v39 = vadd.f32 %v4692_v38, %v4619_v57  ;;  %v9651_v40 = vpop.f32.mrb[55].mxu0  ;;  %v4938_v57 = vsub.s32 0, %v4937_v46 }
0x138d   : > { %v4696_v42 = vadd.f32 %v4693_v39, %v12236_v27  ;;  %v4768_v43 = vpop.f32.mrb[58].mxu1  ;;  %v4939_v38 = vrot.slane %v4934_v36, %v4938_v57 }
0x138e   : > { %v4772_v31 = vadd.f32 %v7681_v41, %v4768_v43  ;;  %v9670_v47 = vpop.f32.mrb[59].mxu1  ;;  %v5071_v43 = vld [vmem:[%s13732_s11 + $0x10] sm:$0xff] (%p433_p0) }
0x138f   : > { %11584 = vtanh.f32 %v4696_v42  ;;  %v5070_v42 = vld [vmem:[%s13732_s11 + $0x8] sm:$0xff] (%p433_p0)  ;;  %v11076_v6 = vpack.c.bf16 (%p433_p0), %v5072_v3, %v5071_v43  ;;  %v13377_v43 = vld [vmem:[#allocation17] sm:$0x1] (%p433_p0) }
0x1390   : > { %11586 = vtanh.f32 %v4772_v31 }
0x1399   : > { %v11585_v45 = vpop.eup %11584 }
0x139a   : > { %v11587_v50 = vpop.eup %11586   ;;  %4698 = vst.msk [vmem:[#allocation3 + $0x12] sm:$0x1] %vm665_vm2, %v11585_v45  ;;  %9688 = vmatmul.mubr.msk.f32.vlgmr.msra.gmra.mrb[56].mxu0 %vm395_vm0, %v11585_v45  ;;  %v5063_v45 = vld [vmem:[#allocation16 + $0x28] sm:$0xff] (%p433_p0) }
0x139b   : > { %9707 = vmatmul.mubr.msk.f32.vlgmr.msra.gmra.mrb[60].mxu1 %vm395_vm0, %v11587_v50  ;;  %11059 = vmatpush3.bf16.xpose.msk.msra.mxu0 %vm13194_vm3, %v11057_v49  ;;  %v13762_v30 = vmov %v11587_v50  ;;  %5040 = vst.msk [vmem:[#allocation20] sm:$0x1] (%p433_p0), %vm665_vm2, %v11587_v50  ;;  %v13316_v49 = vpack.c.bf16 (%p433_p0), %v5063_v45, %v5062_v48  ;;  %v5064_v50 = vld [vmem:[#allocation16 + $0x30] sm:$0xff] (%p433_p0) }
0x139c   : > { %11060 = vmatprep.subr.bf16.mxu0 %v11875_v59  ;;  %9725 = vmatprep.mubr.msk.f32.mxu0 %vm11876_vm1, %v11877_v37  ;;  %v4927_v37 = vld [vmem:[#allocation3 + $0x20] sm:$0xff]  ;;  %v5061_v30 = vld [vmem:[#allocation16 + $0x18] sm:$0xff] (%p433_p0) }
0x139d   : > { %v11065_v1 = vpack.c.bf16 %v4928_v0, %v4927_v37  ;;  %9763 = vmatprep.mubr.msk.f32.mxu1 (%p433_p0), %vm11880_vm4, %v11874_v2  ;;  %11090 = vmatpush3.bf16.msra.mxu1 (%p433_p0), %v13257_v10  ;;  %v5056_v0 = vld [vmem:[#allocation14 + $0x30] sm:$0xff] (%p433_p0) }
0x139e   :  { %11091 = vmatprep.subr.bf16.mxu1 (%p433_p0), %v11879_v5 }
0x13a1   :  { %11093 = vmatpush3.bf16.msra.mxu1 (%p433_p0), %v13270_v16 }
0x13a2   :  { %11094 = vmatprep.subr.bf16.mxu1 (%p433_p0), %v11879_v5 }
0x13a5   :  { %11096 = vmatpush3.bf16.msra.mxu1 (%p433_p0), %v13283_v21 }
0x13a6   :  { %11097 = vmatprep.subr.bf16.mxu1 (%p433_p0), %v11879_v5 }
0x13a9   :  { %11099 = vmatpush3.bf16.msra.mxu1 (%p433_p0), %v13293_v24 }
0x13aa   :  { %11112 = vmatprep.subr.bf16.mxu1 (%p433_p0), %v11879_v5 }
0x13ac   :  { %9764 = vmatmul.mubr.msk.f32.vlgmr.msra.gmra.mrb[0].mxu1 (%p433_p0), %vm395_vm0, %v5168_v29 }
0x13ad   :  { %9801 = vmatprep.mubr.msk.f32.mxu1 (%p433_p0), %vm11880_vm4, %v11874_v2 }
0x146d   : > { %v4843_v52 = vpop.f32.mrb[56].mxu0 }
0x146e   : > { %v4916_v53 = vpop.f32.mrb[60].mxu1  ;;  %v9689_v54 = vpop.f32.mrb[57].mxu0 }
0x146f   : > { %v4917_v55 = vadd.f32 %v4916_v53, %v4843_v52  ;;  %v9708_v56 = vpop.f32.mrb[61].mxu1  ;;  %v13320_v52 = vpack.c.bf16 (%p433_p0), %v5065_v51, %v5064_v50  ;;  %v5050_v53 = vld [vmem:[#allocation14] sm:$0xff] (%p433_p0)  ;;  %v5051_v54 = vld [vmem:[#allocation14 + $0x8] sm:$0xff] (%p433_p0) }
0x1470   :  { %v5169_v56 = vld [vmem:[%s13763_s10 + $0x1] sm:$0x1] (%p433_p0) }
0x1471   : > { %v4920_v58 = vadd.f32 %v4917_v55, %v12236_v27  ;;  %v13324_v55 = vpack.c.bf16 (%p433_p0), %v5051_v54, %v5050_v53 }
0x1473   : > { %11588 = vtanh.f32 %v4920_v58  ;;  %11114 = vmatpush3.bf16.msra.mxu1 (%p433_p0), %v13324_v55  ;;  %v5052_v58 = vld [vmem:[#allocation14 + $0x10] sm:$0xff] (%p433_p0) }
0x1474   :  { %11115 = vmatprep.subr.bf16.mxu1 (%p433_p0), %v11879_v5 }
0x147d   : > { %v11589_v60 = vpop.eup %11588  }
0x147e   : > { %4922 = vst.msk [vmem:[#allocation3 + $0x13] sm:$0x1] %vm665_vm2, %v11589_v60  ;;  %v13761_v31 = vmov %v11589_v60  ;;  %5041 = vst.msk [vmem:[#allocation20 + $0x1] sm:$0x1] (%p433_p0), %vm665_vm2, %v11589_v60  ;;  %v5053_v60 = vld [vmem:[#allocation14 + $0x18] sm:$0xff] (%p433_p0) }
0x147f   :  { %v5060_v31 = vld [vmem:[#allocation16 + $0x10] sm:$0xff] (%p433_p0)  ;;  %v5240_v57 = vpop.f32.mrb[0].mxu1 (%p433_p0) }
0x1480   :  { %v13307_v44 = vpack.c.bf16 (%p433_p0), %v5061_v30, %v5060_v31 }
0x1485   : > { %v4925_v62 = vld [vmem:[#allocation3 + $0x10] sm:$0xff] }
0x1486   : > { %v11061_v63 = vpack.c.bf16 %v4926_v61, %v4925_v62  ;;  %v13334_v61 = vpack.c.bf16 (%p433_p0), %v5053_v60, %v5052_v58  ;;  %v5054_v62 = vld [vmem:[#allocation14 + $0x20] sm:$0xff] (%p433_p0) }
0x1488   : > { %11063 = vmatpush3.bf16.xpose.msk.msra.mxu0 %vm13194_vm3, %v11061_v63  ;;  %11117 = vmatpush3.bf16.msra.mxu1 (%p433_p0), %v13334_v61  ;;  %v5055_v63 = vld [vmem:[#allocation14 + $0x28] sm:$0xff] (%p433_p0) }
0x1489   : > { %11064 = vmatprep.subr.bf16.mxu0 %v11875_v59  ;;  %11118 = vmatprep.subr.bf16.mxu1 (%p433_p0), %v11879_v5  ;;  %v13341_v37 = vpack.c.bf16 (%p433_p0), %v5055_v63, %v5054_v62 }
0x148c   :  { %11120 = vmatpush3.bf16.msra.mxu1 (%p433_p0), %v13341_v37 }
0x148d   :  { %11121 = vmatprep.subr.bf16.mxu1 (%p433_p0), %v11879_v5 }
0x1490   : > { %11067 = vmatpush3.bf16.xpose.msk.msra.mxu0 %vm13194_vm3, %v11065_v1  ;;  %v5057_v1 = vld [vmem:[#allocation14 + $0x38] sm:$0xff] (%p433_p0) }
0x1491   : > { %11068 = vmatprep.subr.bf16.mxu0 %v11875_v59  ;;  %v5069_v59 = vld [vmem:[%s13732_s11] sm:$0xff] (%p433_p0)  ;;  %v13345_v32 = vpack.c.bf16 (%p433_p0), %v5057_v1, %v5056_v0  ;;  %s7515_s11 = sshll.u32 (%p433_p0), %s11882_s15, 4  ;;  %s7516_s11 = int_to_ptr.vmem [resolvable:$true] %s7515_s11 }
0x1492   :  { %v11072_v47 = vpack.c.bf16 (%p433_p0), %v5070_v42, %v5069_v59 }
0x1493   :  { %11123 = vmatpush3.bf16.msra.mxu1 (%p433_p0), %v13345_v32 }
0x1494   :  { %11136 = vmatprep.subr.bf16.mxu1 (%p433_p0), %v11879_v5 }
0x1498   : > { %11071 = vmatpush3.bf16.xpose.msk.msra.mxu0 %vm13194_vm3, %v11069_v34 }
0x1499   :  { %11073 = vmatprep.subr.bf16.mxu0 (%p433_p0), %v11072_v47 }
0x149f   : > { %9726 = vmatmul.mubr.msk.f32.vlgmr.msra.gmra.mrb[58].mxu0 %vm395_vm0, %v12241_v28  ;;  %v13296_v28 = vpack.c.bf16 (%p433_p0), %v5059_v26, %v5058_v25 }
0x14a0   :  { %11075 = vmatpush3.bf16.msra.mxu0 (%p433_p0), %v11072_v47 }
0x14a1   :  { %11077 = vmatprep.subr.bf16.mxu0 (%p433_p0), %v11076_v6 }
0x14a4   :  { %11079 = vmatpush3.bf16.msra.mxu0 (%p433_p0), %v11076_v6 }
0x14a5   :  { %11081 = vmatprep.subr.bf16.mxu0 (%p433_p0), %v11080_v14 }
0x14a8   :  { %11083 = vmatpush3.bf16.msra.mxu0 (%p433_p0), %v11080_v14 }
0x14a9   :  { %11085 = vmatprep.subr.bf16.mxu0 (%p433_p0), %v11084_v20 }
0x14ac   :  { %11087 = vmatpush3.bf16.msra.mxu0 (%p433_p0), %v11084_v20 }
0x14ad   :  { %11100 = vmatprep.subr.bf16.mxu0 (%p433_p0), %v11879_v5 }
0x156f   :  { %435 = sbr.rel (!%p433_p0) target bundleno = 337 (0x151), region = 168 }
0x1572   : > { %v5033_v39 = vpop.f32.mrb[58].mxu0 }
0x1573   : > { %v5034_v40 = vadd.f32 %v5033_v39, %v4939_v38  ;;  %v9727_v41 = vpop.f32.mrb[59].mxu0  ;;  %v9765_v38 = vpop.f32.mrb[1].mxu1 (%p433_p0) }
0x1575   : > { %5038 = vst.msk [vmem:[%s5037_s1] sm:$0x1] %vm665_vm2, %v5034_v40 }
0x157c   :  { %v5067_v11 = vld [vmem:[#allocation4] sm:$0xff]  ;;  %v5068_v27 = vld [vmem:[#allocation4 + $0x8] sm:$0x3] }
0x157d   :  { %9744 = vmatprep.mubr.msk.f32.mxu0 %vm395_vm0, %v5067_v11 }
0x157e   :  { %9745 = vmatmul.mubr.msk.f32.vlgmr.msra.gmra.mrb[0].mxu0 %vm395_vm0, %v5068_v27 }
0x157f   :  { %11102 = vmatpush3.bf16.msra.mxu0 %v13296_v28  ;;  %9782 = vmatprep.mubr.msk.f32.mxu0 %vm11880_vm4, %v11874_v2 }
0x1580   :  { %11103 = vmatprep.subr.bf16.mxu0 %v11879_v5 }
0x1583   :  { %11105 = vmatpush3.bf16.msra.mxu0 %v13307_v44 }
0x1584   :  { %11106 = vmatprep.subr.bf16.mxu0 %v11879_v5 }
0x1587   :  { %11108 = vmatpush3.bf16.msra.mxu0 %v13316_v49 }
0x1588   :  { %11109 = vmatprep.subr.bf16.mxu0 %v11879_v5 }
0x158b   :  { %11111 = vmatpush3.bf16.msra.mxu0 %v13320_v52 }
0x158c   :  { %11124 = vmatprep.subr.bf16.mxu0 %v11879_v5 }
0x158e   :  { %9783 = vmatmul.mubr.msk.f32.vlgmr.msra.gmra.mrb[2].mxu0 %vm395_vm0, %v5169_v56 }
0x158f   :  { %11126 = vmatpush3.bf16.msra.mxu0 %v13257_v10  ;;  %9820 = vmatprep.mubr.msk.f32.mxu0 %vm11880_vm4, %v11874_v2 }
0x1590   :  { %11127 = vmatprep.subr.bf16.mxu0 %v11879_v5 }
0x1593   :  { %11129 = vmatpush3.bf16.msra.mxu0 %v13270_v16 }
0x1594   :  { %11130 = vmatprep.subr.bf16.mxu0 %v11879_v5 }
0x1597   :  { %11132 = vmatpush3.bf16.msra.mxu0 %v13283_v21 }
0x1598   :  { %11133 = vmatprep.subr.bf16.mxu0 %v11879_v5 }
0x159b   :  { %11135 = vmatpush3.bf16.msra.mxu0 %v13293_v24 }
0x159c   :  { %11148 = vmatprep.subr.bf16.mxu0 %v11879_v5 }
0x1651   :  { %v9746_v34 = vpop.f32.mrb[0].mxu0 }
0x1652   :  { %v5162_v35 = vadd.f32 %v9746_v34, %v7694_v33  ;;  %v5156_v46 = vpop.f32.mrb[1].mxu0 }
0x1653   :  { %v5157_v36 = vadd.f32 %v7694_v33, %v5156_v46 }
0x1654   :  { %5167 = vst.msk [vmem:[#allocation5 + $0x8] sm:$0x3] %vm5166_vm5, %v5162_v35 }
0x1655   :  { %5165 = vst.msk [vmem:[#allocation5] sm:$0xff] %vm395_vm0, %v5157_v36 }
0x165c   :  { %v5170_v39 = vld [vmem:[#allocation5] sm:$0x1]  ;;  %v5395_v3 = vld [vmem:[#allocation5 + $0x1] sm:$0x1]  ;;  %v5617_v23 = vld [vmem:[#allocation5 + $0x2] sm:$0x1] }
0x165d   :  { %v5244_v40 = vadd.f32 %v5240_v57, %v5170_v39  ;;  %v5839_v51 = vld [vmem:[#allocation5 + $0x3] sm:$0x1]  ;;  %v6061_v57 = vld [vmem:[#allocation5 + $0x4] sm:$0x1] }
0x165f   :  { %11590 = vtanh.f32 %v5244_v40 }
0x1661   :  { %v5315_v59 = vpop.f32.mrb[2].mxu0 }
0x1662   :  { %v9784_v42 = vpop.f32.mrb[3].mxu0 }
0x1669   :  { %v11591_v41 = vpop.eup %11590 }
0x166a   :  { %9802 = vmatmul.mubr.msk.f32.vlgmr.msra.gmra.mrb[2].mxu1 %vm395_vm0, %v11591_v41  ;;  %9821 = vmatmul.mubr.msk.f32.vlgmr.msra.gmra.mrb[4].mxu0 %vm395_vm0, %v11591_v41 }
0x166b   :  { %11150 = vmatpush3.bf16.msra.mxu0 %v13324_v55  ;;  %11138 = vmatpush3.bf16.msra.mxu1 %v13296_v28 }
0x166c   :  { %11151 = vmatprep.subr.bf16.mxu0 %v11879_v5  ;;  %11139 = vmatprep.subr.bf16.mxu1 %v11879_v5 }
0x166d   :  { %9858 = vmatprep.mubr.msk.f32.mxu0 %vm11880_vm4, %v11874_v2  ;;  %9839 = vmatprep.mubr.msk.f32.mxu1 %vm11880_vm4, %v11874_v2 }
0x166f   :  { %11153 = vmatpush3.bf16.msra.mxu0 %v13334_v61  ;;  %11141 = vmatpush3.bf16.msra.mxu1 %v13307_v44 }
0x1670   :  { %11154 = vmatprep.subr.bf16.mxu0 %v11879_v5  ;;  %11142 = vmatprep.subr.bf16.mxu1 %v11879_v5 }
0x1673   :  { %11156 = vmatpush3.bf16.msra.mxu0 %v13341_v37  ;;  %11144 = vmatpush3.bf16.msra.mxu1 %v13316_v49 }
0x1674   :  { %11157 = vmatprep.subr.bf16.mxu0 %v11879_v5  ;;  %11145 = vmatprep.subr.bf16.mxu1 %v11879_v5 }
0x1677   :  { %11159 = vmatpush3.bf16.msra.mxu0 %v13345_v32  ;;  %11147 = vmatpush3.bf16.msra.mxu1 %v13320_v52 }
0x1678   :  { %11160 = vmatprep.subr.bf16.mxu1 %v11879_v5  ;;  %11172 = vmatprep.subr.bf16.mxu0 %v11879_v5 }
0x173d   :  { %v5388_v47 = vpop.f32.mrb[2].mxu1  ;;  %v5462_v4 = vpop.f32.mrb[4].mxu0 }
0x173e   :  { %v5389_v6 = vadd.f32 %v5388_v47, %v5315_v59  ;;  %v5466_v7 = vadd.f32 %v5462_v4, %v5395_v3  ;;  %v9803_v8 = vpop.f32.mrb[3].mxu1  ;;  %v9822_v9 = vpop.f32.mrb[5].mxu0 }
0x1740   :  { %v5392_v11 = vadd.f32 %v5389_v6, %v13377_v43  ;;  %11592 = vtanh.f32 %v5466_v7  ;;  %v6283_v6 = vld [vmem:[#allocation5 + $0x5] sm:$0x1] }
0x1742   :  { %11594 = vtanh.f32 %v5392_v11 }
0x174a   :  { %v11593_v12 = vpop.eup %11592 }
0x174b   :  { %9859 = vmatmul.mubr.msk.f32.vlgmr.msra.gmra.mrb[6].mxu0 %vm395_vm0, %v11593_v12 }
0x174c   :  { %v11595_v13 = vpop.eup %11594  ;;  %11174 = vmatpush3.bf16.msra.mxu0 %v13296_v28  ;;  %9896 = vmatprep.mubr.msk.f32.mxu0 %vm11880_vm4, %v11874_v2 }
0x174d   :  { %5394 = vst.msk [vmem:[#allocation6] sm:$0x1] %vm665_vm2, %v11595_v13  ;;  %9840 = vmatmul.mubr.msk.f32.vlgmr.msra.gmra.mrb[4].mxu1 %vm395_vm0, %v11595_v13  ;;  %11175 = vmatprep.subr.bf16.mxu0 %v11879_v5 }
0x174e   :  { %11162 = vmatpush3.bf16.msra.mxu1 %v13257_v10  ;;  %9877 = vmatprep.mubr.msk.f32.mxu1 %vm11880_vm4, %v11874_v2 }
0x174f   :  { %11163 = vmatprep.subr.bf16.mxu1 %v11879_v5 }
0x1750   :  { %11177 = vmatpush3.bf16.msra.mxu0 %v13307_v44 }
0x1751   :  { %11178 = vmatprep.subr.bf16.mxu0 %v11879_v5 }
0x1752   :  { %11165 = vmatpush3.bf16.msra.mxu1 %v13270_v16 }
0x1753   :  { %11166 = vmatprep.subr.bf16.mxu1 %v11879_v5 }
0x1754   :  { %11180 = vmatpush3.bf16.msra.mxu0 %v13316_v49 }
0x1755   :  { %11181 = vmatprep.subr.bf16.mxu0 %v11879_v5 }
0x1756   :  { %11168 = vmatpush3.bf16.msra.mxu1 %v13283_v21 }
0x1757   :  { %11169 = vmatprep.subr.bf16.mxu1 %v11879_v5 }
0x1758   :  { %11183 = vmatpush3.bf16.msra.mxu0 %v13320_v52 }
0x1759   :  { %11196 = vmatprep.subr.bf16.mxu0 %v11879_v5 }
0x175a   :  { %11171 = vmatpush3.bf16.msra.mxu1 %v13293_v24 }
0x175b   :  { %11184 = vmatprep.subr.bf16.mxu1 %v11879_v5 }
0x175d   :  { %9878 = vmatmul.mubr.msk.f32.vlgmr.msra.gmra.mrb[6].mxu1 %vm395_vm0, %v11593_v12 }
0x175e   :  { %11186 = vmatpush3.bf16.msra.mxu1 %v13324_v55  ;;  %9915 = vmatprep.mubr.msk.f32.mxu1 %vm11880_vm4, %v11874_v2 }
0x175f   :  { %11187 = vmatprep.subr.bf16.mxu1 %v11879_v5 }
0x1762   :  { %11189 = vmatpush3.bf16.msra.mxu1 %v13334_v61 }
0x1763   :  { %11190 = vmatprep.subr.bf16.mxu1 %v11879_v5 }
0x1766   :  { %11192 = vmatpush3.bf16.msra.mxu1 %v13341_v37 }
0x1767   :  { %11193 = vmatprep.subr.bf16.mxu1 %v11879_v5 }
0x176a   :  { %11195 = vmatpush3.bf16.msra.mxu1 %v13345_v32 }
0x176b   :  { %11208 = vmatprep.subr.bf16.mxu1 %v11879_v5 }
0x181e   :  { %v5610_v14 = vpop.f32.mrb[6].mxu0 }
0x181f   :  { %v9860_v15 = vpop.f32.mrb[7].mxu0 }
0x1820   :  { %v5537_v17 = vpop.f32.mrb[4].mxu1 }
0x1821   :  { %v5611_v18 = vadd.f32 %v5610_v14, %v5537_v17  ;;  %v9841_v19 = vpop.f32.mrb[5].mxu1 }
0x1823   :  { %v5614_v20 = vadd.f32 %v5611_v18, %v13377_v43 }
0x1825   :  { %11596 = vtanh.f32 %v5614_v20 }
0x182f   :  { %v11597_v22 = vpop.eup %11596 }
0x1830   :  { %5616 = vst.msk [vmem:[#allocation6 + $0x1] sm:$0x1] %vm665_vm2, %v11597_v22  ;;  %v5684_v25 = vpop.f32.mrb[6].mxu1  ;;  %9897 = vmatmul.mubr.msk.f32.vlgmr.msra.gmra.mrb[8].mxu0 %vm395_vm0, %v11597_v22  ;;  %v6505_v22 = vld [vmem:[#allocation5 + $0x6] sm:$0x1] }
0x1831   :  { %v5688_v26 = vadd.f32 %v5684_v25, %v5617_v23  ;;  %v9879_v27 = vpop.f32.mrb[7].mxu1  ;;  %11198 = vmatpush3.bf16.msra.mxu0 %v13257_v10  ;;  %9934 = vmatprep.mubr.msk.f32.mxu0 %vm11880_vm4, %v11874_v2 }
0x1832   :  { %11199 = vmatprep.subr.bf16.mxu0 %v11879_v5 }
0x1833   :  { %11598 = vtanh.f32 %v5688_v26 }
0x1835   :  { %11201 = vmatpush3.bf16.msra.mxu0 %v13270_v16 }
0x1836   :  { %11202 = vmatprep.subr.bf16.mxu0 %v11879_v5 }
0x1839   :  { %11204 = vmatpush3.bf16.msra.mxu0 %v13283_v21 }
0x183a   :  { %11205 = vmatprep.subr.bf16.mxu0 %v11879_v5 }
0x183d   :  { %v11599_v29 = vpop.eup %11598  ;;  %11207 = vmatpush3.bf16.msra.mxu0 %v13293_v24 }
0x183e   :  { %9916 = vmatmul.mubr.msk.f32.vlgmr.msra.gmra.mrb[8].mxu1 %vm395_vm0, %v11599_v29  ;;  %11220 = vmatprep.subr.bf16.mxu0 %v11879_v5 }
0x183f   :  { %11210 = vmatpush3.bf16.msra.mxu1 %v13296_v28  ;;  %9953 = vmatprep.mubr.msk.f32.mxu1 %vm11880_vm4, %v11874_v2 }
0x1840   :  { %9935 = vmatmul.mubr.msk.f32.vlgmr.msra.gmra.mrb[10].mxu0 %vm395_vm0, %v11599_v29  ;;  %11211 = vmatprep.subr.bf16.mxu1 %v11879_v5 }
0x1841   :  { %11222 = vmatpush3.bf16.msra.mxu0 %v13324_v55  ;;  %9972 = vmatprep.mubr.msk.f32.mxu0 %vm11880_vm4, %v11874_v2 }
0x1842   :  { %11223 = vmatprep.subr.bf16.mxu0 %v11879_v5 }
0x1843   :  { %11213 = vmatpush3.bf16.msra.mxu1 %v13307_v44 }
0x1844   :  { %11214 = vmatprep.subr.bf16.mxu1 %v11879_v5 }
0x1845   :  { %11225 = vmatpush3.bf16.msra.mxu0 %v13334_v61 }
0x1846   :  { %11226 = vmatprep.subr.bf16.mxu0 %v11879_v5 }
0x1847   :  { %11216 = vmatpush3.bf16.msra.mxu1 %v13316_v49 }
0x1848   :  { %11217 = vmatprep.subr.bf16.mxu1 %v11879_v5 }
0x1849   :  { %11228 = vmatpush3.bf16.msra.mxu0 %v13341_v37 }
0x184a   :  { %11229 = vmatprep.subr.bf16.mxu0 %v11879_v5 }
0x184b   :  { %11219 = vmatpush3.bf16.msra.mxu1 %v13320_v52 }
0x184c   :  { %11232 = vmatprep.subr.bf16.mxu1 %v11879_v5 }
0x184d   :  { %11231 = vmatpush3.bf16.msra.mxu0 %v13345_v32 }
0x184e   :  { %11244 = vmatprep.subr.bf16.mxu0 %v11879_v5 }
0x1903   :  { %v5759_v31 = vpop.f32.mrb[8].mxu0 }
0x1904   :  { %v9898_v30 = vpop.f32.mrb[9].mxu0 }
0x1911   :  { %v5832_v48 = vpop.f32.mrb[8].mxu1 }
0x1912   :  { %v5833_v45 = vadd.f32 %v5832_v48, %v5759_v31  ;;  %v9917_v50 = vpop.f32.mrb[9].mxu1 }
0x1913   :  { %v5906_v53 = vpop.f32.mrb[10].mxu0 }
0x1914   :  { %v5836_v54 = vadd.f32 %v5833_v45, %v13377_v43  ;;  %v5910_v56 = vadd.f32 %v5906_v53, %v5839_v51  ;;  %v9936_v58 = vpop.f32.mrb[11].mxu0  ;;  %v6727_v51 = vld [vmem:[#allocation5 + $0x7] sm:$0x1] }
0x1916   :  { %11600 = vtanh.f32 %v5836_v54 }
0x1917   :  { %11602 = vtanh.f32 %v5910_v56 }
0x1920   :  { %v11601_v60 = vpop.eup %11600 }
0x1921   :  { %v11603_v62 = vpop.eup %11602  ;;  %5838 = vst.msk [vmem:[#allocation6 + $0x2] sm:$0x1] %vm665_vm2, %v11601_v60  ;;  %9954 = vmatmul.mubr.msk.f32.vlgmr.msra.gmra.mrb[10].mxu1 %vm395_vm0, %v11601_v60 }
0x1922   :  { %9973 = vmatmul.mubr.msk.f32.vlgmr.msra.gmra.mrb[12].mxu0 %vm395_vm0, %v11603_v62  ;;  %11234 = vmatpush3.bf16.msra.mxu1 %v13257_v10 }
0x1923   :  { %11235 = vmatprep.subr.bf16.mxu1 %v11879_v5  ;;  %9991 = vmatprep.mubr.msk.f32.mxu1 %vm11880_vm4, %v11874_v2 }
0x1924   :  { %11246 = vmatpush3.bf16.msra.mxu0 %v13296_v28  ;;  %10010 = vmatprep.mubr.msk.f32.mxu0 %vm11880_vm4, %v11874_v2 }
0x1925   :  { %11247 = vmatprep.subr.bf16.mxu0 %v11879_v5 }
0x1926   :  { %11237 = vmatpush3.bf16.msra.mxu1 %v13270_v16 }
0x1927   :  { %11238 = vmatprep.subr.bf16.mxu1 %v11879_v5 }
0x1928   :  { %11249 = vmatpush3.bf16.msra.mxu0 %v13307_v44 }
0x1929   :  { %11250 = vmatprep.subr.bf16.mxu0 %v11879_v5 }
0x192a   :  { %11240 = vmatpush3.bf16.msra.mxu1 %v13283_v21 }
0x192b   :  { %11241 = vmatprep.subr.bf16.mxu1 %v11879_v5 }
0x192c   :  { %11252 = vmatpush3.bf16.msra.mxu0 %v13316_v49 }
0x192d   :  { %11253 = vmatprep.subr.bf16.mxu0 %v11879_v5 }
0x192e   :  { %11243 = vmatpush3.bf16.msra.mxu1 %v13293_v24 }
0x192f   :  { %11256 = vmatprep.subr.bf16.mxu1 %v11879_v5 }
0x1930   :  { %11255 = vmatpush3.bf16.msra.mxu0 %v13320_v52 }
0x1931   :  { %9992 = vmatmul.mubr.msk.f32.vlgmr.msra.gmra.mrb[12].mxu1 %vm395_vm0, %v11603_v62  ;;  %11268 = vmatprep.subr.bf16.mxu0 %v11879_v5 }
0x1932   :  { %11258 = vmatpush3.bf16.msra.mxu1 %v13324_v55  ;;  %10029 = vmatprep.mubr.msk.f32.mxu1 %vm11880_vm4, %v11874_v2 }
0x1933   :  { %11259 = vmatprep.subr.bf16.mxu1 %v11879_v5 }
0x1936   :  { %11261 = vmatpush3.bf16.msra.mxu1 %v13334_v61 }
0x1937   :  { %11262 = vmatprep.subr.bf16.mxu1 %v11879_v5 }
0x193a   :  { %11264 = vmatpush3.bf16.msra.mxu1 %v13341_v37 }
0x193b   :  { %11265 = vmatprep.subr.bf16.mxu1 %v11879_v5 }
0x193e   :  { %11267 = vmatpush3.bf16.msra.mxu1 %v13345_v32 }
0x193f   :  { %11280 = vmatprep.subr.bf16.mxu1 %v11879_v5 }
0x19f4   :  { %v5981_v63 = vpop.f32.mrb[10].mxu1 }
0x19f5   :  { %v6054_v0 = vpop.f32.mrb[12].mxu0  ;;  %v9955_v1 = vpop.f32.mrb[11].mxu1 }
0x19f6   :  { %v6055_v33 = vadd.f32 %v6054_v0, %v5981_v63  ;;  %v9974_v34 = vpop.f32.mrb[13].mxu0 }
0x19f8   :  { %v6058_v35 = vadd.f32 %v6055_v33, %v13377_v43 }
0x19fa   :  { %11604 = vtanh.f32 %v6058_v35 }
0x1a04   :  { %v11605_v46 = vpop.eup %11604  ;;  %v6128_v36 = vpop.f32.mrb[12].mxu1 }
0x1a05   :  { %6060 = vst.msk [vmem:[#allocation6 + $0x3] sm:$0x1] %vm665_vm2, %v11605_v46  ;;  %v6132_v38 = vadd.f32 %v6128_v36, %v6061_v57  ;;  %v9993_v39 = vpop.f32.mrb[13].mxu1  ;;  %10011 = vmatmul.mubr.msk.f32.vlgmr.msra.gmra.mrb[14].mxu0 %vm395_vm0, %v11605_v46  ;;  %v6949_v46 = vld [vmem:[#allocation5 + $0x8] sm:$0x1] }
0x1a06   :  { %11270 = vmatpush3.bf16.msra.mxu0 %v13257_v10  ;;  %10048 = vmatprep.mubr.msk.f32.mxu0 %vm11880_vm4, %v11874_v2 }
0x1a07   :  { %11606 = vtanh.f32 %v6132_v38  ;;  %11271 = vmatprep.subr.bf16.mxu0 %v11879_v5 }
0x1a0a   :  { %11273 = vmatpush3.bf16.msra.mxu0 %v13270_v16 }
0x1a0b   :  { %11274 = vmatprep.subr.bf16.mxu0 %v11879_v5 }
0x1a0e   :  { %11276 = vmatpush3.bf16.msra.mxu0 %v13283_v21 }
0x1a0f   :  { %11277 = vmatprep.subr.bf16.mxu0 %v11879_v5 }
0x1a11   :  { %v11607_v40 = vpop.eup %11606 }
0x1a12   :  { %11279 = vmatpush3.bf16.msra.mxu0 %v13293_v24  ;;  %10030 = vmatmul.mubr.msk.f32.vlgmr.msra.gmra.mrb[14].mxu1 %vm395_vm0, %v11607_v40 }
0x1a13   :  { %11282 = vmatpush3.bf16.msra.mxu1 %v13296_v28  ;;  %11292 = vmatprep.subr.bf16.mxu0 %v11879_v5 }
0x1a14   :  { %11283 = vmatprep.subr.bf16.mxu1 %v11879_v5  ;;  %10067 = vmatprep.mubr.msk.f32.mxu1 %vm11880_vm4, %v11874_v2 }
0x1a15   :  { %10049 = vmatmul.mubr.msk.f32.vlgmr.msra.gmra.mrb[16].mxu0 %vm395_vm0, %v11607_v40 }
0x1a16   :  { %11294 = vmatpush3.bf16.msra.mxu0 %v13324_v55  ;;  %10086 = vmatprep.mubr.msk.f32.mxu0 %vm11880_vm4, %v11874_v2 }
0x1a17   :  { %11285 = vmatpush3.bf16.msra.mxu1 %v13307_v44  ;;  %11295 = vmatprep.subr.bf16.mxu0 %v11879_v5 }
0x1a18   :  { %11286 = vmatprep.subr.bf16.mxu1 %v11879_v5 }
0x1a1a   :  { %11297 = vmatpush3.bf16.msra.mxu0 %v13334_v61 }
0x1a1b   :  { %11288 = vmatpush3.bf16.msra.mxu1 %v13316_v49  ;;  %11298 = vmatprep.subr.bf16.mxu0 %v11879_v5 }
0x1a1c   :  { %11289 = vmatprep.subr.bf16.mxu1 %v11879_v5 }
0x1a1e   :  { %11300 = vmatpush3.bf16.msra.mxu0 %v13341_v37 }
0x1a1f   :  { %11291 = vmatpush3.bf16.msra.mxu1 %v13320_v52  ;;  %11301 = vmatprep.subr.bf16.mxu0 %v11879_v5 }
0x1a20   :  { %11304 = vmatprep.subr.bf16.mxu1 %v11879_v5 }
0x1a22   :  { %11303 = vmatpush3.bf16.msra.mxu0 %v13345_v32 }
0x1a23   :  { %11316 = vmatprep.subr.bf16.mxu0 %v11879_v5 }
0x1ad8   :  { %v6203_v41 = vpop.f32.mrb[14].mxu0 }
0x1ad9   :  { %v10012_v59 = vpop.f32.mrb[15].mxu0 }
0x1ada   :  { %v7399_v59 = vld [vmem:[%s13738_s17 + $0x10] sm:$0xff] }
0x1ae5   :  { %v6276_v42 = vpop.f32.mrb[14].mxu1 }
0x1ae6   :  { %v6277_v47 = vadd.f32 %v6276_v42, %v6203_v41  ;;  %v10031_v3 = vpop.f32.mrb[15].mxu1  ;;  %v7400_v42 = vld [vmem:[%s13738_s17 + $0x18] sm:$0xff] }
0x1ae7   :  { %v7401_v3 = vld [vmem:[%s13738_s17 + $0x20] sm:$0xff] }
0x1ae8   :  { %v6280_v4 = vadd.f32 %v6277_v47, %v13377_v43  ;;  %v6350_v7 = vpop.f32.mrb[16].mxu0  ;;  %v11452_v47 = vpack.c.bf16 %v7400_v42, %v7399_v59 }
0x1ae9   :  { %v6354_v8 = vadd.f32 %v6350_v7, %v6283_v6  ;;  %v10050_v9 = vpop.f32.mrb[17].mxu0  ;;  %v7403_v7 = vld [vmem:[%s13738_s17 + $0x30] sm:$0xff] }
0x1aea   :  { %11608 = vtanh.f32 %v6280_v4  ;;  %v7402_v4 = vld [vmem:[%s13738_s17 + $0x28] sm:$0xff] }
0x1aeb   :  { %11610 = vtanh.f32 %v6354_v8  ;;  %v11456_v6 = vpack.c.bf16 %v7402_v4, %v7401_v3  ;;  %v7404_v8 = vld [vmem:[%s13738_s17 + $0x38] sm:$0xff] }
0x1aec   :  { %v11460_v9 = vpack.c.bf16 %v7404_v8, %v7403_v7 }
0x1af4   :  { %v11609_v11 = vpop.eup %11608 }
0x1af5   :  { %v11611_v12 = vpop.eup %11610  ;;  %6282 = vst.msk [vmem:[#allocation6 + $0x4] sm:$0x1] %vm665_vm2, %v11609_v11  ;;  %10068 = vmatmul.mubr.msk.f32.vlgmr.msra.gmra.mrb[16].mxu1 %vm395_vm0, %v11609_v11 }
0x1af6   :  { %10087 = vmatmul.mubr.msk.f32.vlgmr.msra.gmra.mrb[18].mxu0 %vm395_vm0, %v11611_v12  ;;  %11306 = vmatpush3.bf16.msra.mxu1 %v13257_v10 }
0x1af7   :  { %11307 = vmatprep.subr.bf16.mxu1 %v11879_v5  ;;  %10105 = vmatprep.mubr.msk.f32.mxu1 %vm11880_vm4, %v11874_v2 }
0x1af8   :  { %11318 = vmatpush3.bf16.msra.mxu0 %v13296_v28  ;;  %10124 = vmatprep.mubr.msk.f32.mxu0 %vm11880_vm4, %v11874_v2 }
0x1af9   :  { %11319 = vmatprep.subr.bf16.mxu0 %v11879_v5 }
0x1afa   :  { %11309 = vmatpush3.bf16.msra.mxu1 %v13270_v16 }
0x1afb   :  { %11310 = vmatprep.subr.bf16.mxu1 %v11879_v5 }
0x1afc   :  { %11321 = vmatpush3.bf16.msra.mxu0 %v13307_v44 }
0x1afd   :  { %11322 = vmatprep.subr.bf16.mxu0 %v11879_v5 }
0x1afe   :  { %11312 = vmatpush3.bf16.msra.mxu1 %v13283_v21 }
0x1aff   :  { %11313 = vmatprep.subr.bf16.mxu1 %v11879_v5 }
0x1b00   :  { %11324 = vmatpush3.bf16.msra.mxu0 %v13316_v49 }
0x1b01   :  { %11325 = vmatprep.subr.bf16.mxu0 %v11879_v5 }
0x1b02   :  { %11315 = vmatpush3.bf16.msra.mxu1 %v13293_v24 }
0x1b03   :  { %11328 = vmatprep.subr.bf16.mxu1 %v11879_v5 }
0x1b04   :  { %11327 = vmatpush3.bf16.msra.mxu0 %v13320_v52 }
0x1b05   :  { %10106 = vmatmul.mubr.msk.f32.vlgmr.msra.gmra.mrb[18].mxu1 %vm395_vm0, %v11611_v12  ;;  %11340 = vmatprep.subr.bf16.mxu0 %v11879_v5 }
0x1b06   :  { %11330 = vmatpush3.bf16.msra.mxu1 %v13324_v55  ;;  %10143 = vmatprep.mubr.msk.f32.mxu1 %vm11880_vm4, %v11874_v2 }
0x1b07   :  { %11331 = vmatprep.subr.bf16.mxu1 %v11879_v5 }
0x1b0a   :  { %11333 = vmatpush3.bf16.msra.mxu1 %v13334_v61 }
0x1b0b   :  { %11334 = vmatprep.subr.bf16.mxu1 %v11879_v5 }
0x1b0e   :  { %11336 = vmatpush3.bf16.msra.mxu1 %v13341_v37 }
0x1b0f   :  { %11337 = vmatprep.subr.bf16.mxu1 %v11879_v5 }
0x1b12   :  { %11339 = vmatpush3.bf16.msra.mxu1 %v13345_v32 }
0x1b13   :  { %11352 = vmatprep.subr.bf16.mxu1 %v11879_v5 }
0x1bc8   :  { %v6425_v13 = vpop.f32.mrb[16].mxu1 }
0x1bc9   :  { %v6498_v14 = vpop.f32.mrb[18].mxu0  ;;  %v10069_v15 = vpop.f32.mrb[17].mxu1 }
0x1bca   :  { %v6499_v17 = vadd.f32 %v6498_v14, %v6425_v13  ;;  %v10088_v18 = vpop.f32.mrb[19].mxu0 }
0x1bcc   :  { %v6502_v19 = vadd.f32 %v6499_v17, %v13377_v43 }
0x1bce   :  { %11612 = vtanh.f32 %v6502_v19 }
0x1bd8   :  { %v11613_v20 = vpop.eup %11612  ;;  %v6572_v23 = vpop.f32.mrb[18].mxu1 }
0x1bd9   :  { %6504 = vst.msk [vmem:[#allocation6 + $0x5] sm:$0x1] %vm665_vm2, %v11613_v20  ;;  %v6576_v25 = vadd.f32 %v6572_v23, %v6505_v22  ;;  %v10107_v26 = vpop.f32.mrb[19].mxu1  ;;  %10125 = vmatmul.mubr.msk.f32.vlgmr.msra.gmra.mrb[20].mxu0 %vm395_vm0, %v11613_v20 }
0x1bda   :  { %11342 = vmatpush3.bf16.msra.mxu0 %v13257_v10  ;;  %10162 = vmatprep.mubr.msk.f32.mxu0 %vm11880_vm4, %v11874_v2 }
0x1bdb   :  { %11614 = vtanh.f32 %v6576_v25  ;;  %11343 = vmatprep.subr.bf16.mxu0 %v11879_v5 }
0x1bde   :  { %11345 = vmatpush3.bf16.msra.mxu0 %v13270_v16 }
0x1bdf   :  { %11346 = vmatprep.subr.bf16.mxu0 %v11879_v5 }
0x1be2   :  { %11348 = vmatpush3.bf16.msra.mxu0 %v13283_v21 }
0x1be3   :  { %11349 = vmatprep.subr.bf16.mxu0 %v11879_v5 }
0x1be5   :  { %v11615_v27 = vpop.eup %11614 }
0x1be6   :  { %11351 = vmatpush3.bf16.msra.mxu0 %v13293_v24  ;;  %10144 = vmatmul.mubr.msk.f32.vlgmr.msra.gmra.mrb[20].mxu1 %vm395_vm0, %v11615_v27 }
0x1be7   :  { %11354 = vmatpush3.bf16.msra.mxu1 %v13296_v28  ;;  %11364 = vmatprep.subr.bf16.mxu0 %v11879_v5 }
0x1be8   :  { %11355 = vmatprep.subr.bf16.mxu1 %v11879_v5  ;;  %10181 = vmatprep.mubr.msk.f32.mxu1 %vm11880_vm4, %v11874_v2 }
0x1be9   :  { %10163 = vmatmul.mubr.msk.f32.vlgmr.msra.gmra.mrb[22].mxu0 %vm395_vm0, %v11615_v27 }
0x1bea   :  { %11366 = vmatpush3.bf16.msra.mxu0 %v13324_v55  ;;  %10200 = vmatprep.mubr.msk.f32.mxu0 %vm11880_vm4, %v11874_v2 }
0x1beb   :  { %11357 = vmatpush3.bf16.msra.mxu1 %v13307_v44  ;;  %11367 = vmatprep.subr.bf16.mxu0 %v11879_v5 }
0x1bec   :  { %11358 = vmatprep.subr.bf16.mxu1 %v11879_v5 }
0x1bee   :  { %11369 = vmatpush3.bf16.msra.mxu0 %v13334_v61 }
0x1bef   :  { %11360 = vmatpush3.bf16.msra.mxu1 %v13316_v49  ;;  %11370 = vmatprep.subr.bf16.mxu0 %v11879_v5 }
0x1bf0   :  { %11361 = vmatprep.subr.bf16.mxu1 %v11879_v5 }
0x1bf2   :  { %11372 = vmatpush3.bf16.msra.mxu0 %v13341_v37 }
0x1bf3   :  { %11363 = vmatpush3.bf16.msra.mxu1 %v13320_v52  ;;  %11373 = vmatprep.subr.bf16.mxu0 %v11879_v5 }
0x1bf4   :  { %11376 = vmatprep.subr.bf16.mxu1 %v11879_v5 }
0x1bf6   :  { %11375 = vmatpush3.bf16.msra.mxu0 %v13345_v32 }
0x1bf7   :  { %11388 = vmatprep.subr.bf16.mxu0 %v11879_v5 }
0x1cac   :  { %v6647_v29 = vpop.f32.mrb[20].mxu0 }
0x1cad   :  { %v10126_v31 = vpop.f32.mrb[21].mxu0 }
0x1cb9   :  { %v6720_v30 = vpop.f32.mrb[20].mxu1 }
0x1cba   :  { %v6721_v48 = vadd.f32 %v6720_v30, %v6647_v29  ;;  %v10145_v45 = vpop.f32.mrb[21].mxu1 }
0x1cbc   :  { %v6724_v50 = vadd.f32 %v6721_v48, %v13377_v43  ;;  %v6794_v53 = vpop.f32.mrb[22].mxu0 }
0x1cbd   :  { %v6798_v54 = vadd.f32 %v6794_v53, %v6727_v51  ;;  %v10164_v56 = vpop.f32.mrb[23].mxu0 }
0x1cbe   :  { %11616 = vtanh.f32 %v6724_v50 }
0x1cbf   :  { %11618 = vtanh.f32 %v6798_v54 }
0x1cc8   :  { %v11617_v58 = vpop.eup %11616 }
0x1cc9   :  { %v11619_v60 = vpop.eup %11618  ;;  %6726 = vst.msk [vmem:[#allocation6 + $0x6] sm:$0x1] %vm665_vm2, %v11617_v58  ;;  %10182 = vmatmul.mubr.msk.f32.vlgmr.msra.gmra.mrb[22].mxu1 %vm395_vm0, %v11617_v58 }
0x1cca   :  { %10201 = vmatmul.mubr.msk.f32.vlgmr.msra.gmra.mrb[24].mxu0 %vm395_vm0, %v11619_v60  ;;  %11378 = vmatpush3.bf16.msra.mxu1 %v13257_v10 }
0x1ccb   :  { %11379 = vmatprep.subr.bf16.mxu1 %v11879_v5  ;;  %10219 = vmatprep.mubr.msk.f32.mxu1 %vm11880_vm4, %v11874_v2 }
0x1ccc   :  { %11390 = vmatpush3.bf16.msra.mxu0 %v13296_v28  ;;  %10238 = vmatprep.mubr.msk.f32.mxu0 %vm11880_vm4, %v11874_v2 }
0x1ccd   :  { %11391 = vmatprep.subr.bf16.mxu0 %v11879_v5 }
0x1cce   :  { %11381 = vmatpush3.bf16.msra.mxu1 %v13270_v16 }
0x1ccf   :  { %11382 = vmatprep.subr.bf16.mxu1 %v11879_v5 }
0x1cd0   :  { %11393 = vmatpush3.bf16.msra.mxu0 %v13307_v44 }
0x1cd1   :  { %11394 = vmatprep.subr.bf16.mxu0 %v11879_v5 }
0x1cd2   :  { %11384 = vmatpush3.bf16.msra.mxu1 %v13283_v21 }
0x1cd3   :  { %11385 = vmatprep.subr.bf16.mxu1 %v11879_v5 }
0x1cd4   :  { %11396 = vmatpush3.bf16.msra.mxu0 %v13316_v49 }
0x1cd5   :  { %11397 = vmatprep.subr.bf16.mxu0 %v11879_v5 }
0x1cd6   :  { %11387 = vmatpush3.bf16.msra.mxu1 %v13293_v24 }
0x1cd7   :  { %11400 = vmatprep.subr.bf16.mxu1 %v11879_v5 }
0x1cd8   :  { %11399 = vmatpush3.bf16.msra.mxu0 %v13320_v52 }
0x1cd9   :  { %10220 = vmatmul.mubr.msk.f32.vlgmr.msra.gmra.mrb[24].mxu1 %vm395_vm0, %v11619_v60  ;;  %11412 = vmatprep.subr.bf16.mxu0 %v11879_v5 }
0x1cda   :  { %11402 = vmatpush3.bf16.msra.mxu1 %v13324_v55  ;;  %10257 = vmatprep.mubr.msk.f32.mxu1 %vm11880_vm4, %v11874_v2 }
0x1cdb   :  { %11403 = vmatprep.subr.bf16.mxu1 %v11879_v5 }
0x1cde   :  { %11405 = vmatpush3.bf16.msra.mxu1 %v13334_v61 }
0x1cdf   :  { %11406 = vmatprep.subr.bf16.mxu1 %v11879_v5 }
0x1ce2   :  { %11408 = vmatpush3.bf16.msra.mxu1 %v13341_v37 }
0x1ce3   :  { %11409 = vmatprep.subr.bf16.mxu1 %v11879_v5 }
0x1ce6   :  { %11411 = vmatpush3.bf16.msra.mxu1 %v13345_v32 }
0x1ce7   :  { %11424 = vmatprep.subr.bf16.mxu1 %v11879_v5 }
0x1d9c   :  { %v6869_v62 = vpop.f32.mrb[22].mxu1 }
0x1d9d   :  { %v6942_v63 = vpop.f32.mrb[24].mxu0  ;;  %v10183_v0 = vpop.f32.mrb[23].mxu1 }
0x1d9e   :  { %v6943_v1 = vadd.f32 %v6942_v63, %v6869_v62  ;;  %v10202_v33 = vpop.f32.mrb[25].mxu0 }
0x1da0   :  { %v6946_v34 = vadd.f32 %v6943_v1, %v13377_v43 }
0x1da2   :  { %11620 = vtanh.f32 %v6946_v34 }
0x1dac   :  { %v11621_v35 = vpop.eup %11620  ;;  %v7016_v57 = vpop.f32.mrb[24].mxu1 }
0x1dad   :  { %6948 = vst.msk [vmem:[#allocation6 + $0x7] sm:$0x1] %vm665_vm2, %v11621_v35  ;;  %v7020_v36 = vadd.f32 %v7016_v57, %v6949_v46  ;;  %v10221_v38 = vpop.f32.mrb[25].mxu1  ;;  %10239 = vmatmul.mubr.msk.f32.vlgmr.msra.gmra.mrb[26].mxu0 %vm395_vm0, %v11621_v35 }
0x1dae   :  { %11414 = vmatpush3.bf16.msra.mxu0 %v13257_v10  ;;  %10276 = vmatprep.mubr.msk.f32.mxu0 %vm11880_vm4, %v11874_v2 }
0x1daf   :  { %11622 = vtanh.f32 %v7020_v36  ;;  %11415 = vmatprep.subr.bf16.mxu0 %v11879_v5 }
0x1db2   :  { %11417 = vmatpush3.bf16.msra.mxu0 %v13270_v16 }
0x1db3   :  { %11418 = vmatprep.subr.bf16.mxu0 %v11879_v5 }
0x1db6   :  { %11420 = vmatpush3.bf16.msra.mxu0 %v13283_v21 }
0x1db7   :  { %11421 = vmatprep.subr.bf16.mxu0 %v11879_v5 }
0x1db9   :  { %v11623_v39 = vpop.eup %11622 }
0x1dba   :  { %11423 = vmatpush3.bf16.msra.mxu0 %v13293_v24  ;;  %10258 = vmatmul.mubr.msk.f32.vlgmr.msra.gmra.mrb[26].mxu1 %vm395_vm0, %v11623_v39 }
0x1dbb   :  { %11436 = vmatprep.subr.bf16.mxu0 %v11879_v5  ;;  %11426 = vmatpush3.bf16.msra.mxu1 %v13296_v28 }
0x1dbc   :  { %11427 = vmatprep.subr.bf16.mxu1 %v11879_v5  ;;  %10295 = vmatprep.mubr.msk.f32.mxu1 %vm11880_vm4, %v11874_v2 }
0x1dbd   :  { %10277 = vmatmul.mubr.msk.f32.vlgmr.msra.gmra.mrb[28].mxu0 %vm395_vm0, %v11623_v39 }
0x1dbe   :  { %11438 = vmatpush3.bf16.msra.mxu0 %v13324_v55  ;;  %10314 = vmatprep.mubr.msk.f32.mxu0 %vm11880_vm4, %v11874_v2 }
0x1dbf   :  { %11439 = vmatprep.subr.bf16.mxu0 %v11879_v5  ;;  %11429 = vmatpush3.bf16.msra.mxu1 %v13307_v44  ;;  %v7171_v44 = vld [vmem:[#allocation5 + $0x9] sm:$0x1] }
0x1dc0   :  { %11430 = vmatprep.subr.bf16.mxu1 %v11879_v5 }
0x1dc2   :  { %11441 = vmatpush3.bf16.msra.mxu0 %v13334_v61 }
0x1dc3   :  { %11442 = vmatprep.subr.bf16.mxu0 %v11879_v5  ;;  %11432 = vmatpush3.bf16.msra.mxu1 %v13316_v49 }
0x1dc4   :  { %11433 = vmatprep.subr.bf16.mxu1 %v11879_v5 }
0x1dc6   :  { %11444 = vmatpush3.bf16.msra.mxu0 %v13341_v37 }
0x1dc7   :  { %11445 = vmatprep.subr.bf16.mxu0 %v11879_v5  ;;  %11435 = vmatpush3.bf16.msra.mxu1 %v13320_v52  ;;  %v7395_v5 = vld [vmem:[#allocation6] sm:$0xff]  ;;  %v7397_v52 = vld [vmem:[%s13738_s17] sm:$0xff] }
0x1dca   :  { %11447 = vmatpush3.bf16.msra.mxu0 %v13345_v32  ;;  %v7398_v32 = vld [vmem:[%s13738_s17 + $0x8] sm:$0xff]  ;;  %s11881_s17 = smov [#allocation20]  }
0x1dcb   :  { %v11448_v41 = vpack.c.bf16 %v7398_v32, %v7397_v52  ;;  %s7505_s6 = sshll.u32 %s11881_s17, 4  ;;  %s7506_s6 = int_to_ptr.vmem [resolvable:$true] %s7505_s6 }
0x1dcc   :  { %s11784_s8 = scalar_lea.vmem %s7506_s6, 32  ;;  %p11789_p2 = scmp.lt.s32.totalorder %s7506_s6, %s7506_s6 }
0x1dcd   :  { %11449 = vmatprep.subr.bf16.mxu1 %v11448_v41  ;;  %p11785_p1 = scmp.ne.s32.totalorder %s7506_s6, %s11784_s8  ;;  %p11790_p3 = scmp.lt.s32.totalorder %s11784_s8, %s11784_s8 }
0x1dcf   :  { %p11791_p4 = por %p11790_p3, %p11789_p2 }
0x1dd1   :  { %p11792_p5 = pnand %p11791_p4, %p11785_p1 }
0x1e80   :  { %v7091_v2 = vpop.f32.mrb[26].mxu0 }
0x1e81   :  { %v10240_v10 = vpop.f32.mrb[27].mxu0 }
0x1e8d   :  { %v7164_v16 = vpop.f32.mrb[26].mxu1 }
0x1e8e   :  { %v7165_v21 = vadd.f32 %v7164_v16, %v7091_v2  ;;  %v10259_v24 = vpop.f32.mrb[27].mxu1 }
0x1e90   :  { %v7168_v28 = vadd.f32 %v7165_v21, %v13377_v43  ;;  %v7238_v55 = vpop.f32.mrb[28].mxu0 }
0x1e91   :  { %v7242_v49 = vadd.f32 %v7238_v55, %v7171_v44  ;;  %v10278_v61 = vpop.f32.mrb[29].mxu0 }
0x1e92   :  { %11624 = vtanh.f32 %v7168_v28 }
0x1e93   :  { %11626 = vtanh.f32 %v7242_v49 }
0x1e9c   :  { %v11625_v37 = vpop.eup %11624 }
0x1e9d   :  { %v11627_v40 = vpop.eup %11626  ;;  %7170 = vst.msk [vmem:[#allocation6 + $0x8] sm:$0x1] %vm665_vm2, %v11625_v37  ;;  %10296 = vmatmul.mubr.msk.f32.vlgmr.msra.gmra.mrb[28].mxu1 %vm395_vm0, %v11625_v37 }
0x1e9e   :  { %7393 = vst.msk [vmem:[#allocation21] sm:$0x1] %vm665_vm2, %v11627_v40  ;;  %10315 = vmatmul.mubr.msk.f32.vlgmr.msra.gmra.mrb[30].mxu0 %vm395_vm0, %v11627_v40  ;;  %10333 = vmatprep.mubr.msk.f32.mxu1 %vm395_vm0, %v7395_v5 }
0x1e9f   :  { %11451 = vmatpush3.bf16.msra.mxu1 %v11448_v41 }
0x1ea0   :  { %11453 = vmatprep.subr.bf16.mxu1 %v11452_v47 }
0x1ea3   :  { %11455 = vmatpush3.bf16.msra.mxu1 %v11452_v47 }
0x1ea4   :  { %11457 = vmatprep.subr.bf16.mxu1 %v11456_v6 }
0x1ea7   :  { %11459 = vmatpush3.bf16.msra.mxu1 %v11456_v6 }
0x1ea8   :  { %11461 = vmatprep.subr.bf16.mxu1 %v11460_v9 }
0x1eab   :  { %11463 = vmatpush3.bf16.msra.mxu1 %v11460_v9 }
0x1f70   :  { %v7313_v11 = vpop.f32.mrb[28].mxu1 }
0x1f71   :  { %v7386_v12 = vpop.f32.mrb[30].mxu0  ;;  %v10297_v13 = vpop.f32.mrb[29].mxu1 }
0x1f72   :  { %v7387_v14 = vadd.f32 %v7386_v12, %v7313_v11  ;;  %v10316_v15 = vpop.f32.mrb[31].mxu0 }
0x1f74   :  { %v7390_v17 = vadd.f32 %v7387_v14, %v13377_v43 }
0x1f76   :  { %11628 = vtanh.f32 %v7390_v17 }
0x1f80   :  { %v11629_v18 = vpop.eup %11628 }
0x1f81   :  { %7392 = vst.msk [vmem:[#allocation6 + $0x9] sm:$0x1] %vm665_vm2, %v11629_v18  ;;  %7394 = vst.msk [vmem:[#allocation21 + $0x1] sm:$0x1] %vm665_vm2, %v11629_v18 }
0x1f88   :  { %v7396_v19 = vld [vmem:[#allocation6 + $0x8] sm:$0x3] }
0x1f89   :  { %10334 = vmatmul.mubr.msk.f32.vlgmr.msra.gmra.mrb[30].mxu1 %vm395_vm0, %v7396_v19 }
0x1f8a   :  { %11795 = shalt.err (!%p11792_p5)
}
0x1f8b   :  { %s11796_s5 = scalar_lea.hbm %s13741_s20, 32 }
0x1f8c   :  { %p11797_p6 = scmp.ne.s32.totalorder %s13741_s20, %s11796_s5  ;;  %p11800_p7 = scmp.lt.u32.totalorder %s11796_s5, %s13741_s20 }
0x1f8e   :  { %p11802_p8 = pnand %p11800_p7, %p11797_p6 }
0x1f90   :  { %11805 = shalt.err (!%p11802_p8)
}
0x1f91   :  { %7508 = dma.vmem_to_hbm [thread:$0]  %s7506_s6, 32, %s13741_s20, [#allocation10]  }
0x1f92   :  { %s11806_s12 = scalar_lea.vmem %s7516_s11, 32  ;;  %p11811_p10 = scmp.lt.s32.totalorder %s7516_s11, %s7516_s11 }
0x1f93   :  { %p11807_p9 = scmp.ne.s32.totalorder %s7516_s11, %s11806_s12  ;;  %p11812_p11 = scmp.lt.s32.totalorder %s11806_s12, %s11806_s12 }
0x1f95   :  { %p11813_p12 = por %p11812_p11, %p11811_p10 }
0x1f97   :  { %p11814_p13 = pnand %p11813_p12, %p11807_p9 }
0x1f99   :  { %11817 = shalt.err (!%p11814_p13)
}
0x1f9a   :  { %s11818_s29 = scalar_lea.hbm %s13742_s21, 32 }
0x1f9b   :  { %p11819_p0 = scmp.ne.s32.totalorder %s13742_s21, %s11818_s29  ;;  %p11822_p1 = scmp.lt.u32.totalorder %s11818_s29, %s13742_s21 }
0x1f9d   :  { %p11824_p2 = pnand %p11822_p1, %p11819_p0 }
0x1f9f   :  { %11827 = shalt.err (!%p11824_p2)
}
0x1fa0   :  { %7518 = dma.vmem_to_hbm [thread:$0]  %s7516_s11, 32, %s13742_s21, [#allocation22]   ;;  %v7727_v43 = vld [vmem:[#allocation19] ss:$0 sm:$0xff]  ;;  %vm7495_vm6 = vcmask 33792   ;;  %vm7493_vm7 = vcmask 39936  }
0x205c   :  { %v10335_v20 = vpop.f32.mrb[30].mxu1 }
0x205d   :  { %v7490_v22 = vadd.f32 %v10335_v20, %v7727_v43  ;;  %v7484_v23 = vpop.f32.mrb[31].mxu1 }
0x205e   :  { %v7485_v25 = vadd.f32 %v7727_v43, %v7484_v23 }
0x205f   :  { %7496 = vst.msk [vmem:[%s13740_s19 + $0x8] sm:$0x3] %vm7495_vm6, %v7490_v22 }
0x2060   :  { %7494 = vst.msk [vmem:[%s13740_s19] sm:$0xff] %vm7493_vm7, %v7485_v25 }
0x2061   :  { %11848 = dma.done.wait [#allocation10], 32  }
0x2062   :  { %11849 = vsyncadd [#allocation10], 4294967264 }
0x2063   :  { %11850 = dma.done.wait [#allocation22], 32  }
0x2064   :  { %11851 = vsyncadd [#allocation22], 4294967264 }
0x2065   :  { %7527 = vsyncpa [#allocation9], 1 }
0x2066   :  { %7528 = vsyncpa [#allocation12], 1 }
0x2067   :  { %7529 = vsyncpa [#allocation15], 1 }
0x2068   :  { %7530 = vsyncpa [#allocation18], 1 }
0x2069   :  { %7531 = vsyncpa [#allocation10], 1 }
0x206a   :  { %7532 = vsyncpa [#allocation22], 1 }

</bundles_post_ra>
